<compile_context>
chip_gen: v7x
topology: tpu7x:2x2x1
jax: 0.10.0
libtpu: 0.0.40
codegen_flags: <defaults>
</compile_context>

<pallas_src>
import math
from functools import partial

import jax
import jax.numpy as jnp
import numpy as np
from jax import lax
from jax.experimental import pallas as pl
from jax.experimental.pallas import tpu as pltpu


def _mha_kernel(q_ref, k_ref, v_ref, mq_ref, mk_ref,
                wqt_ref, bq_ref, wkt_ref, bk_ref, wvt_ref, bv_ref,
                wot_ref, bo_ref,
                out_ref, kc_ref, vc_ref,
                *, num_heads, compute_dtype, cache_kv, approx_recip):
    # Blocks per grid step (b, qi):
    #   q/out -> (1, Sq, E); k/v -> (1, S, E); mask_q -> (1, Sq, 1); mask_k -> (1, 1, S)
    #   weights (pre-transposed) -> (E, E); biases -> (1, E)
    #   scratch: kc/vc -> (S, E) projected K/V slabs (persist across qi steps)
    Sq = q_ref.shape[1]
    E = q_ref.shape[2]
    Dh = E // num_heads
    scale = 1.0 / math.sqrt(Dh)
    cdt = compute_dtype
    NEG = jnp.float32(-1e30)   # finite "masked" fill -> exp underflows to exactly 0

    # --- K/V projections, cached in VMEM scratch across the query tiles of a
    # batch row (qi axis is "arbitrary" in that mode).  Interleaved epilogues:
    # each f32 temp dies right after its cast/store.
    def _project_kv():
        kp = jnp.dot(k_ref[0], wkt_ref[...],
                     preferred_element_type=jnp.float32) + bk_ref[0]
        kc_ref[...] = kp.astype(cdt)
        vp = jnp.dot(v_ref[0], wvt_ref[...],
                     preferred_element_type=jnp.float32) + bv_ref[0]
        vc_ref[...] = vp.astype(cdt)

    if cache_kv:
        pl.when(pl.program_id(1) == 0)(_project_kv)
    else:
        _project_kv()

    # --- Q projection for this tile; 1/sqrt(Dh) folded into q once.
    qp = jnp.dot(q_ref[0], wqt_ref[...],
                 preferred_element_type=jnp.float32) + bq_ref[0]
    qc = (qp * scale).astype(cdt)

    # --- Mask math hoisted out of the head loop: one additive bias shared by all
    # heads + one (Sq,1) row-keep factor for fully-masked query rows.
    mq = mq_ref[0]                                                     # (Sq, 1) f32
    mk = mk_ref[0]                                                     # (1, S)  f32
    mbias = jnp.where(mq * mk == 0.0, NEG, jnp.float32(0.0))           # (Sq, S) f32
    keep_any = jnp.sum(jnp.abs(mk), axis=-1, keepdims=True) > 0.0      # (1, 1)
    row_keep = jnp.where(jnp.logical_and(mq != 0.0, keep_any),
                         jnp.float32(1.0), jnp.float32(0.0))           # (Sq, 1)

    # --- Heads: output projection fused into the loop -> lane-dense (Sq, E)
    # accumulation, no Dh-wide partial stores, no context slab round-trip.
    acc = jnp.zeros((Sq, E), jnp.float32)
    for h in range(num_heads):                       # static unroll (tiny H)
        sl = slice(h * Dh, (h + 1) * Dh)
        qh = qc[:, sl]                               # (Sq, Dh)
        kh = kc_ref[:, sl]                           # (S,  Dh)
        vh = vc_ref[:, sl]                           # (S,  Dh)

        # q . k^T without an in-kernel transpose: contract the last dims.
        scores = lax.dot_general(qh, kh, (((1,), (1,)), ((), ())),
                                 preferred_element_type=jnp.float32)   # (Sq, S)
        scores = scores + mbias

        # Softmax in f32.  Masked columns underflow exp() to exactly 0; the row
        # max always contributes exp(0)=1 so denom >= 1 (no divide-by-zero guard).
        s_max = jnp.max(scores, axis=-1, keepdims=True)
        e = jnp.exp(scores - s_max)
        denom = jnp.sum(e, axis=-1, keepdims=True)
        inv = pl.reciprocal(denom, approx=approx_recip)  # EUP slot when approx
        attn = (e * inv).astype(cdt)

        ctx_h = jnp.dot(attn, vh,
                        preferred_element_type=jnp.float32).astype(cdt)
        acc = acc + jnp.dot(ctx_h, wot_ref[sl, :],
                            preferred_element_type=jnp.float32)

    # Fully-masked query rows (mask_q == 0 or no keys kept) -> output bias only,
    # matching softmax -> nan_to_num(0) -> out_proj in the reference.
    out = acc * row_keep + bo_ref[0]
    out_ref[0] = out.astype(out_ref.dtype)


def _pick_q_tile(S):
    # Sq must be a multiple of 8 (sublane) and divide S (or equal S).
    # ~512-row tiles reach ~85% of HBM roofline on v6e; halve on v7x (64 MiB VMEM).
    # TODO(synk): query pltpu.get_tpu_info() to auto-halve the tile on v7x.
    if S <= 512:
        return S
    for t in (512, 384, 256, 128, 64, 32, 16, 8):
        if S % t == 0:
            return t
    return S


def masked_mha(query, key, value, input_patch_mask, params, num_heads, *,
               compute_dtype=jnp.bfloat16, q_tile=None, out_dtype=None,
               cache_kv=True, single_buffer_weights=True):
    """Pallas forward for MaskedMultiHeadAttention (eval-mode dropout)."""
    B, S, E = query.shape
    assert E % num_heads == 0, "embed_dim must be divisible by num_heads"
    wq, bq, wk, bk, wv, bv, wo, bo = params
    cdt = jnp.dtype(compute_dtype)
    odt = jnp.dtype(out_dtype) if out_dtype is not None else query.dtype

    if q_tile is None:
        q_tile = _pick_q_tile(S)
    assert S % q_tile == 0, "q_tile must divide seq_len"
    assert q_tile == S or q_tile % 8 == 0, "q_tile must be a multiple of 8"
    n_q = S // q_tile

    # One-time wrapper-side transposes + casts (plain XLA ops, not re-executed
    # per grid step).  Biases stay f32 (added after the f32 accumulation).
    wq_t = wq.T.astype(cdt)
    wk_t = wk.T.astype(cdt)
    wv_t = wv.T.astype(cdt)
    wo_t = wo.T.astype(cdt)
    bq2 = bq.reshape(1, E).astype(jnp.float32)
    bk2 = bk.reshape(1, E).astype(jnp.float32)
    bv2 = bv.reshape(1, E).astype(jnp.float32)
    bo2 = bo.reshape(1, E).astype(jnp.float32)

    q = query.astype(cdt)
    k = key.astype(cdt)
    v = value.astype(cdt)
    m_f32 = input_patch_mask.astype(jnp.float32)
    mask_q = m_f32[:, :, None]          # (B, S, 1) column layout, tiled over qi
    mask_k = m_f32[:, None, :]          # (B, 1, S) row layout, full per batch row

    q_spec = pl.BlockSpec((1, q_tile, E), lambda b, qi: (b, qi, 0))
    kv_spec = pl.BlockSpec((1, S, E), lambda b, qi: (b, 0, 0))
    mq_spec = pl.BlockSpec((1, q_tile, 1), lambda b, qi: (b, qi, 0))
    mk_spec = pl.BlockSpec((1, 1, S), lambda b, qi: (b, 0, 0))
    out_spec = pl.BlockSpec((1, q_tile, E), lambda b, qi: (b, qi, 0))
    if single_buffer_weights:
        # Constant block index -> never revisited -> the default second pipeline
        # buffer is pure VMEM waste; single-buffer the resident operands.
        w_spec = pl.BlockSpec((E, E), lambda b, qi: (0, 0),
                              pipeline_mode=pl.Buffered(1))
        b_spec = pl.BlockSpec((1, E), lambda b, qi: (0, 0),
                              pipeline_mode=pl.Buffered(1))
    else:
        w_spec = pl.BlockSpec((E, E), lambda b, qi: (0, 0))
        b_spec = pl.BlockSpec((1, E), lambda b, qi: (0, 0))

    # Explicit VMEM budget derived from the actual buffer plan (default scoped
    # limits are 16/32 MiB).  Capped at 64 MiB so the plan also fits v7x.
    cb = cdt.itemsize
    ob = jnp.dtype(odt).itemsize
    wbuf = 1 if single_buffer_weights else 2
    est = (2 * q_tile * E * cb                 # q tile (double-buffered)
           + 2 * 2 * S * E * cb                # k and v blocks
           + 2 * S * E * cb                    # projected K/V scratch slabs
           + wbuf * 4 * E * E * cb             # weights
           + wbuf * 4 * E * 4                  # biases
           + 2 * q_tile * E * ob               # output tile
           + 3 * q_tile * S * 4                # mask bias + scores + exp temporaries
           + q_tile * E * 4)                   # f32 output accumulator
    vmem_limit = int(min(max(2 * est, 32 * 1024 * 1024), 64 * 1024 * 1024))

    # cache_kv=True needs sequential qi within a batch row (scratch reuse);
    # cache_kv=False recomputes K/V per tile -> both axes fully parallel
    # (megacore-friendly on v7x when B is tiny).
    dims = ("parallel", "arbitrary") if cache_kv else ("parallel", "parallel")

    kernel = partial(_mha_kernel,
                     num_heads=num_heads,
                     compute_dtype=cdt,
                     cache_kv=cache_kv,
                     approx_recip=bool(cdt != jnp.dtype(jnp.float32)))

    return pl.pallas_call(
        kernel,
        grid=(B, n_q),
        in_specs=[q_spec, kv_spec, kv_spec, mq_spec, mk_spec,
                  w_spec, b_spec, w_spec, b_spec, w_spec, b_spec, w_spec, b_spec],
        out_specs=out_spec,
        out_shape=jax.ShapeDtypeStruct((B, S, E), odt),
        scratch_shapes=[pltpu.VMEM((S, E), cdt),    # projected K slab
                        pltpu.VMEM((S, E), cdt)],   # projected V slab
        compiler_params=pltpu.CompilerParams(
            dimension_semantics=dims,
            vmem_limit_bytes=vmem_limit),
    )(q, k, v, mask_q, mask_k, wq_t, bq2, wk_t, bk2, wv_t, bv2, wo_t, bo2)


def reference_mha(query, key, value, input_patch_mask, params, num_heads):
    """Pure-JAX reference mirroring the PyTorch forward (eval-mode dropout)."""
    B, S, E = query.shape
    head_dim = E // num_heads
    wq, bq, wk, bk, wv, bv, wo, bo = params

    def proj(x, w, b):
        return (x @ w.T + b).reshape(B, S, num_heads, head_dim).transpose(0, 2, 1, 3)

    q = proj(query, wq, bq)
    k = proj(key, wk, bk)
    v = proj(value, wv, bv)
    scores = jnp.einsum('bhqd,bhkd->bhqk', q, k) / math.sqrt(head_dim)
    mm = (input_patch_mask[:, :, None] * input_patch_mask[:, None, :])[:, None]
    scores = jnp.where(mm == 0, -jnp.inf, scores)
    s_max = jnp.max(scores, axis=-1, keepdims=True)
    e = jnp.exp(scores - s_max)
    attn = e / jnp.sum(e, axis=-1, keepdims=True)
    attn = jnp.where(jnp.isnan(attn), 0.0, attn)
    ctx = jnp.einsum('bhqk,bhkd->bhqd', attn, v)
    ctx = ctx.transpose(0, 2, 1, 3).reshape(B, S, E)
    return ctx @ wo.T + bo


def init_params(key, embed_dim):
    """Deterministic nn.Linear-style init: U(-1/sqrt(fan_in), 1/sqrt(fan_in))."""
    bound = 1.0 / math.sqrt(embed_dim)
    keys = jax.random.split(key, 8)
    params = []
    for i in range(4):
        w = jax.random.uniform(keys[2 * i], (embed_dim, embed_dim),
                               minval=-bound, maxval=bound, dtype=jnp.float32)
        b = jax.random.uniform(keys[2 * i + 1], (embed_dim,),
                               minval=-bound, maxval=bound, dtype=jnp.float32)
        params += [w, b]
    return tuple(params)


if __name__ == "__main__":
    B, S, E, H = 2, 16, 32, 4

    root = jax.random.PRNGKey(0)
    k_q, k_k, k_v, k_m, k_p = jax.random.split(root, 5)

    query = jax.random.normal(k_q, (B, S, E), dtype=jnp.float32)
    key_ = jax.random.normal(k_k, (B, S, E), dtype=jnp.float32)
    value = jax.random.normal(k_v, (B, S, E), dtype=jnp.float32)
    # Partial mask in batch 1 (masked keys + masked query rows) and a fully
    # masked batch 0 (exercises the "all keys masked -> bias only" path).
    input_patch_mask = jax.random.bernoulli(k_m, p=0.7, shape=(B, S)).astype(jnp.float32)
    input_patch_mask = input_patch_mask.at[0].set(0.0)

    params = init_params(k_p, E)
    ref = reference_mha(query, key_, value, input_patch_mask, params, H)

    # q_tile=8 -> 2 query tiles per batch row: exercises the Sq grid axis and the
    # cached-K/V path, while keeping (8,*) sublane-aligned blocks at this tiny S.
    kwargs = dict(q_tile=8)

    # Strict numerical check: f32 compute path must match the reference tightly.
    try:
        out_f32 = jax.block_until_ready(
            masked_mha(query, key_, value, input_patch_mask, params, H,
                       compute_dtype=jnp.float32, **kwargs))
    except Exception:
        # TODO(synk): pipeline_mode=pl.Buffered(1) unsupported on this jax/libtpu;
        # fall back to default double-buffered weight blocks (identical numerics).
        kwargs["single_buffer_weights"] = False
        out_f32 = jax.block_until_ready(
            masked_mha(query, key_, value, input_patch_mask, params, H,
                       compute_dtype=jnp.float32, **kwargs))
    np.testing.assert_allclose(np.asarray(out_f32), np.asarray(ref),
                               rtol=1e-5, atol=1e-5)

    # Performance path: bf16 MXU operands, f32 accumulation, approx reciprocal
    # (looser tolerance purely due to bf16 operand rounding).
    out_bf16 = jax.block_until_ready(
        masked_mha(query, key_, value, input_patch_mask, params, H,
                   compute_dtype=jnp.bfloat16, **kwargs))
    np.testing.assert_allclose(np.asarray(out_bf16), np.asarray(ref),
                               rtol=5e-2, atol=5e-2)

    # Recompute-K/V variant: fully ("parallel","parallel") grid (v7x megacore
    # when B is tiny); numerics identical to the cached path.
    out_nc = jax.block_until_ready(
        masked_mha(query, key_, value, input_patch_mask, params, H,
                   compute_dtype=jnp.float32, cache_kv=False, **kwargs))
    np.testing.assert_allclose(np.asarray(out_nc), np.asarray(ref),
                               rtol=1e-5, atol=1e-5)

    print("KERNEL_OK")
</pallas_src>

<mosaic_0001>
module attributes {stable_mosaic.version = 11 : i64} {
  func.func @_mha_kernel(%arg0: i32, %arg1: i32, %arg2: memref<1x8x32xf32, #tpu.memory_space<vmem>>, %arg3: memref<1x16x32xf32, #tpu.memory_space<vmem>>, %arg4: memref<1x16x32xf32, #tpu.memory_space<vmem>>, %arg5: memref<1x8x1xf32, #tpu.memory_space<vmem>>, %arg6: memref<1x1x16xf32, #tpu.memory_space<vmem>>, %arg7: memref<32x32xf32, #tpu.memory_space<vmem>>, %arg8: memref<1x32xf32, #tpu.memory_space<vmem>>, %arg9: memref<32x32xf32, #tpu.memory_space<vmem>>, %arg10: memref<1x32xf32, #tpu.memory_space<vmem>>, %arg11: memref<32x32xf32, #tpu.memory_space<vmem>>, %arg12: memref<1x32xf32, #tpu.memory_space<vmem>>, %arg13: memref<32x32xf32, #tpu.memory_space<vmem>>, %arg14: memref<1x32xf32, #tpu.memory_space<vmem>>, %arg15: memref<1x8x32xf32, #tpu.memory_space<vmem>>, %arg16: memref<16x32xf32, #tpu.memory_space<vmem>>, %arg17: memref<16x32xf32, #tpu.memory_space<vmem>>) attributes {dimension_semantics = [#tpu.dimension_semantics<parallel>, #tpu.dimension_semantics<arbitrary>], iteration_bounds = array<i64: 2, 2>, scalar_prefetch = 0 : i64, scratch_operands = 2 : i64, tpu.core_type = #tpu.core_type<tc>, window_params = [{transform_indices = @transform_0, window_bounds = array<i64: 1, 8, 32>}, {transform_indices = @transform_1, window_bounds = array<i64: 1, 16, 32>}, {transform_indices = @transform_2, window_bounds = array<i64: 1, 16, 32>}, {transform_indices = @transform_3, window_bounds = array<i64: 1, 8, 1>}, {transform_indices = @transform_4, window_bounds = array<i64: 1, 1, 16>}, {pipeline_mode = #tpu.pipeline_mode<synchronous>, transform_indices = @transform_5, window_bounds = array<i64: 32, 32>}, {pipeline_mode = #tpu.pipeline_mode<synchronous>, transform_indices = @transform_6, window_bounds = array<i64: 1, 32>}, {pipeline_mode = #tpu.pipeline_mode<synchronous>, transform_indices = @transform_7, window_bounds = array<i64: 32, 32>}, {pipeline_mode = #tpu.pipeline_mode<synchronous>, transform_indices = @transform_8, window_bounds = array<i64: 1, 32>}, {pipeline_mode = #tpu.pipeline_mode<synchronous>, transform_indices = @transform_9, window_bounds = array<i64: 32, 32>}, {pipeline_mode = #tpu.pipeline_mode<synchronous>, transform_indices = @transform_10, window_bounds = array<i64: 1, 32>}, {pipeline_mode = #tpu.pipeline_mode<synchronous>, transform_indices = @transform_11, window_bounds = array<i64: 32, 32>}, {pipeline_mode = #tpu.pipeline_mode<synchronous>, transform_indices = @transform_12, window_bounds = array<i64: 1, 32>}, {transform_indices = @transform_13, window_bounds = array<i64: 1, 8, 32>}]} {
    %c0_i32 = arith.constant 0 : i32
    %0 = arith.cmpi eq, %arg1, %c0_i32 : i32
    %1 = arith.extui %0 : i1 to i32
    %c0_i32_0 = arith.constant 0 : i32
    %2 = arith.cmpi ne, %1, %c0_i32_0 : i32
    scf.if %2 {
      %c0_69 = arith.constant 0 : index
      %c0_70 = arith.constant 0 : index
      %c0_71 = arith.constant 0 : index
      %125 = vector.load %arg3[%c0_69, %c0_70, %c0_71] : memref<1x16x32xf32, #tpu.memory_space<vmem>>, vector<1x16x32xf32>
      %126 = vector.shape_cast %125 : vector<1x16x32xf32> to vector<16x32xf32>
      %c0_72 = arith.constant 0 : index
      %c0_73 = arith.constant 0 : index
      %127 = vector.load %arg9[%c0_72, %c0_73] : memref<32x32xf32, #tpu.memory_space<vmem>>, vector<32x32xf32>
      %cst_74 = arith.constant dense<0.000000e+00> : vector<16x32xf32>
      %128 = tpu.matmul %126, %127, %cst_74 {dimension_numbers = #tpu.dot_dimension_numbers<[1], [0], [0], [1], [0, 0, 1, 1], [], []>} : vector<16x32xf32>, vector<32x32xf32>, vector<16x32xf32> -> vector<16x32xf32>
      %c0_75 = arith.constant 0 : index
      %c0_76 = arith.constant 0 : index
      %129 = vector.load %arg10[%c0_75, %c0_76] : memref<1x32xf32, #tpu.memory_space<vmem>>, vector<1x32xf32>
      %130 = vector.shape_cast %129 : vector<1x32xf32> to vector<32xf32>
      %131 = vector.shape_cast %130 : vector<32xf32> to vector<1x32xf32>
      %132 = vector.broadcast %131 : vector<1x32xf32> to vector<16x32xf32>
      %133 = arith.addf %128, %132 : vector<16x32xf32>
      %c0_77 = arith.constant 0 : index
      %c0_78 = arith.constant 0 : index
      %134 = vector.load %arg16[%c0_77, %c0_78] : memref<16x32xf32, #tpu.memory_space<vmem>>, vector<16x32xf32>
      tpu.vector_store %arg16[%c0_77, %c0_78], %133 {strides = array<i32>} : memref<16x32xf32, #tpu.memory_space<vmem>>, vector<16x32xf32>,
      %c0_79 = arith.constant 0 : index
      %c0_80 = arith.constant 0 : index
      %c0_81 = arith.constant 0 : index
      %135 = vector.load %arg4[%c0_79, %c0_80, %c0_81] : memref<1x16x32xf32, #tpu.memory_space<vmem>>, vector<1x16x32xf32>
      %136 = vector.shape_cast %135 : vector<1x16x32xf32> to vector<16x32xf32>
      %c0_82 = arith.constant 0 : index
      %c0_83 = arith.constant 0 : index
      %137 = vector.load %arg11[%c0_82, %c0_83] : memref<32x32xf32, #tpu.memory_space<vmem>>, vector<32x32xf32>
      %cst_84 = arith.constant dense<0.000000e+00> : vector<16x32xf32>
      %138 = tpu.matmul %136, %137, %cst_84 {dimension_numbers = #tpu.dot_dimension_numbers<[1], [0], [0], [1], [0, 0, 1, 1], [], []>} : vector<16x32xf32>, vector<32x32xf32>, vector<16x32xf32> -> vector<16x32xf32>
      %c0_85 = arith.constant 0 : index
      %c0_86 = arith.constant 0 : index
      %139 = vector.load %arg12[%c0_85, %c0_86] : memref<1x32xf32, #tpu.memory_space<vmem>>, vector<1x32xf32>
      %140 = vector.shape_cast %139 : vector<1x32xf32> to vector<32xf32>
      %141 = vector.shape_cast %140 : vector<32xf32> to vector<1x32xf32>
      %142 = vector.broadcast %141 : vector<1x32xf32> to vector<16x32xf32>
      %143 = arith.addf %138, %142 : vector<16x32xf32>
      %c0_87 = arith.constant 0 : index
      %c0_88 = arith.constant 0 : index
      %144 = vector.load %arg17[%c0_87, %c0_88] : memref<16x32xf32, #tpu.memory_space<vmem>>, vector<16x32xf32>
      tpu.vector_store %arg17[%c0_87, %c0_88], %143 {strides = array<i32>} : memref<16x32xf32, #tpu.memory_space<vmem>>, vector<16x32xf32>,
    } else {
    }
    %c0 = arith.constant 0 : index
    %c0_1 = arith.constant 0 : index
    %c0_2 = arith.constant 0 : index
    %3 = vector.load %arg2[%c0, %c0_1, %c0_2] : memref<1x8x32xf32, #tpu.memory_space<vmem>>, vector<1x8x32xf32>
    %4 = vector.shape_cast %3 : vector<1x8x32xf32> to vector<8x32xf32>
    %c0_3 = arith.constant 0 : index
    %c0_4 = arith.constant 0 : index
    %5 = vector.load %arg7[%c0_3, %c0_4] : memref<32x32xf32, #tpu.memory_space<vmem>>, vector<32x32xf32>
    %cst = arith.constant dense<0.000000e+00> : vector<8x32xf32>
    %6 = tpu.matmul %4, %5, %cst {dimension_numbers = #tpu.dot_dimension_numbers<[1], [0], [0], [1], [0, 0, 1, 1], [], []>} : vector<8x32xf32>, vector<32x32xf32>, vector<8x32xf32> -> vector<8x32xf32>
    %c0_5 = arith.constant 0 : index
    %c0_6 = arith.constant 0 : index
    %7 = vector.load %arg8[%c0_5, %c0_6] : memref<1x32xf32, #tpu.memory_space<vmem>>, vector<1x32xf32>
    %8 = vector.shape_cast %7 : vector<1x32xf32> to vector<32xf32>
    %9 = vector.shape_cast %8 : vector<32xf32> to vector<1x32xf32>
    %10 = vector.broadcast %9 : vector<1x32xf32> to vector<8x32xf32>
    %11 = arith.addf %6, %10 : vector<8x32xf32>
    %cst_7 = arith.constant 0.353553385 : f32
    %12 = vector.broadcast %cst_7 : f32 to vector<8x32xf32>
    %13 = arith.mulf %11, %12 : vector<8x32xf32>
    %c0_8 = arith.constant 0 : index
    %c0_9 = arith.constant 0 : index
    %c0_10 = arith.constant 0 : index
    %14 = vector.load %arg5[%c0_8, %c0_9, %c0_10] : memref<1x8x1xf32, #tpu.memory_space<vmem>>, vector<1x8x1xf32>
    %15 = vector.shape_cast %14 : vector<1x8x1xf32> to vector<8x1xf32>
    %c0_11 = arith.constant 0 : index
    %c0_12 = arith.constant 0 : index
    %c0_13 = arith.constant 0 : index
    %16 = vector.load %arg6[%c0_11, %c0_12, %c0_13] : memref<1x1x16xf32, #tpu.memory_space<vmem>>, vector<1x1x16xf32>
    %17 = vector.shape_cast %16 : vector<1x1x16xf32> to vector<1x16xf32>
    %18 = vector.broadcast %15 : vector<8x1xf32> to vector<8x16xf32>
    %19 = vector.broadcast %17 : vector<1x16xf32> to vector<8x16xf32>
    %20 = arith.mulf %18, %19 : vector<8x16xf32>
    %cst_14 = arith.constant 0.000000e+00 : f32
    %21 = vector.broadcast %cst_14 : f32 to vector<8x16xf32>
    %22 = arith.cmpf oeq, %20, %21 : vector<8x16xf32>
    %cst_15 = arith.constant -1.000000e+30 : f32
    %cst_16 = arith.constant 0.000000e+00 : f32
    %23 = vector.broadcast %cst_15 : f32 to vector<8x16xf32>
    %24 = vector.broadcast %cst_16 : f32 to vector<8x16xf32>
    %25 = arith.select %22, %23, %24 : vector<8x16xi1>, vector<8x16xf32>
    %26 = math.absf %17 : vector<1x16xf32>
    %cst_17 = arith.constant dense<0.000000e+00> : vector<1xf32>
    %27 = vector.multi_reduction <add>, %26, %cst_17 [1] : vector<1x16xf32> to vector<1xf32>
    %28 = vector.shape_cast %27 : vector<1xf32> to vector<1x1xf32>
    %cst_18 = arith.constant 0.000000e+00 : f32
    %29 = vector.broadcast %cst_18 : f32 to vector<1x1xf32>
    %30 = arith.cmpf ogt, %28, %29 : vector<1x1xf32>
    %cst_19 = arith.constant 0.000000e+00 : f32
    %31 = vector.broadcast %cst_19 : f32 to vector<8x1xf32>
    %32 = arith.cmpf one, %15, %31 : vector<8x1xf32>
    %33 = vector.broadcast %30 : vector<1x1xi1> to vector<8x1xi1>
    %34 = arith.andi %32, %33 : vector<8x1xi1>
    %cst_20 = arith.constant 1.000000e+00 : f32
    %cst_21 = arith.constant 0.000000e+00 : f32
    %35 = vector.broadcast %cst_20 : f32 to vector<8x1xf32>
    %36 = vector.broadcast %cst_21 : f32 to vector<8x1xf32>
    %37 = arith.select %34, %35, %36 : vector<8x1xi1>, vector<8x1xf32>
    %cst_22 = arith.constant 0.000000e+00 : f32
    %38 = vector.broadcast %cst_22 : f32 to vector<8x32xf32>
    %39 = vector.extract_strided_slice %13 {offsets = [0, 0], sizes = [8, 8], strides = [1, 1]} : vector<8x32xf32> to vector<8x8xf32>
    %c0_23 = arith.constant 0 : index
    %c0_24 = arith.constant 0 : index
    %40 = vector.load %arg16[%c0_23, %c0_24] : memref<16x32xf32, #tpu.memory_space<vmem>>, vector<16x8xf32>
    %c0_25 = arith.constant 0 : index
    %c0_26 = arith.constant 0 : index
    %41 = vector.load %arg17[%c0_25, %c0_26] : memref<16x32xf32, #tpu.memory_space<vmem>>, vector<16x8xf32>
    %cst_27 = arith.constant dense<0.000000e+00> : vector<8x16xf32>
    %42 = tpu.matmul %39, %40, %cst_27 {dimension_numbers = #tpu.dot_dimension_numbers<[1], [1], [0], [0], [0, 0, 1, 0], [], []>} : vector<8x8xf32>, vector<16x8xf32>, vector<8x16xf32> -> vector<8x16xf32>
    %43 = arith.addf %42, %25 : vector<8x16xf32>
    %cst_28 = arith.constant dense<0xFF800000> : vector<8xf32>
    %44 = vector.multi_reduction <maximumf>, %43, %cst_28 [1] : vector<8x16xf32> to vector<8xf32>
    %45 = vector.shape_cast %44 : vector<8xf32> to vector<8x1xf32>
    %46 = vector.broadcast %45 : vector<8x1xf32> to vector<8x16xf32>
    %47 = arith.subf %43, %46 : vector<8x16xf32>
    %48 = math.exp %47 : vector<8x16xf32>
    %cst_29 = arith.constant dense<0.000000e+00> : vector<8xf32>
    %49 = vector.multi_reduction <add>, %48, %cst_29 [1] : vector<8x16xf32> to vector<8xf32>
    %50 = vector.shape_cast %49 : vector<8xf32> to vector<8x1xf32>
    %51 = tpu.reciprocal %50 : vector<8x1xf32> -> vector<8x1xf32>
    %52 = vector.broadcast %51 : vector<8x1xf32> to vector<8x16xf32>
    %53 = arith.mulf %48, %52 : vector<8x16xf32>
    %cst_30 = arith.constant dense<0.000000e+00> : vector<8x8xf32>
    %54 = tpu.matmul %53, %41, %cst_30 {dimension_numbers = #tpu.dot_dimension_numbers<[1], [0], [0], [1], [0, 0, 1, 1], [], []>} : vector<8x16xf32>, vector<16x8xf32>, vector<8x8xf32> -> vector<8x8xf32>
    %c0_31 = arith.constant 0 : index
    %c0_32 = arith.constant 0 : index
    %55 = vector.load %arg13[%c0_31, %c0_32] : memref<32x32xf32, #tpu.memory_space<vmem>>, vector<8x32xf32>
    %cst_33 = arith.constant dense<0.000000e+00> : vector<8x32xf32>
    %56 = tpu.matmul %54, %55, %cst_33 {dimension_numbers = #tpu.dot_dimension_numbers<[1], [0], [0], [1], [0, 0, 1, 1], [], []>} : vector<8x8xf32>, vector<8x32xf32>, vector<8x32xf32> -> vector<8x32xf32>
    %57 = arith.addf %38, %56 : vector<8x32xf32>
    %58 = vector.extract_strided_slice %13 {offsets = [0, 8], sizes = [8, 8], strides = [1, 1]} : vector<8x32xf32> to vector<8x8xf32>
    %c0_34 = arith.constant 0 : index
    %c8 = arith.constant 8 : index
    %59 = vector.load %arg16[%c0_34, %c8] : memref<16x32xf32, #tpu.memory_space<vmem>>, vector<16x8xf32>
    %c0_35 = arith.constant 0 : index
    %c8_36 = arith.constant 8 : index
    %60 = vector.load %arg17[%c0_35, %c8_36] : memref<16x32xf32, #tpu.memory_space<vmem>>, vector<16x8xf32>
    %cst_37 = arith.constant dense<0.000000e+00> : vector<8x16xf32>
    %61 = tpu.matmul %58, %59, %cst_37 {dimension_numbers = #tpu.dot_dimension_numbers<[1], [1], [0], [0], [0, 0, 1, 0], [], []>} : vector<8x8xf32>, vector<16x8xf32>, vector<8x16xf32> -> vector<8x16xf32>
    %62 = arith.addf %61, %25 : vector<8x16xf32>
    %cst_38 = arith.constant dense<0xFF800000> : vector<8xf32>
    %63 = vector.multi_reduction <maximumf>, %62, %cst_38 [1] : vector<8x16xf32> to vector<8xf32>
    %64 = vector.shape_cast %63 : vector<8xf32> to vector<8x1xf32>
    %65 = vector.broadcast %64 : vector<8x1xf32> to vector<8x16xf32>
    %66 = arith.subf %62, %65 : vector<8x16xf32>
    %67 = math.exp %66 : vector<8x16xf32>
    %cst_39 = arith.constant dense<0.000000e+00> : vector<8xf32>
    %68 = vector.multi_reduction <add>, %67, %cst_39 [1] : vector<8x16xf32> to vector<8xf32>
    %69 = vector.shape_cast %68 : vector<8xf32> to vector<8x1xf32>
    %70 = tpu.reciprocal %69 : vector<8x1xf32> -> vector<8x1xf32>
    %71 = vector.broadcast %70 : vector<8x1xf32> to vector<8x16xf32>
    %72 = arith.mulf %67, %71 : vector<8x16xf32>
    %cst_40 = arith.constant dense<0.000000e+00> : vector<8x8xf32>
    %73 = tpu.matmul %72, %60, %cst_40 {dimension_numbers = #tpu.dot_dimension_numbers<[1], [0], [0], [1], [0, 0, 1, 1], [], []>} : vector<8x16xf32>, vector<16x8xf32>, vector<8x8xf32> -> vector<8x8xf32>
    %c8_41 = arith.constant 8 : index
    %c0_42 = arith.constant 0 : index
    %74 = vector.load %arg13[%c8_41, %c0_42] : memref<32x32xf32, #tpu.memory_space<vmem>>, vector<8x32xf32>
    %cst_43 = arith.constant dense<0.000000e+00> : vector<8x32xf32>
    %75 = tpu.matmul %73, %74, %cst_43 {dimension_numbers = #tpu.dot_dimension_numbers<[1], [0], [0], [1], [0, 0, 1, 1], [], []>} : vector<8x8xf32>, vector<8x32xf32>, vector<8x32xf32> -> vector<8x32xf32>
    %76 = arith.addf %57, %75 : vector<8x32xf32>
    %77 = vector.extract_strided_slice %13 {offsets = [0, 16], sizes = [8, 8], strides = [1, 1]} : vector<8x32xf32> to vector<8x8xf32>
    %c0_44 = arith.constant 0 : index
    %c16 = arith.constant 16 : index
    %78 = vector.load %arg16[%c0_44, %c16] : memref<16x32xf32, #tpu.memory_space<vmem>>, vector<16x8xf32>
    %c0_45 = arith.constant 0 : index
    %c16_46 = arith.constant 16 : index
    %79 = vector.load %arg17[%c0_45, %c16_46] : memref<16x32xf32, #tpu.memory_space<vmem>>, vector<16x8xf32>
    %cst_47 = arith.constant dense<0.000000e+00> : vector<8x16xf32>
    %80 = tpu.matmul %77, %78, %cst_47 {dimension_numbers = #tpu.dot_dimension_numbers<[1], [1], [0], [0], [0, 0, 1, 0], [], []>} : vector<8x8xf32>, vector<16x8xf32>, vector<8x16xf32> -> vector<8x16xf32>
    %81 = arith.addf %80, %25 : vector<8x16xf32>
    %cst_48 = arith.constant dense<0xFF800000> : vector<8xf32>
    %82 = vector.multi_reduction <maximumf>, %81, %cst_48 [1] : vector<8x16xf32> to vector<8xf32>
    %83 = vector.shape_cast %82 : vector<8xf32> to vector<8x1xf32>
    %84 = vector.broadcast %83 : vector<8x1xf32> to vector<8x16xf32>
    %85 = arith.subf %81, %84 : vector<8x16xf32>
    %86 = math.exp %85 : vector<8x16xf32>
    %cst_49 = arith.constant dense<0.000000e+00> : vector<8xf32>
    %87 = vector.multi_reduction <add>, %86, %cst_49 [1] : vector<8x16xf32> to vector<8xf32>
    %88 = vector.shape_cast %87 : vector<8xf32> to vector<8x1xf32>
    %89 = tpu.reciprocal %88 : vector<8x1xf32> -> vector<8x1xf32>
    %90 = vector.broadcast %89 : vector<8x1xf32> to vector<8x16xf32>
    %91 = arith.mulf %86, %90 : vector<8x16xf32>
    %cst_50 = arith.constant dense<0.000000e+00> : vector<8x8xf32>
    %92 = tpu.matmul %91, %79, %cst_50 {dimension_numbers = #tpu.dot_dimension_numbers<[1], [0], [0], [1], [0, 0, 1, 1], [], []>} : vector<8x16xf32>, vector<16x8xf32>, vector<8x8xf32> -> vector<8x8xf32>
    %c16_51 = arith.constant 16 : index
    %c0_52 = arith.constant 0 : index
    %93 = vector.load %arg13[%c16_51, %c0_52] : memref<32x32xf32, #tpu.memory_space<vmem>>, vector<8x32xf32>
    %cst_53 = arith.constant dense<0.000000e+00> : vector<8x32xf32>
    %94 = tpu.matmul %92, %93, %cst_53 {dimension_numbers = #tpu.dot_dimension_numbers<[1], [0], [0], [1], [0, 0, 1, 1], [], []>} : vector<8x8xf32>, vector<8x32xf32>, vector<8x32xf32> -> vector<8x32xf32>
    %95 = arith.addf %76, %94 : vector<8x32xf32>
    %96 = vector.extract_strided_slice %13 {offsets = [0, 24], sizes = [8, 8], strides = [1, 1]} : vector<8x32xf32> to vector<8x8xf32>
    %c0_54 = arith.constant 0 : index
    %c24 = arith.constant 24 : index
    %97 = vector.load %arg16[%c0_54, %c24] : memref<16x32xf32, #tpu.memory_space<vmem>>, vector<16x8xf32>
    %c0_55 = arith.constant 0 : index
    %c24_56 = arith.constant 24 : index
    %98 = vector.load %arg17[%c0_55, %c24_56] : memref<16x32xf32, #tpu.memory_space<vmem>>, vector<16x8xf32>
    %cst_57 = arith.constant dense<0.000000e+00> : vector<8x16xf32>
    %99 = tpu.matmul %96, %97, %cst_57 {dimension_numbers = #tpu.dot_dimension_numbers<[1], [1], [0], [0], [0, 0, 1, 0], [], []>} : vector<8x8xf32>, vector<16x8xf32>, vector<8x16xf32> -> vector<8x16xf32>
    %100 = arith.addf %99, %25 : vector<8x16xf32>
    %cst_58 = arith.constant dense<0xFF800000> : vector<8xf32>
    %101 = vector.multi_reduction <maximumf>, %100, %cst_58 [1] : vector<8x16xf32> to vector<8xf32>
    %102 = vector.shape_cast %101 : vector<8xf32> to vector<8x1xf32>
    %103 = vector.broadcast %102 : vector<8x1xf32> to vector<8x16xf32>
    %104 = arith.subf %100, %103 : vector<8x16xf32>
    %105 = math.exp %104 : vector<8x16xf32>
    %cst_59 = arith.constant dense<0.000000e+00> : vector<8xf32>
    %106 = vector.multi_reduction <add>, %105, %cst_59 [1] : vector<8x16xf32> to vector<8xf32>
    %107 = vector.shape_cast %106 : vector<8xf32> to vector<8x1xf32>
    %108 = tpu.reciprocal %107 : vector<8x1xf32> -> vector<8x1xf32>
    %109 = vector.broadcast %108 : vector<8x1xf32> to vector<8x16xf32>
    %110 = arith.mulf %105, %109 : vector<8x16xf32>
    %cst_60 = arith.constant dense<0.000000e+00> : vector<8x8xf32>
    %111 = tpu.matmul %110, %98, %cst_60 {dimension_numbers = #tpu.dot_dimension_numbers<[1], [0], [0], [1], [0, 0, 1, 1], [], []>} : vector<8x16xf32>, vector<16x8xf32>, vector<8x8xf32> -> vector<8x8xf32>
    %c24_61 = arith.constant 24 : index
    %c0_62 = arith.constant 0 : index
    %112 = vector.load %arg13[%c24_61, %c0_62] : memref<32x32xf32, #tpu.memory_space<vmem>>, vector<8x32xf32>
    %cst_63 = arith.constant dense<0.000000e+00> : vector<8x32xf32>
    %113 = tpu.matmul %111, %112, %cst_63 {dimension_numbers = #tpu.dot_dimension_numbers<[1], [0], [0], [1], [0, 0, 1, 1], [], []>} : vector<8x8xf32>, vector<8x32xf32>, vector<8x32xf32> -> vector<8x32xf32>
    %114 = arith.addf %95, %113 : vector<8x32xf32>
    %115 = vector.broadcast %37 : vector<8x1xf32> to vector<8x32xf32>
    %116 = arith.mulf %114, %115 : vector<8x32xf32>
    %c0_64 = arith.constant 0 : index
    %c0_65 = arith.constant 0 : index
    %117 = vector.load %arg14[%c0_64, %c0_65] : memref<1x32xf32, #tpu.memory_space<vmem>>, vector<1x32xf32>
    %118 = vector.shape_cast %117 : vector<1x32xf32> to vector<32xf32>
    %119 = vector.shape_cast %118 : vector<32xf32> to vector<1x32xf32>
    %120 = vector.broadcast %119 : vector<1x32xf32> to vector<8x32xf32>
    %121 = arith.addf %116, %120 : vector<8x32xf32>
    %c0_66 = arith.constant 0 : index
    %c0_67 = arith.constant 0 : index
    %c0_68 = arith.constant 0 : index
    %122 = vector.load %arg15[%c0_66, %c0_67, %c0_68] : memref<1x8x32xf32, #tpu.memory_space<vmem>>, vector<1x8x32xf32>
    %123 = vector.shape_cast %122 : vector<1x8x32xf32> to vector<8x32xf32>
    %124 = vector.shape_cast %121 : vector<8x32xf32> to vector<1x8x32xf32>
    tpu.vector_store %arg15[%c0_66, %c0_67, %c0_68], %124 {strides = array<i32>} : memref<1x8x32xf32, #tpu.memory_space<vmem>>, vector<1x8x32xf32>,
    return
  }
  func.func @transform_0(%arg0: i32, %arg1: i32) -> (i32, i32, i32) {
    %c0_i32 = arith.constant 0 : i32
    %c0_i32_0 = arith.constant 0 : i32
    return %arg0, %arg1, %c0_i32 : i32, i32, i32
  }
  func.func @transform_1(%arg0: i32, %arg1: i32) -> (i32, i32, i32) {
    %c0_i32 = arith.constant 0 : i32
    %c0_i32_0 = arith.constant 0 : i32
    %c0_i32_1 = arith.constant 0 : i32
    return %arg0, %c0_i32, %c0_i32_0 : i32, i32, i32
  }
  func.func @transform_2(%arg0: i32, %arg1: i32) -> (i32, i32, i32) {
    %c0_i32 = arith.constant 0 : i32
    %c0_i32_0 = arith.constant 0 : i32
    %c0_i32_1 = arith.constant 0 : i32
    return %arg0, %c0_i32, %c0_i32_0 : i32, i32, i32
  }
  func.func @transform_3(%arg0: i32, %arg1: i32) -> (i32, i32, i32) {
    %c0_i32 = arith.constant 0 : i32
    %c0_i32_0 = arith.constant 0 : i32
    return %arg0, %arg1, %c0_i32 : i32, i32, i32
  }
  func.func @transform_4(%arg0: i32, %arg1: i32) -> (i32, i32, i32) {
    %c0_i32 = arith.constant 0 : i32
    %c0_i32_0 = arith.constant 0 : i32
    %c0_i32_1 = arith.constant 0 : i32
    return %arg0, %c0_i32, %c0_i32_0 : i32, i32, i32
  }
  func.func @transform_5(%arg0: i32, %arg1: i32) -> (i32, i32) {
    %c0_i32 = arith.constant 0 : i32
    %c0_i32_0 = arith.constant 0 : i32
    %c0_i32_1 = arith.constant 0 : i32
    return %c0_i32, %c0_i32_0 : i32, i32
  }
  func.func @transform_6(%arg0: i32, %arg1: i32) -> (i32, i32) {
    %c0_i32 = arith.constant 0 : i32
    %c0_i32_0 = arith.constant 0 : i32
    %c0_i32_1 = arith.constant 0 : i32
    return %c0_i32, %c0_i32_0 : i32, i32
  }
  func.func @transform_7(%arg0: i32, %arg1: i32) -> (i32, i32) {
    %c0_i32 = arith.constant 0 : i32
    %c0_i32_0 = arith.constant 0 : i32
    %c0_i32_1 = arith.constant 0 : i32
    return %c0_i32, %c0_i32_0 : i32, i32
  }
  func.func @transform_8(%arg0: i32, %arg1: i32) -> (i32, i32) {
    %c0_i32 = arith.constant 0 : i32
    %c0_i32_0 = arith.constant 0 : i32
    %c0_i32_1 = arith.constant 0 : i32
    return %c0_i32, %c0_i32_0 : i32, i32
  }
  func.func @transform_9(%arg0: i32, %arg1: i32) -> (i32, i32) {
    %c0_i32 = arith.constant 0 : i32
    %c0_i32_0 = arith.constant 0 : i32
    %c0_i32_1 = arith.constant 0 : i32
    return %c0_i32, %c0_i32_0 : i32, i32
  }
  func.func @transform_10(%arg0: i32, %arg1: i32) -> (i32, i32) {
    %c0_i32 = arith.constant 0 : i32
    %c0_i32_0 = arith.constant 0 : i32
    %c0_i32_1 = arith.constant 0 : i32
    return %c0_i32, %c0_i32_0 : i32, i32
  }
  func.func @transform_11(%arg0: i32, %arg1: i32) -> (i32, i32) {
    %c0_i32 = arith.constant 0 : i32
    %c0_i32_0 = arith.constant 0 : i32
    %c0_i32_1 = arith.constant 0 : i32
    return %c0_i32, %c0_i32_0 : i32, i32
  }
  func.func @transform_12(%arg0: i32, %arg1: i32) -> (i32, i32) {
    %c0_i32 = arith.constant 0 : i32
    %c0_i32_0 = arith.constant 0 : i32
    %c0_i32_1 = arith.constant 0 : i32
    return %c0_i32, %c0_i32_0 : i32, i32
  }
  func.func @transform_13(%arg0: i32, %arg1: i32) -> (i32, i32, i32) {
    %c0_i32 = arith.constant 0 : i32
    %c0_i32_0 = arith.constant 0 : i32
    return %arg0, %arg1, %c0_i32 : i32, i32, i32
  }
}

module attributes {stable_mosaic.version = 11 : i64} {
  func.func @_mha_kernel(%arg0: i32, %arg1: i32, %arg2: memref<1x8x32xf32, #tpu.memory_space<vmem>>, %arg3: memref<1x16x32xf32, #tpu.memory_space<vmem>>, %arg4: memref<1x16x32xf32, #tpu.memory_space<vmem>>, %arg5: memref<1x8x1xf32, #tpu.memory_space<vmem>>, %arg6: memref<1x1x16xf32, #tpu.memory_space<vmem>>, %arg7: memref<32x32xf32, #tpu.memory_space<vmem>>, %arg8: memref<1x32xf32, #tpu.memory_space<vmem>>, %arg9: memref<32x32xf32, #tpu.memory_space<vmem>>, %arg10: memref<1x32xf32, #tpu.memory_space<vmem>>, %arg11: memref<32x32xf32, #tpu.memory_space<vmem>>, %arg12: memref<1x32xf32, #tpu.memory_space<vmem>>, %arg13: memref<32x32xf32, #tpu.memory_space<vmem>>, %arg14: memref<1x32xf32, #tpu.memory_space<vmem>>, %arg15: memref<1x8x32xf32, #tpu.memory_space<vmem>>, %arg16: memref<16x32xf32, #tpu.memory_space<vmem>>, %arg17: memref<16x32xf32, #tpu.memory_space<vmem>>) attributes {dimension_semantics = [#tpu.dimension_semantics<parallel>, #tpu.dimension_semantics<arbitrary>], iteration_bounds = array<i64: 2, 2>, scalar_prefetch = 0 : i64, scratch_operands = 2 : i64, tpu.core_type = #tpu.core_type<tc>, window_params = [{transform_indices = @transform_0, window_bounds = array<i64: 1, 8, 32>}, {transform_indices = @transform_1, window_bounds = array<i64: 1, 16, 32>}, {transform_indices = @transform_2, window_bounds = array<i64: 1, 16, 32>}, {transform_indices = @transform_3, window_bounds = array<i64: 1, 8, 1>}, {transform_indices = @transform_4, window_bounds = array<i64: 1, 1, 16>}, {pipeline_mode = #tpu.pipeline_mode<synchronous>, transform_indices = @transform_5, window_bounds = array<i64: 32, 32>}, {pipeline_mode = #tpu.pipeline_mode<synchronous>, transform_indices = @transform_6, window_bounds = array<i64: 1, 32>}, {pipeline_mode = #tpu.pipeline_mode<synchronous>, transform_indices = @transform_7, window_bounds = array<i64: 32, 32>}, {pipeline_mode = #tpu.pipeline_mode<synchronous>, transform_indices = @transform_8, window_bounds = array<i64: 1, 32>}, {pipeline_mode = #tpu.pipeline_mode<synchronous>, transform_indices = @transform_9, window_bounds = array<i64: 32, 32>}, {pipeline_mode = #tpu.pipeline_mode<synchronous>, transform_indices = @transform_10, window_bounds = array<i64: 1, 32>}, {pipeline_mode = #tpu.pipeline_mode<synchronous>, transform_indices = @transform_11, window_bounds = array<i64: 32, 32>}, {pipeline_mode = #tpu.pipeline_mode<synchronous>, transform_indices = @transform_12, window_bounds = array<i64: 1, 32>}, {transform_indices = @transform_13, window_bounds = array<i64: 1, 8, 32>}]} {
    %c0_i32 = arith.constant 0 : i32
    %0 = arith.cmpi eq, %arg1, %c0_i32 : i32
    %1 = arith.extui %0 : i1 to i32
    %c0_i32_0 = arith.constant 0 : i32
    %2 = arith.cmpi ne, %1, %c0_i32_0 : i32
    scf.if %2 {
      %c0_69 = arith.constant 0 : index
      %c0_70 = arith.constant 0 : index
      %c0_71 = arith.constant 0 : index
      %125 = vector.load %arg3[%c0_69, %c0_70, %c0_71] : memref<1x16x32xf32, #tpu.memory_space<vmem>>, vector<1x16x32xf32>
      %126 = vector.shape_cast %125 : vector<1x16x32xf32> to vector<16x32xf32>
      %c0_72 = arith.constant 0 : index
      %c0_73 = arith.constant 0 : index
      %127 = vector.load %arg9[%c0_72, %c0_73] : memref<32x32xf32, #tpu.memory_space<vmem>>, vector<32x32xf32>
      %cst_74 = arith.constant dense<0.000000e+00> : vector<16x32xf32>
      %128 = tpu.matmul %126, %127, %cst_74 {dimension_numbers = #tpu.dot_dimension_numbers<[1], [0], [0], [1], [0, 0, 1, 1], [], []>} : vector<16x32xf32>, vector<32x32xf32>, vector<16x32xf32> -> vector<16x32xf32>
      %c0_75 = arith.constant 0 : index
      %c0_76 = arith.constant 0 : index
      %129 = vector.load %arg10[%c0_75, %c0_76] : memref<1x32xf32, #tpu.memory_space<vmem>>, vector<1x32xf32>
      %130 = vector.shape_cast %129 : vector<1x32xf32> to vector<32xf32>
      %131 = vector.shape_cast %130 : vector<32xf32> to vector<1x32xf32>
      %132 = vector.broadcast %131 : vector<1x32xf32> to vector<16x32xf32>
      %133 = arith.addf %128, %132 : vector<16x32xf32>
      %c0_77 = arith.constant 0 : index
      %c0_78 = arith.constant 0 : index
      %134 = vector.load %arg16[%c0_77, %c0_78] : memref<16x32xf32, #tpu.memory_space<vmem>>, vector<16x32xf32>
      tpu.vector_store %arg16[%c0_77, %c0_78], %133 {strides = array<i32>} : memref<16x32xf32, #tpu.memory_space<vmem>>, vector<16x32xf32>,
      %c0_79 = arith.constant 0 : index
      %c0_80 = arith.constant 0 : index
      %c0_81 = arith.constant 0 : index
      %135 = vector.load %arg4[%c0_79, %c0_80, %c0_81] : memref<1x16x32xf32, #tpu.memory_space<vmem>>, vector<1x16x32xf32>
      %136 = vector.shape_cast %135 : vector<1x16x32xf32> to vector<16x32xf32>
      %c0_82 = arith.constant 0 : index
      %c0_83 = arith.constant 0 : index
      %137 = vector.load %arg11[%c0_82, %c0_83] : memref<32x32xf32, #tpu.memory_space<vmem>>, vector<32x32xf32>
      %cst_84 = arith.constant dense<0.000000e+00> : vector<16x32xf32>
      %138 = tpu.matmul %136, %137, %cst_84 {dimension_numbers = #tpu.dot_dimension_numbers<[1], [0], [0], [1], [0, 0, 1, 1], [], []>} : vector<16x32xf32>, vector<32x32xf32>, vector<16x32xf32> -> vector<16x32xf32>
      %c0_85 = arith.constant 0 : index
      %c0_86 = arith.constant 0 : index
      %139 = vector.load %arg12[%c0_85, %c0_86] : memref<1x32xf32, #tpu.memory_space<vmem>>, vector<1x32xf32>
      %140 = vector.shape_cast %139 : vector<1x32xf32> to vector<32xf32>
      %141 = vector.shape_cast %140 : vector<32xf32> to vector<1x32xf32>
      %142 = vector.broadcast %141 : vector<1x32xf32> to vector<16x32xf32>
      %143 = arith.addf %138, %142 : vector<16x32xf32>
      %c0_87 = arith.constant 0 : index
      %c0_88 = arith.constant 0 : index
      %144 = vector.load %arg17[%c0_87, %c0_88] : memref<16x32xf32, #tpu.memory_space<vmem>>, vector<16x32xf32>
      tpu.vector_store %arg17[%c0_87, %c0_88], %143 {strides = array<i32>} : memref<16x32xf32, #tpu.memory_space<vmem>>, vector<16x32xf32>,
    } else {
    }
    %c0 = arith.constant 0 : index
    %c0_1 = arith.constant 0 : index
    %c0_2 = arith.constant 0 : index
    %3 = vector.load %arg2[%c0, %c0_1, %c0_2] : memref<1x8x32xf32, #tpu.memory_space<vmem>>, vector<1x8x32xf32>
    %4 = vector.shape_cast %3 : vector<1x8x32xf32> to vector<8x32xf32>
    %c0_3 = arith.constant 0 : index
    %c0_4 = arith.constant 0 : index
    %5 = vector.load %arg7[%c0_3, %c0_4] : memref<32x32xf32, #tpu.memory_space<vmem>>, vector<32x32xf32>
    %cst = arith.constant dense<0.000000e+00> : vector<8x32xf32>
    %6 = tpu.matmul %4, %5, %cst {dimension_numbers = #tpu.dot_dimension_numbers<[1], [0], [0], [1], [0, 0, 1, 1], [], []>} : vector<8x32xf32>, vector<32x32xf32>, vector<8x32xf32> -> vector<8x32xf32>
    %c0_5 = arith.constant 0 : index
    %c0_6 = arith.constant 0 : index
    %7 = vector.load %arg8[%c0_5, %c0_6] : memref<1x32xf32, #tpu.memory_space<vmem>>, vector<1x32xf32>
    %8 = vector.shape_cast %7 : vector<1x32xf32> to vector<32xf32>
    %9 = vector.shape_cast %8 : vector<32xf32> to vector<1x32xf32>
    %10 = vector.broadcast %9 : vector<1x32xf32> to vector<8x32xf32>
    %11 = arith.addf %6, %10 : vector<8x32xf32>
    %cst_7 = arith.constant 0.353553385 : f32
    %12 = vector.broadcast %cst_7 : f32 to vector<8x32xf32>
    %13 = arith.mulf %11, %12 : vector<8x32xf32>
    %c0_8 = arith.constant 0 : index
    %c0_9 = arith.constant 0 : index
    %c0_10 = arith.constant 0 : index
    %14 = vector.load %arg5[%c0_8, %c0_9, %c0_10] : memref<1x8x1xf32, #tpu.memory_space<vmem>>, vector<1x8x1xf32>
    %15 = vector.shape_cast %14 : vector<1x8x1xf32> to vector<8x1xf32>
    %c0_11 = arith.constant 0 : index
    %c0_12 = arith.constant 0 : index
    %c0_13 = arith.constant 0 : index
    %16 = vector.load %arg6[%c0_11, %c0_12, %c0_13] : memref<1x1x16xf32, #tpu.memory_space<vmem>>, vector<1x1x16xf32>
    %17 = vector.shape_cast %16 : vector<1x1x16xf32> to vector<1x16xf32>
    %18 = vector.broadcast %15 : vector<8x1xf32> to vector<8x16xf32>
    %19 = vector.broadcast %17 : vector<1x16xf32> to vector<8x16xf32>
    %20 = arith.mulf %18, %19 : vector<8x16xf32>
    %cst_14 = arith.constant 0.000000e+00 : f32
    %21 = vector.broadcast %cst_14 : f32 to vector<8x16xf32>
    %22 = arith.cmpf oeq, %20, %21 : vector<8x16xf32>
    %cst_15 = arith.constant -1.000000e+30 : f32
    %cst_16 = arith.constant 0.000000e+00 : f32
    %23 = vector.broadcast %cst_15 : f32 to vector<8x16xf32>
    %24 = vector.broadcast %cst_16 : f32 to vector<8x16xf32>
    %25 = arith.select %22, %23, %24 : vector<8x16xi1>, vector<8x16xf32>
    %26 = math.absf %17 : vector<1x16xf32>
    %cst_17 = arith.constant dense<0.000000e+00> : vector<1xf32>
    %27 = vector.multi_reduction <add>, %26, %cst_17 [1] : vector<1x16xf32> to vector<1xf32>
    %28 = vector.shape_cast %27 : vector<1xf32> to vector<1x1xf32>
    %cst_18 = arith.constant 0.000000e+00 : f32
    %29 = vector.broadcast %cst_18 : f32 to vector<1x1xf32>
    %30 = arith.cmpf ogt, %28, %29 : vector<1x1xf32>
    %cst_19 = arith.constant 0.000000e+00 : f32
    %31 = vector.broadcast %cst_19 : f32 to vector<8x1xf32>
    %32 = arith.cmpf one, %15, %31 : vector<8x1xf32>
    %33 = vector.broadcast %30 : vector<1x1xi1> to vector<8x1xi1>
    %34 = arith.andi %32, %33 : vector<8x1xi1>
    %cst_20 = arith.constant 1.000000e+00 : f32
    %cst_21 = arith.constant 0.000000e+00 : f32
    %35 = vector.broadcast %cst_20 : f32 to vector<8x1xf32>
    %36 = vector.broadcast %cst_21 : f32 to vector<8x1xf32>
    %37 = arith.select %34, %35, %36 : vector<8x1xi1>, vector<8x1xf32>
    %cst_22 = arith.constant 0.000000e+00 : f32
    %38 = vector.broadcast %cst_22 : f32 to vector<8x32xf32>
    %39 = vector.extract_strided_slice %13 {offsets = [0, 0], sizes = [8, 8], strides = [1, 1]} : vector<8x32xf32> to vector<8x8xf32>
    %c0_23 = arith.constant 0 : index
    %c0_24 = arith.constant 0 : index
    %40 = vector.load %arg16[%c0_23, %c0_24] : memref<16x32xf32, #tpu.memory_space<vmem>>, vector<16x8xf32>
    %c0_25 = arith.constant 0 : index
    %c0_26 = arith.constant 0 : index
    %41 = vector.load %arg17[%c0_25, %c0_26] : memref<16x32xf32, #tpu.memory_space<vmem>>, vector<16x8xf32>
    %cst_27 = arith.constant dense<0.000000e+00> : vector<8x16xf32>
    %42 = tpu.matmul %39, %40, %cst_27 {dimension_numbers = #tpu.dot_dimension_numbers<[1], [1], [0], [0], [0, 0, 1, 0], [], []>} : vector<8x8xf32>, vector<16x8xf32>, vector<8x16xf32> -> vector<8x16xf32>
    %43 = arith.addf %42, %25 : vector<8x16xf32>
    %cst_28 = arith.constant dense<0xFF800000> : vector<8xf32>
    %44 = vector.multi_reduction <maximumf>, %43, %cst_28 [1] : vector<8x16xf32> to vector<8xf32>
    %45 = vector.shape_cast %44 : vector<8xf32> to vector<8x1xf32>
    %46 = vector.broadcast %45 : vector<8x1xf32> to vector<8x16xf32>
    %47 = arith.subf %43, %46 : vector<8x16xf32>
    %48 = math.exp %47 : vector<8x16xf32>
    %cst_29 = arith.constant dense<0.000000e+00> : vector<8xf32>
    %49 = vector.multi_reduction <add>, %48, %cst_29 [1] : vector<8x16xf32> to vector<8xf32>
    %50 = vector.shape_cast %49 : vector<8xf32> to vector<8x1xf32>
    %51 = tpu.reciprocal %50 : vector<8x1xf32> -> vector<8x1xf32>
    %52 = vector.broadcast %51 : vector<8x1xf32> to vector<8x16xf32>
    %53 = arith.mulf %48, %52 : vector<8x16xf32>
    %cst_30 = arith.constant dense<0.000000e+00> : vector<8x8xf32>
    %54 = tpu.matmul %53, %41, %cst_30 {dimension_numbers = #tpu.dot_dimension_numbers<[1], [0], [0], [1], [0, 0, 1, 1], [], []>} : vector<8x16xf32>, vector<16x8xf32>, vector<8x8xf32> -> vector<8x8xf32>
    %c0_31 = arith.constant 0 : index
    %c0_32 = arith.constant 0 : index
    %55 = vector.load %arg13[%c0_31, %c0_32] : memref<32x32xf32, #tpu.memory_space<vmem>>, vector<8x32xf32>
    %cst_33 = arith.constant dense<0.000000e+00> : vector<8x32xf32>
    %56 = tpu.matmul %54, %55, %cst_33 {dimension_numbers = #tpu.dot_dimension_numbers<[1], [0], [0], [1], [0, 0, 1, 1], [], []>} : vector<8x8xf32>, vector<8x32xf32>, vector<8x32xf32> -> vector<8x32xf32>
    %57 = arith.addf %38, %56 : vector<8x32xf32>
    %58 = vector.extract_strided_slice %13 {offsets = [0, 8], sizes = [8, 8], strides = [1, 1]} : vector<8x32xf32> to vector<8x8xf32>
    %c0_34 = arith.constant 0 : index
    %c8 = arith.constant 8 : index
    %59 = vector.load %arg16[%c0_34, %c8] : memref<16x32xf32, #tpu.memory_space<vmem>>, vector<16x8xf32>
    %c0_35 = arith.constant 0 : index
    %c8_36 = arith.constant 8 : index
    %60 = vector.load %arg17[%c0_35, %c8_36] : memref<16x32xf32, #tpu.memory_space<vmem>>, vector<16x8xf32>
    %cst_37 = arith.constant dense<0.000000e+00> : vector<8x16xf32>
    %61 = tpu.matmul %58, %59, %cst_37 {dimension_numbers = #tpu.dot_dimension_numbers<[1], [1], [0], [0], [0, 0, 1, 0], [], []>} : vector<8x8xf32>, vector<16x8xf32>, vector<8x16xf32> -> vector<8x16xf32>
    %62 = arith.addf %61, %25 : vector<8x16xf32>
    %cst_38 = arith.constant dense<0xFF800000> : vector<8xf32>
    %63 = vector.multi_reduction <maximumf>, %62, %cst_38 [1] : vector<8x16xf32> to vector<8xf32>
    %64 = vector.shape_cast %63 : vector<8xf32> to vector<8x1xf32>
    %65 = vector.broadcast %64 : vector<8x1xf32> to vector<8x16xf32>
    %66 = arith.subf %62, %65 : vector<8x16xf32>
    %67 = math.exp %66 : vector<8x16xf32>
    %cst_39 = arith.constant dense<0.000000e+00> : vector<8xf32>
    %68 = vector.multi_reduction <add>, %67, %cst_39 [1] : vector<8x16xf32> to vector<8xf32>
    %69 = vector.shape_cast %68 : vector<8xf32> to vector<8x1xf32>
    %70 = tpu.reciprocal %69 : vector<8x1xf32> -> vector<8x1xf32>
    %71 = vector.broadcast %70 : vector<8x1xf32> to vector<8x16xf32>
    %72 = arith.mulf %67, %71 : vector<8x16xf32>
    %cst_40 = arith.constant dense<0.000000e+00> : vector<8x8xf32>
    %73 = tpu.matmul %72, %60, %cst_40 {dimension_numbers = #tpu.dot_dimension_numbers<[1], [0], [0], [1], [0, 0, 1, 1], [], []>} : vector<8x16xf32>, vector<16x8xf32>, vector<8x8xf32> -> vector<8x8xf32>
    %c8_41 = arith.constant 8 : index
    %c0_42 = arith.constant 0 : index
    %74 = vector.load %arg13[%c8_41, %c0_42] : memref<32x32xf32, #tpu.memory_space<vmem>>, vector<8x32xf32>
    %cst_43 = arith.constant dense<0.000000e+00> : vector<8x32xf32>
    %75 = tpu.matmul %73, %74, %cst_43 {dimension_numbers = #tpu.dot_dimension_numbers<[1], [0], [0], [1], [0, 0, 1, 1], [], []>} : vector<8x8xf32>, vector<8x32xf32>, vector<8x32xf32> -> vector<8x32xf32>
    %76 = arith.addf %57, %75 : vector<8x32xf32>
    %77 = vector.extract_strided_slice %13 {offsets = [0, 16], sizes = [8, 8], strides = [1, 1]} : vector<8x32xf32> to vector<8x8xf32>
    %c0_44 = arith.constant 0 : index
    %c16 = arith.constant 16 : index
    %78 = vector.load %arg16[%c0_44, %c16] : memref<16x32xf32, #tpu.memory_space<vmem>>, vector<16x8xf32>
    %c0_45 = arith.constant 0 : index
    %c16_46 = arith.constant 16 : index
    %79 = vector.load %arg17[%c0_45, %c16_46] : memref<16x32xf32, #tpu.memory_space<vmem>>, vector<16x8xf32>
    %cst_47 = arith.constant dense<0.000000e+00> : vector<8x16xf32>
    %80 = tpu.matmul %77, %78, %cst_47 {dimension_numbers = #tpu.dot_dimension_numbers<[1], [1], [0], [0], [0, 0, 1, 0], [], []>} : vector<8x8xf32>, vector<16x8xf32>, vector<8x16xf32> -> vector<8x16xf32>
    %81 = arith.addf %80, %25 : vector<8x16xf32>
    %cst_48 = arith.constant dense<0xFF800000> : vector<8xf32>
    %82 = vector.multi_reduction <maximumf>, %81, %cst_48 [1] : vector<8x16xf32> to vector<8xf32>
    %83 = vector.shape_cast %82 : vector<8xf32> to vector<8x1xf32>
    %84 = vector.broadcast %83 : vector<8x1xf32> to vector<8x16xf32>
    %85 = arith.subf %81, %84 : vector<8x16xf32>
    %86 = math.exp %85 : vector<8x16xf32>
    %cst_49 = arith.constant dense<0.000000e+00> : vector<8xf32>
    %87 = vector.multi_reduction <add>, %86, %cst_49 [1] : vector<8x16xf32> to vector<8xf32>
    %88 = vector.shape_cast %87 : vector<8xf32> to vector<8x1xf32>
    %89 = tpu.reciprocal %88 : vector<8x1xf32> -> vector<8x1xf32>
    %90 = vector.broadcast %89 : vector<8x1xf32> to vector<8x16xf32>
    %91 = arith.mulf %86, %90 : vector<8x16xf32>
    %cst_50 = arith.constant dense<0.000000e+00> : vector<8x8xf32>
    %92 = tpu.matmul %91, %79, %cst_50 {dimension_numbers = #tpu.dot_dimension_numbers<[1], [0], [0], [1], [0, 0, 1, 1], [], []>} : vector<8x16xf32>, vector<16x8xf32>, vector<8x8xf32> -> vector<8x8xf32>
    %c16_51 = arith.constant 16 : index
    %c0_52 = arith.constant 0 : index
    %93 = vector.load %arg13[%c16_51, %c0_52] : memref<32x32xf32, #tpu.memory_space<vmem>>, vector<8x32xf32>
    %cst_53 = arith.constant dense<0.000000e+00> : vector<8x32xf32>
    %94 = tpu.matmul %92, %93, %cst_53 {dimension_numbers = #tpu.dot_dimension_numbers<[1], [0], [0], [1], [0, 0, 1, 1], [], []>} : vector<8x8xf32>, vector<8x32xf32>, vector<8x32xf32> -> vector<8x32xf32>
    %95 = arith.addf %76, %94 : vector<8x32xf32>
    %96 = vector.extract_strided_slice %13 {offsets = [0, 24], sizes = [8, 8], strides = [1, 1]} : vector<8x32xf32> to vector<8x8xf32>
    %c0_54 = arith.constant 0 : index
    %c24 = arith.constant 24 : index
    %97 = vector.load %arg16[%c0_54, %c24] : memref<16x32xf32, #tpu.memory_space<vmem>>, vector<16x8xf32>
    %c0_55 = arith.constant 0 : index
    %c24_56 = arith.constant 24 : index
    %98 = vector.load %arg17[%c0_55, %c24_56] : memref<16x32xf32, #tpu.memory_space<vmem>>, vector<16x8xf32>
    %cst_57 = arith.constant dense<0.000000e+00> : vector<8x16xf32>
    %99 = tpu.matmul %96, %97, %cst_57 {dimension_numbers = #tpu.dot_dimension_numbers<[1], [1], [0], [0], [0, 0, 1, 0], [], []>} : vector<8x8xf32>, vector<16x8xf32>, vector<8x16xf32> -> vector<8x16xf32>
    %100 = arith.addf %99, %25 : vector<8x16xf32>
    %cst_58 = arith.constant dense<0xFF800000> : vector<8xf32>
    %101 = vector.multi_reduction <maximumf>, %100, %cst_58 [1] : vector<8x16xf32> to vector<8xf32>
    %102 = vector.shape_cast %101 : vector<8xf32> to vector<8x1xf32>
    %103 = vector.broadcast %102 : vector<8x1xf32> to vector<8x16xf32>
    %104 = arith.subf %100, %103 : vector<8x16xf32>
    %105 = math.exp %104 : vector<8x16xf32>
    %cst_59 = arith.constant dense<0.000000e+00> : vector<8xf32>
    %106 = vector.multi_reduction <add>, %105, %cst_59 [1] : vector<8x16xf32> to vector<8xf32>
    %107 = vector.shape_cast %106 : vector<8xf32> to vector<8x1xf32>
    %108 = tpu.reciprocal %107 : vector<8x1xf32> -> vector<8x1xf32>
    %109 = vector.broadcast %108 : vector<8x1xf32> to vector<8x16xf32>
    %110 = arith.mulf %105, %109 : vector<8x16xf32>
    %cst_60 = arith.constant dense<0.000000e+00> : vector<8x8xf32>
    %111 = tpu.matmul %110, %98, %cst_60 {dimension_numbers = #tpu.dot_dimension_numbers<[1], [0], [0], [1], [0, 0, 1, 1], [], []>} : vector<8x16xf32>, vector<16x8xf32>, vector<8x8xf32> -> vector<8x8xf32>
    %c24_61 = arith.constant 24 : index
    %c0_62 = arith.constant 0 : index
    %112 = vector.load %arg13[%c24_61, %c0_62] : memref<32x32xf32, #tpu.memory_space<vmem>>, vector<8x32xf32>
    %cst_63 = arith.constant dense<0.000000e+00> : vector<8x32xf32>
    %113 = tpu.matmul %111, %112, %cst_63 {dimension_numbers = #tpu.dot_dimension_numbers<[1], [0], [0], [1], [0, 0, 1, 1], [], []>} : vector<8x8xf32>, vector<8x32xf32>, vector<8x32xf32> -> vector<8x32xf32>
    %114 = arith.addf %95, %113 : vector<8x32xf32>
    %115 = vector.broadcast %37 : vector<8x1xf32> to vector<8x32xf32>
    %116 = arith.mulf %114, %115 : vector<8x32xf32>
    %c0_64 = arith.constant 0 : index
    %c0_65 = arith.constant 0 : index
    %117 = vector.load %arg14[%c0_64, %c0_65] : memref<1x32xf32, #tpu.memory_space<vmem>>, vector<1x32xf32>
    %118 = vector.shape_cast %117 : vector<1x32xf32> to vector<32xf32>
    %119 = vector.shape_cast %118 : vector<32xf32> to vector<1x32xf32>
    %120 = vector.broadcast %119 : vector<1x32xf32> to vector<8x32xf32>
    %121 = arith.addf %116, %120 : vector<8x32xf32>
    %c0_66 = arith.constant 0 : index
    %c0_67 = arith.constant 0 : index
    %c0_68 = arith.constant 0 : index
    %122 = vector.load %arg15[%c0_66, %c0_67, %c0_68] : memref<1x8x32xf32, #tpu.memory_space<vmem>>, vector<1x8x32xf32>
    %123 = vector.shape_cast %122 : vector<1x8x32xf32> to vector<8x32xf32>
    %124 = vector.shape_cast %121 : vector<8x32xf32> to vector<1x8x32xf32>
    tpu.vector_store %arg15[%c0_66, %c0_67, %c0_68], %124 {strides = array<i32>} : memref<1x8x32xf32, #tpu.memory_space<vmem>>, vector<1x8x32xf32>,
    return
  }
  func.func @transform_0(%arg0: i32, %arg1: i32) -> (i32, i32, i32) {
    %c0_i32 = arith.constant 0 : i32
    %c0_i32_0 = arith.constant 0 : i32
    return %arg0, %arg1, %c0_i32 : i32, i32, i32
  }
  func.func @transform_1(%arg0: i32, %arg1: i32) -> (i32, i32, i32) {
    %c0_i32 = arith.constant 0 : i32
    %c0_i32_0 = arith.constant 0 : i32
    %c0_i32_1 = arith.constant 0 : i32
    return %arg0, %c0_i32, %c0_i32_0 : i32, i32, i32
  }
  func.func @transform_2(%arg0: i32, %arg1: i32) -> (i32, i32, i32) {
    %c0_i32 = arith.constant 0 : i32
    %c0_i32_0 = arith.constant 0 : i32
    %c0_i32_1 = arith.constant 0 : i32
    return %arg0, %c0_i32, %c0_i32_0 : i32, i32, i32
  }
  func.func @transform_3(%arg0: i32, %arg1: i32) -> (i32, i32, i32) {
    %c0_i32 = arith.constant 0 : i32
    %c0_i32_0 = arith.constant 0 : i32
    return %arg0, %arg1, %c0_i32 : i32, i32, i32
  }
  func.func @transform_4(%arg0: i32, %arg1: i32) -> (i32, i32, i32) {
    %c0_i32 = arith.constant 0 : i32
    %c0_i32_0 = arith.constant 0 : i32
    %c0_i32_1 = arith.constant 0 : i32
    return %arg0, %c0_i32, %c0_i32_0 : i32, i32, i32
  }
  func.func @transform_5(%arg0: i32, %arg1: i32) -> (i32, i32) {
    %c0_i32 = arith.constant 0 : i32
    %c0_i32_0 = arith.constant 0 : i32
    %c0_i32_1 = arith.constant 0 : i32
    return %c0_i32, %c0_i32_0 : i32, i32
  }
  func.func @transform_6(%arg0: i32, %arg1: i32) -> (i32, i32) {
    %c0_i32 = arith.constant 0 : i32
    %c0_i32_0 = arith.constant 0 : i32
    %c0_i32_1 = arith.constant 0 : i32
    return %c0_i32, %c0_i32_0 : i32, i32
  }
  func.func @transform_7(%arg0: i32, %arg1: i32) -> (i32, i32) {
    %c0_i32 = arith.constant 0 : i32
    %c0_i32_0 = arith.constant 0 : i32
    %c0_i32_1 = arith.constant 0 : i32
    return %c0_i32, %c0_i32_0 : i32, i32
  }
  func.func @transform_8(%arg0: i32, %arg1: i32) -> (i32, i32) {
    %c0_i32 = arith.constant 0 : i32
    %c0_i32_0 = arith.constant 0 : i32
    %c0_i32_1 = arith.constant 0 : i32
    return %c0_i32, %c0_i32_0 : i32, i32
  }
  func.func @transform_9(%arg0: i32, %arg1: i32) -> (i32, i32) {
    %c0_i32 = arith.constant 0 : i32
    %c0_i32_0 = arith.constant 0 : i32
    %c0_i32_1 = arith.constant 0 : i32
    return %c0_i32, %c0_i32_0 : i32, i32
  }
  func.func @transform_10(%arg0: i32, %arg1: i32) -> (i32, i32) {
    %c0_i32 = arith.constant 0 : i32
    %c0_i32_0 = arith.constant 0 : i32
    %c0_i32_1 = arith.constant 0 : i32
    return %c0_i32, %c0_i32_0 : i32, i32
  }
  func.func @transform_11(%arg0: i32, %arg1: i32) -> (i32, i32) {
    %c0_i32 = arith.constant 0 : i32
    %c0_i32_0 = arith.constant 0 : i32
    %c0_i32_1 = arith.constant 0 : i32
    return %c0_i32, %c0_i32_0 : i32, i32
  }
  func.func @transform_12(%arg0: i32, %arg1: i32) -> (i32, i32) {
    %c0_i32 = arith.constant 0 : i32
    %c0_i32_0 = arith.constant 0 : i32
    %c0_i32_1 = arith.constant 0 : i32
    return %c0_i32, %c0_i32_0 : i32, i32
  }
  func.func @transform_13(%arg0: i32, %arg1: i32) -> (i32, i32, i32) {
    %c0_i32 = arith.constant 0 : i32
    %c0_i32_0 = arith.constant 0 : i32
    return %arg0, %arg1, %c0_i32 : i32, i32, i32
  }
}

</mosaic_0001>

<bundles_post_ra>
// kernel: tpu_custom_call.1
= control target key start
LH: loop header
LB: loop body
LE: loop exit
PB: predicated region body
PF: predicated region fallthrough
CT: control target
= control target key end

     0   :  { %s3808_s0 = inlined_call_operand.vmem [shape: f32[2,16,32], index: 0, kind: input, shape index: {}]   ;;  %s3809_s1 = inlined_call_operand.hbm [shape: f32[2,16,32], index: 1, kind: input, shape index: {}]   ;;  %s3810_s2 = inlined_call_operand.hbm [shape: f32[2,16,32], index: 2, kind: input, shape index: {}]   ;;  %s3811_s3 = inlined_call_operand.vmem [shape: f32[2,16,1], index: 3, kind: input, shape index: {}]   ;;  %s3812_s4 = inlined_call_operand.hbm [shape: f32[2,1,16], index: 4, kind: input, shape index: {}]   ;;  %s3813_s5 = inlined_call_operand.hbm [shape: f32[32,32], index: 5, kind: input, shape index: {}]   ;;  %s3814_s6 = inlined_call_operand.hbm [shape: f32[1,32], index: 6, kind: input, shape index: {}]   ;;  %s3815_s7 = inlined_call_operand.hbm [shape: f32[32,32], index: 7, kind: input, shape index: {}]   ;;  %s3816_s8 = inlined_call_operand.hbm [shape: f32[1,32], index: 8, kind: input, shape index: {}]   ;;  %s3817_s9 = inlined_call_operand.vmem [shape: f32[32,32], index: 9, kind: input, shape index: {}]   ;;  %s3818_s10 = inlined_call_operand.vmem [shape: f32[1,32], index: 10, kind: input, shape index: {}]   ;;  %s3819_s11 = inlined_call_operand.hbm [shape: f32[32,32], index: 11, kind: input, shape index: {}]   ;;  %s3820_s12 = inlined_call_operand.vmem [shape: f32[1,32], index: 12, kind: input, shape index: {}]   ;;  %s3821_s13 = inlined_call_operand.hbm [shape: f32[2,16,32], index: 13, kind: output, shape index: {}]  }
   0x1   :  { %3856 = sst [smem:[#allocation39_spill]] %s3808_s0 }
   0x2   :  { %3857 = sst [smem:[#allocation40_spill]] %s3810_s2 }
   0x3   :  { %3858 = sst [smem:[#allocation41_spill]] %s3811_s3 }
   0x4   :  { %3859 = sst [smem:[#allocation42_spill]] %s3813_s5 }
   0x5   :  { %3860 = sst [smem:[#allocation43_spill]] %s3815_s7 }
   0x6   :  { %3861 = sst [smem:[#allocation44_spill]] %s3817_s9 }
   0x7   :  { %3862 = sst [smem:[#allocation45_spill]] %s3818_s10 }
   0x8   :  { %3863 = sst [smem:[#allocation46_spill]] %s3820_s12 }
   0x9   :  { %3864 = sst [smem:[#allocation47_spill]] %s3821_s13 }
   0xa   :  { %18 = vsyncpa [#allocation5], 0 }
   0xb   :  { %20 = vsyncpa [#allocation5 + $0x1], 0 }
   0xc   :  { %21 = vsyncpa [#allocation8], 0 }
   0xd   :  { %23 = vsyncpa [#allocation8 + $0x1], 0 }
   0xe   :  { %24 = vsyncpa [#allocation11], 0 }
   0xf   :  { %25 = vsyncpa [#allocation14], 0 }
  0x10   :  { %26 = vsyncpa [#allocation17], 0 }
  0x11   :  { %27 = vsyncpa [#allocation6], 0 }
  0x12   :  { %29 = vsyncpa [#allocation6 + $0x1], 0  ;;  %s3171_s25 = smov 0   ;;  %s3173_s26 = smov 0  }
  0x13   :  { %s3175_s27 = smov 0   ;;  %s3177_s28 = smov 0  }
  0x14   :  { %s3179_s29 = smov 0   ;;  %s3181_s30 = smov 0  }
  0x15   :  { %s3183_s14 = smov 0   ;;  %s3185_s15 = smov 0  }
  0x16   :  { %s3187_s16 = smov 0   ;;  %s3189_s17 = smov 0  }
  0x17   :  { %s3191_s18 = smov 0  }
  0x18 LB: > { %3865 = sst [smem:[#allocation25_spill]] %s3041_s25  ;;  %s3227_s19 = sadd.s32 4294967295, %s3081_s18   ;;  %s3081_s18 = sphi %s3191_s18, %s35_s18   ;;  %s3077_s17 = sphi %s3189_s17, %s3942_s17   ;;  %s3073_s16 = sphi %s3187_s16, %s3937_s16   ;;  %s3069_s15 = sphi %s3185_s15, %s3941_s15   ;;  %s3065_s14 = sphi %s3183_s14, %s3936_s14   ;;  %s3061_s30 = sphi %s3181_s30, %s3935_s30   ;;  %s3057_s29 = sphi %s3179_s29, %s3940_s29   ;;  %s3053_s28 = sphi %s3177_s28, %s3939_s28   ;;  %s3049_s27 = sphi %s3175_s27, %s3933_s27   ;;  %s3045_s26 = sphi %s3173_s26, %s3932_s26   ;;  %s3041_s25 = sphi %s3171_s25, %s3931_s25  }
  0x19   : > { %3866 = sst [smem:[#allocation26_spill]] %s3045_s26  ;;  %s2214_s20 = sadd.s32 4294967294, %s3081_s18  }
  0x1a   : > { %3867 = sst [smem:[#allocation27_spill]] %s3049_s27  ;;  %p3828_p0 = scmp.eq.s32.totalorder %s3227_s19, 0 }
  0x1b   : > { %3868 = sst [smem:[#allocation28_spill]] %s3061_s30  ;;  %p368_p1 = scmp.ne.s32.totalorder %s3049_s27, %s3045_s26 }
  0x1c   : > { %3869 = sst [smem:[#allocation29_spill]] %s3065_s14  ;;  %p369_p2 = scmp.eq.s32.totalorder %s3227_s19, 3 }
  0x1d   : > { %3870 = sst [smem:[#allocation30_spill]] %s3069_s15  ;;  %p374_p3 = scmp.ne.s32.totalorder %s3045_s26, %s3041_s25 }
  0x1e   : > { %3871 = sst [smem:[#allocation31_spill]] %s3073_s16  ;;  %p375_p4 = scmp.eq.s32.totalorder %s2214_s20, 3 }
  0x1f   : > { %p2215_p5 = scmp.ge.s32.totalorder %s3081_s18, 1  ;;  %p3237_p6 = por %p369_p2, %p368_p1 }
  0x20   : > { %p382_p7 = scmp.lt.s32.totalorder %s3081_s18, 5  ;;  %p3242_p8 = por %p375_p4, %p374_p3 }
  0x21   : > { %s3872_s21 = scalar_select %p3237_p6, 1, 0 }
  0x22   : > { %s3874_s22 = scalar_select %p3242_p8, 1, 0 }
  0x23   : > { %3873 = sst [smem:[#allocation32_spill]] %s3872_s21  ;;  %p3246_p9 = pnand %p2215_p5, %p382_p7 }
  0x24   : > { %3875 = sst [smem:[#allocation33_spill]] %s3874_s22  ;;  %s3083_s24 = smov [#allocation10]  }
  0x25   : > { %s3876_s23 = scalar_select %p3246_p9, 1, 0 }
  0x26   : > { %s394_s13 = sshll.u32 %s3083_s24, 4  ;;  %p2521_p10 = pneg %p3246_p9  ;;  %s395_s13 = int_to_ptr.vmem [resolvable:$true] %s394_s13 }
  0x27   : > { %3877 = sst [smem:[#allocation34_spill]] %s3876_s23  ;;  %s3084_s25 = smov [#allocation13]  }
  0x28   : > { %p3254_p11 = pnand %p2521_p10, %p3828_p0  ;;  %s418_s12 = sshll.u32 %s3084_s25, 4  ;;  %s3258_s12 = int_to_ptr.vmem [resolvable:$true] %s418_s12 }
  0x29   : > { %s3879_s5 = sld [smem:[#allocation42_spill]] }
  0x2a   : > { %s3878_s20 = scalar_select %p3254_p11, 1, 0 }
  0x2b   : > { %p3268_p13 = pneg %p3254_p11 }
  0x2d   : > { %s3880_s24 = scalar_select %p3268_p13, 1, 0 }
  0x2f   : > { %s2713_s10 = scalar_lea.hbm %s3879_s5, 512 }
  0x30   : > { %p2714_p12 = scmp.ne.s32.totalorder %s3879_s5, %s2713_s10  ;;  %p2720_p3 = scmp.lt.u32.totalorder %s2713_s10, %s3879_s5 }
  0x32   : > { %p2716_p1 = pnand %p3268_p13, %p2714_p12 }
  0x34   : > { %p2717_p2 = pneg %p2716_p1 }
  0x36   : > { %p2722_p4 = pnand %p2720_p3, %p2717_p2 }
  0x38   : > { %2725 = shalt.err (!%p2722_p4)
}
  0x39   : > { %s2726_s21 = scalar_lea.vmem %s395_s13, 512  ;;  %p2734_p0 = scmp.lt.s32.totalorder %s395_s13, %s395_s13 }
  0x3a   : > { %p2727_p5 = scmp.ne.s32.totalorder %s395_s13, %s2726_s21  ;;  %p2735_p8 = scmp.lt.s32.totalorder %s2726_s21, %s2726_s21 }
  0x3c   : > { %p2729_p7 = pnand %p2727_p5, %p3268_p13  ;;  %p2736_p6 = por %p2735_p8, %p2734_p0 }
  0x3e   : > { %p2730_p10 = pneg %p2729_p7 }
  0x40   : > { %p2737_p9 = pnand %p2736_p6, %p2730_p10 }
  0x42   : > { %2740 = shalt.err (!%p2737_p9)
}
  0x43   : > { %s3836_s3 = smov 128   ;;  %s3838_s9 = smov 8  }
  0x44   : > { %2524 = dma.hbm_to_vmem [thread:$0]  (!%p3254_p11), %s3879_s5, 512, %s395_s13, [#allocation11], %s3836_s3, %s3836_s3, %s3838_s9  }
  0x45   : > { %s3881_s7 = sld [smem:[#allocation43_spill]] }
  0x4b   : > { %s2741_s14 = scalar_lea.hbm %s3881_s7, 512 }
  0x4c   : > { %p2742_p0 = scmp.ne.s32.totalorder %s3881_s7, %s2741_s14  ;;  %p2748_p9 = scmp.lt.u32.totalorder %s2741_s14, %s3881_s7 }
  0x4e   : > { %p2744_p6 = pnand %p2742_p0, %p3268_p13 }
  0x50   : > { %p2745_p8 = pneg %p2744_p6 }
  0x52   : > { %p2750_p12 = pnand %p2748_p9, %p2745_p8 }
  0x54   : > { %2753 = shalt.err (!%p2750_p12)
}
  0x55   : > { %s2754_s13 = scalar_lea.vmem %s3258_s12, 512  ;;  %p2762_p4 = scmp.lt.s32.totalorder %s3258_s12, %s3258_s12 }
  0x56   : > { %p2755_p1 = scmp.ne.s32.totalorder %s3258_s12, %s2754_s13  ;;  %p2763_p5 = scmp.lt.s32.totalorder %s2754_s13, %s2754_s13 }
  0x58   : > { %p2757_p2 = pnand %p2755_p1, %p3268_p13  ;;  %p2764_p7 = por %p2763_p5, %p2762_p4 }
  0x5a   : > { %p2758_p3 = pneg %p2757_p2 }
  0x5c   : > { %p2765_p10 = pnand %p2764_p7, %p2758_p3 }
  0x5e   : > { %2768 = shalt.err (!%p2765_p10)
}
  0x5f   : > { %2530 = dma.hbm_to_vmem [thread:$0]  (!%p3254_p11), %s3881_s7, 512, %s3258_s12, [#allocation14], %s3836_s3, %s3836_s3, %s3838_s9  }
  0x60   : > { %s44_s15 = sadd.s32 1, %s3073_s16  ;;  %s47_s23 = sadd.s32 1, %s3077_s17 }
  0x61   : > { %p45_p0 = scmp.ge.s32.totalorder %s44_s15, 2  ;;  %s82_s0 = sadd.s32 1, %s3061_s30 }
  0x62   : > { %p89_p6 = scmp.ne.s32.totalorder %s3061_s30, %s3057_s29  ;;  %p90_p8 = scmp.eq.s32.totalorder %s3081_s18, 0 }
  0x63   : > { %s3944_s15 = smov (%p45_p0, %s44_s15), 0  ;;  %s3946_s23 = smov (!%p45_p0, %s47_s23), %s3077_s17 }
  0x64   : > { %3882 = sst [smem:[#allocation35_spill]] %s3944_s15  ;;  %p95_p9 = scmp.ne.s32.totalorder %s3057_s29, %s3053_s28 }
  0x65   : > { %p49_p12 = scmp.ge.s32.totalorder %s3946_s23, 2  ;;  %s354_s10 = ssub.s32 %s3073_s16, %s3944_s15 }
  0x66   : > { %p3326_p1 = por %p90_p8, %p89_p6  ;;  %p3884_p2 = scmp.eq.s32.totalorder %s3227_s19, 0 }
  0x67   : > { %s3948_s23 = smov (%p49_p12, %s3946_s23), 0  ;;  %s358_s25 = sadd.s32 1, %s3049_s27 }
  0x68   : > { %p3332_p3 = por %p3884_p2, %p95_p9  ;;  %3886 = sst [smem:[#allocation36_spill]] %s3948_s23 }
  0x69   : > { %p2556_p4 = scmp.lt.s32.totalorder %s3081_s18, 4  ;;  %s79_s28 = ssub.s32 %s3077_s17, %s3948_s23 }
  0x6a   : > { %s3885_s22 = scalar_select %p3332_p3, 1, 0 }
  0x6b   : > { %s3343_s21 = sand.u32 1, %s3061_s30   ;;  %p80_p5 = scmp.eq.s32.totalorder %s79_s28, 0 }
  0x6c   : > { %s355_s13 = sor.u32 %s354_s10, %s79_s28  ;;  %s3843_s26 = sshll.u32 %s3343_s21, 4 }
  0x6d   : > { %p356_p7 = scmp.eq.s32.totalorder %s355_s13, 0  ;;  %s3849_s9 = sshll.u32 %s3077_s17, 8 }
  0x6e   : > { %s3347_s14 = scalar_select %p80_p5, %s3061_s30, %s82_s0  }
  0x6f   : > { %s3350_s3 = scalar_select %p356_p7, %s3049_s27, %s358_s25  }
  0x70   : > { %3887 = sst [smem:[#allocation37_spill]] %s3347_s14  ;;  %p3355_p10 = pnand %p2556_p4, %p3326_p1 }
  0x71   : > { %3888 = sst [smem:[#allocation38_spill]] %s3350_s3  ;;  %s497_s7 = sand.u32 1, %s3081_s18  }
  0x72   : > { %s3889_s5 = scalar_select %p3355_p10, 1, 0 }
  0x73   : > { %s3890_s2 = sld [smem:[#allocation40_spill]]  ;;  %s501_s0 = scalar_lea.vmem [#allocation7], %s3843_s26 }
  0x74   : > { %s508_s10 = sshll.u32 %s501_s0, 4  ;;  %s3371_s12 = scalar_lea.sflag [#allocation8], %s497_s7  ;;  %s3369_s10 = int_to_ptr.vmem [resolvable:$true] %s508_s10 }
  0x75   : > { %p3377_p6 = pneg %p3355_p10 }
  0x77   : > { %s3891_s28 = scalar_select %p3377_p6, 1, 0 }
  0x79   : > { %s3365_s16 = scalar_lea.hbm %s3890_s2, %s3849_s9  ;;  %s2774_s13 = scalar_lea.hbm %s3890_s2, 512 }
  0x7a   : > { %s2769_s25 = scalar_lea.hbm %s3365_s16, 256  ;;  %p2775_p12 = scmp.lt.u32.totalorder %s3365_s16, %s3890_s2 }
  0x7b   : > { %p2770_p0 = scmp.ne.s32.totalorder %s3365_s16, %s2769_s25  ;;  %p2776_p1 = scmp.lt.u32.totalorder %s2774_s13, %s2769_s25 }
  0x7c   : > { %p2778_p4 = scmp.lt.u32.totalorder %s2769_s25, %s3365_s16 }
  0x7d   : > { %p2772_p8 = pnand %p3377_p6, %p2770_p0  ;;  %p2777_p2 = por %p2776_p1, %p2775_p12 }
  0x7f   : > { %p2773_p9 = pneg %p2772_p8  ;;  %p2779_p5 = por %p2778_p4, %p2777_p2 }
  0x81   : > { %p2780_p7 = pnand %p2779_p5, %p2773_p9 }
  0x83   : > { %2783 = shalt.err (!%p2780_p7)
}
  0x84   : > { %s2784_s7 = scalar_lea.vmem %s3369_s10, 256  ;;  %s3087_s15 = smov [#allocation7]  }
  0x85   : > { %p2785_p0 = scmp.ne.s32.totalorder %s3369_s10, %s2784_s7  ;;  %s2789_s23 = sshll.u32 %s3087_s15, 4  ;;  %s2790_s23 = int_to_ptr.vmem [resolvable:$false] %s2789_s23 }
  0x86   : > { %s2791_s26 = scalar_lea.vmem %s2790_s23, 512  ;;  %p2792_p11 = scmp.lt.s32.totalorder %s3369_s10, %s2790_s23 }
  0x87   : > { %p2787_p8 = pnand %p2785_p0, %p3377_p6  ;;  %p2793_p13 = scmp.lt.s32.totalorder %s2791_s26, %s2784_s7 }
  0x89   : > { %p2788_p3 = pneg %p2787_p8  ;;  %p2794_p12 = por %p2793_p13, %p2792_p11 }
  0x8b   : > { %p2795_p1 = pnand %p2794_p12, %p2788_p3 }
  0x8d   : > { %2798 = shalt.err (!%p2795_p1)
}
  0x8e   : > { %s3892_s25 = smov 8   ;;  %s3893_s13 = smov 128  }
  0x8f   : > { %2543 = dma.hbm_to_vmem [thread:$0]  (!%p3355_p10), %s3365_s16, 256, %s3369_s10, %s3371_s12, %s3893_s13, %s3893_s13, %s3892_s25  }
  0x90   : > { %s3088_s0 = smov [#allocation12]   ;;  %s3089_s15 = smov [#allocation15]  }
  0x91   : > { %s408_s9 = sshll.u32 %s3088_s0, 4  ;;  %s432_s2 = sshll.u32 %s3089_s15, 4  ;;  %s409_s9 = int_to_ptr.vmem [resolvable:$true] %s408_s9  ;;  %s433_s2 = int_to_ptr.vmem [resolvable:$true] %s432_s2 }
  0x92   : > { %s2799_s26 = scalar_lea.hbm %s3814_s6, 16  ;;  %p3894_p13 = scmp.ne.s32.totalorder %s3880_s24, 0 }
  0x93   : > { %p2800_p11 = scmp.ne.s32.totalorder %s3814_s6, %s2799_s26  ;;  %p2806_p2 = scmp.lt.u32.totalorder %s2799_s26, %s3814_s6 }
  0x95   : > { %p2802_p3 = pnand %p2800_p11, %p3894_p13 }
  0x97   : > { %p2803_p9 = pneg %p2802_p3 }
  0x99   : > { %p2808_p4 = pnand %p2806_p2, %p2803_p9 }
  0x9b   : > { %2811 = shalt.err (!%p2808_p4)
}
  0x9c   : > { %s2812_s16 = scalar_lea.vmem %s409_s9, 16  ;;  %s2819_s10 = scalar_lea.vmem %s409_s9, 32 }
  0x9d   : > { %p2813_p5 = scmp.ne.s32.totalorder %s409_s9, %s2812_s16  ;;  %p2820_p8 = scmp.lt.s32.totalorder %s409_s9, %s409_s9 }
  0x9e   : > { %p2821_p12 = scmp.lt.s32.totalorder %s2819_s10, %s2812_s16 }
  0x9f   : > { %p2815_p7 = pnand %p2813_p5, %p3894_p13 }
  0xa0   : > { %p2822_p1 = por %p2821_p12, %p2820_p8 }
  0xa1   : > { %p2816_p0 = pneg %p2815_p7 }
  0xa3   : > { %p2823_p10 = pnand %p2822_p1, %p2816_p0 }
  0xa5   : > { %2826 = shalt.err (!%p2823_p10)
}
  0xa6   : > { %p3895_p11 = scmp.ne.s32.totalorder %s3878_s20, 0  ;;  %s2827_s0 = scalar_lea.hbm %s3816_s8, 16 }
  0xa7   : > { %p2828_p3 = scmp.ne.s32.totalorder %s3816_s8, %s2827_s0  ;;  %p2834_p10 = scmp.lt.u32.totalorder %s2827_s0, %s3816_s8 }
  0xa8   : > { %2527 = dma.hbm_to_vmem [thread:$0]  (!%p3895_p11), %s3814_s6, 16, %s409_s9, [#allocation11]  }
  0xa9   : > { %p2830_p9 = pnand %p2828_p3, %p3894_p13 }
  0xab   : > { %p2831_p2 = pneg %p2830_p9 }
  0xad   : > { %p2836_p4 = pnand %p2834_p10, %p2831_p2 }
  0xaf   : > { %2839 = shalt.err (!%p2836_p4)
}
  0xb0   : > { %s2840_s16 = scalar_lea.vmem %s433_s2, 16  ;;  %s2847_s9 = scalar_lea.vmem %s433_s2, 32 }
  0xb1   : > { %p2841_p5 = scmp.ne.s32.totalorder %s433_s2, %s2840_s16  ;;  %p2848_p8 = scmp.lt.s32.totalorder %s433_s2, %s433_s2 }
  0xb2   : > { %p2849_p12 = scmp.lt.s32.totalorder %s2847_s9, %s2840_s16 }
  0xb3   : > { %p2843_p7 = pnand %p2841_p5, %p3894_p13 }
  0xb4   : > { %p2850_p1 = por %p2849_p12, %p2848_p8 }
  0xb5   : > { %p2844_p0 = pneg %p2843_p7 }
  0xb7   : > { %p2851_p6 = pnand %p2850_p1, %p2844_p0 }
  0xb9   : > { %2854 = shalt.err (!%p2851_p6)
}
  0xba   : > { %2533 = dma.hbm_to_vmem [thread:$0]  (!%p3895_p11), %s3816_s8, 16, %s433_s2, [#allocation14]  }
  0xbb   : > { %s3090_s14 = smov [#allocation16]   ;;  %s2855_s15 = scalar_lea.hbm %s3819_s11, 512 }
  0xbc   : > { %s448_s27 = sshll.u32 %s3090_s14, 4  ;;  %p2856_p3 = scmp.ne.s32.totalorder %s3819_s11, %s2855_s15  ;;  %s449_s27 = int_to_ptr.vmem [resolvable:$true] %s448_s27 }
  0xbd   : > { %p2862_p2 = scmp.lt.u32.totalorder %s2855_s15, %s3819_s11 }
  0xbe   : > { %p2858_p6 = pnand %p2856_p3, %p3894_p13 }
  0xc0   : > { %p2859_p9 = pneg %p2858_p6 }
  0xc2   : > { %p2864_p10 = pnand %p2862_p2, %p2859_p9 }
  0xc4   : > { %2867 = shalt.err (!%p2864_p10)
}
  0xc5   : > { %s2868_s2 = scalar_lea.vmem %s449_s27, 512  ;;  %p2876_p0 = scmp.lt.s32.totalorder %s449_s27, %s449_s27 }
  0xc6   : > { %p2869_p4 = scmp.ne.s32.totalorder %s449_s27, %s2868_s2  ;;  %p2877_p8 = scmp.lt.s32.totalorder %s2868_s2, %s2868_s2 }
  0xc8   : > { %p2871_p5 = pnand %p2869_p4, %p3894_p13  ;;  %p2878_p12 = por %p2877_p8, %p2876_p0 }
  0xca   : > { %p2872_p7 = pneg %p2871_p5 }
  0xcc   : > { %p2879_p1 = pnand %p2878_p12, %p2872_p7 }
  0xce   : > { %2882 = shalt.err (!%p2879_p1)
}
  0xcf   : > { %2536 = dma.hbm_to_vmem [thread:$0]  (!%p3895_p11), %s3819_s11, 512, %s449_s27, [#allocation17], %s3893_s13, %s3893_s13, %s3892_s25  }
  0xd0   : > { %s3896_s24 = sshll.u32 %s3077_s17, 8  ;;  %s3897_s0 = sshll.u32 %s3343_s21, 4 }
  0xd1   : > { %s3466_s3 = scalar_lea.hbm %s3809_s1, %s3896_s24  ;;  %s480_s20 = scalar_lea.vmem [#allocation4], %s3897_s0 }
  0xd2   : > { %s487_s15 = sshll.u32 %s480_s20, 4  ;;  %s477_s23 = scalar_lea.sflag [#allocation5], %s3343_s21  ;;  %s3470_s15 = int_to_ptr.vmem [resolvable:$true] %s487_s15 }
  0xd3   : > { %s2883_s7 = scalar_lea.hbm %s3466_s3, 256  ;;  %p3898_p3 = scmp.ne.s32.totalorder %s3891_s28, 0 }
  0xd4   : > { %p2884_p13 = scmp.ne.s32.totalorder %s3466_s3, %s2883_s7  ;;  %s2888_s16 = scalar_lea.hbm %s3809_s1, 512 }
  0xd5   : > { %p2889_p9 = scmp.lt.u32.totalorder %s3466_s3, %s3809_s1  ;;  %p2890_p2 = scmp.lt.u32.totalorder %s2888_s16, %s2883_s7 }
  0xd6   : > { %p2886_p11 = pnand %p2884_p13, %p3898_p3  ;;  %p2892_p4 = scmp.lt.u32.totalorder %s2883_s7, %s3466_s3 }
  0xd7   : > { %p2891_p10 = por %p2890_p2, %p2889_p9 }
  0xd8   : > { %p2887_p6 = pneg %p2886_p11 }
  0xd9   : > { %p2893_p5 = por %p2892_p4, %p2891_p10 }
  0xdb   : > { %p2894_p7 = pnand %p2893_p5, %p2887_p6 }
  0xdd   : > { %2897 = shalt.err (!%p2894_p7)
}
  0xde   : > { %s2898_s10 = scalar_lea.vmem %s3470_s15, 256  ;;  %s3091_s24 = smov [#allocation4]  }
  0xdf   : > { %p2899_p0 = scmp.ne.s32.totalorder %s3470_s15, %s2898_s10  ;;  %s2903_s30 = sshll.u32 %s3091_s24, 4  ;;  %s2904_s30 = int_to_ptr.vmem [resolvable:$false] %s2903_s30 }
  0xe0   : > { %s2905_s14 = scalar_lea.vmem %s2904_s30, 512  ;;  %p2906_p1 = scmp.lt.s32.totalorder %s3470_s15, %s2904_s30 }
  0xe1   : > { %p2901_p8 = pnand %p2899_p0, %p3898_p3  ;;  %p2907_p13 = scmp.lt.s32.totalorder %s2905_s14, %s2898_s10 }
  0xe3   : > { %p2902_p12 = pneg %p2901_p8  ;;  %p2908_p11 = por %p2907_p13, %p2906_p1 }
  0xe5   : > { %p2909_p9 = pnand %p2908_p11, %p2902_p12 }
  0xe7   : > { %2912 = shalt.err (!%p2909_p9)
}
  0xe8   : > { %p3899_p6 = scmp.ne.s32.totalorder %s3889_s5, 0  ;;  %s2228_s0 = sshll.u32 %s3077_s17, 4 }
  0xe9   : > { %s532_s20 = scalar_lea.vmem [#allocation9], %s3343_s21  ;;  %s537_s16 = scalar_lea.hbm %s3812_s4, %s2228_s0 }
  0xea   : > { %2540 = dma.hbm_to_vmem [thread:$0]  (!%p3899_p6), %s3466_s3, 256, %s3470_s15, %s477_s23, %s3893_s13, %s3893_s13, %s3892_s25  }
  0xeb   : > { %s539_s7 = sshll.u32 %s532_s20, 4  ;;  %s2913_s2 = scalar_lea.hbm %s537_s16, 16  ;;  %s540_s7 = int_to_ptr.vmem [resolvable:$true] %s539_s7 }
  0xec   : > { %p2914_p2 = scmp.ne.s32.totalorder %s537_s16, %s2913_s2  ;;  %s2918_s24 = scalar_lea.hbm %s3812_s4, 32 }
  0xed   : > { %p2919_p5 = scmp.lt.u32.totalorder %s537_s16, %s3812_s4  ;;  %p2920_p7 = scmp.lt.u32.totalorder %s2918_s24, %s2913_s2 }
  0xee   : > { %p2916_p10 = pnand %p2914_p2, %p3898_p3  ;;  %p2922_p8 = scmp.lt.u32.totalorder %s2913_s2, %s537_s16 }
  0xef   : > { %p2921_p0 = por %p2920_p7, %p2919_p5 }
  0xf0   : > { %p2917_p4 = pneg %p2916_p10 }
  0xf1   : > { %p2923_p12 = por %p2922_p8, %p2921_p0 }
  0xf3   : > { %p2924_p1 = pnand %p2923_p12, %p2917_p4 }
  0xf5   : > { %2927 = shalt.err (!%p2924_p1)
}
  0xf6   : > { %s2928_s21 = scalar_lea.vmem %s540_s7, 16  ;;  %s3092_s25 = smov [#allocation9]  }
  0xf7   : > { %p2929_p13 = scmp.ne.s32.totalorder %s540_s7, %s2928_s21  ;;  %s2933_s13 = sshll.u32 %s3092_s25, 4  ;;  %s2934_s13 = int_to_ptr.vmem [resolvable:$false] %s2933_s13 }
  0xf8   : > { %s2935_s3 = scalar_lea.vmem %s2934_s13, 32  ;;  %p2936_p2 = scmp.lt.s32.totalorder %s540_s7, %s2934_s13 }
  0xf9   : > { %p2931_p11 = pnand %p2929_p13, %p3898_p3  ;;  %p2937_p10 = scmp.lt.s32.totalorder %s2935_s3, %s2928_s21 }
  0xfb   : > { %p2932_p9 = pneg %p2931_p11  ;;  %p2938_p6 = por %p2937_p10, %p2936_p2 }
  0xfd   : > { %p2939_p5 = pnand %p2938_p6, %p2932_p9 }
  0xff   : > { %2942 = shalt.err (!%p2939_p5)
}
 0x100   : > { %p3900_p7 = scmp.ne.s32.totalorder %s3889_s5, 0  ;;  %s3901_s15 = sld [smem:[#allocation34_spill]] }
 0x102   : > { %2546 = dma.hbm_to_vmem [thread:$0]  (!%p3900_p7), %s537_s16, 16, %s540_s7, %s3371_s12  }
 0x106   : > { %p3902_p4 = scmp.ne.s32.totalorder %s3901_s15, 0 }
 0x107   : > { %s3520_s28 = sand.u32 (!%p3902_p4), 1, %s3057_s29   ;;  %p3903_p3 = scmp.ne.s32.totalorder (!%p3902_p4), %s3885_s22, 0 }
 0x108   : > { %548 = sbr.rel (%p3902_p4) target bundleno = 2796 (0xaec), region = 72  ;;  %s2230_s23 = sshll.u32 (!%p3902_p4), %s3520_s28, 4 }
 0x109   : > { %s551_s0 = scalar_lea.sflag (!%p3902_p4), [#allocation5], %s3520_s28  ;;  %s3524_s20 = scalar_lea.vmem (!%p3902_p4), [#allocation4], %s2230_s23 }
 0x10f   : > { %3016 = dma.done.wait (%p3903_p3), %s551_s0, 256  }
 0x110   : > { %3018 = vsyncadd (%p3903_p3), %s551_s0, 4294967040  ;;  %s559_s5 = sand.u32 1, %s3227_s19   ;;  %s3531_s7 = scalar_lea.vmem [#allocation7], %s2230_s23 }
 0x111   : > { %s560_s12 = scalar_lea.sflag [#allocation8], %s559_s5 }
 0x112   : > { %3020 = dma.done.wait (%p3903_p3), %s560_s12, 272  }
 0x113   : > { %3022 = vsyncadd (%p3903_p3), %s560_s12, 4294967024  ;;  %s571_s27 = scalar_lea.vmem [#allocation9], %s3520_s28  ;;  %p3904_p6 = scmp.eq.s32.totalorder %s3227_s19, 0 }
 0x115   : > { %3024 = dma.done.wait (%p3904_p6), [#allocation11], 528   ;;  %p3905_p0 = pmov %p3904_p6 }
 0x117   : > { %3026 = vsyncadd (%p3905_p0), [#allocation11], 4294966768  ;;  %p3906_p8 = pmov %p3905_p0 }
 0x118   : > { %p3907_p12 = pmov %p3905_p0 }
 0x119   : > { %3028 = dma.done.wait (%p3906_p8), [#allocation14], 528  }
 0x11a   : > { %3030 = vsyncadd (%p3907_p12), [#allocation14], 4294966768  ;;  %p3908_p1 = pmov %p3905_p0 }
 0x11b   : > { %p3909_p13 = pmov %p3905_p0 }
 0x11c   : > { %3032 = dma.done.wait (%p3908_p1), [#allocation17], 512  }
 0x11d   : > { %3034 = vsyncadd (%p3909_p13), [#allocation17], 4294966784  ;;  %s3910_s22 = sld [smem:[#allocation26_spill]]  ;;  %s3911_s26 = sld [smem:[#allocation30_spill]] }
 0x11e   : > { %s3912_s16 = sld [smem:[#allocation29_spill]]  ;;  %s3913_s25 = sld [smem:[#allocation39_spill]] }
 0x11f   : > { %s3914_s23 = sld [smem:[#allocation41_spill]] }
 0x123   : > { %s656_s2 = sand.u32 1, %s3910_s22   ;;  %p659_p11 = scmp.lt.s32.totalorder %s3911_s26, 1 }
 0x124   : > { %s3554_s9 = sshll.u32 %s656_s2, 3  ;;  %p661_p9 = scmp.lt.s32.totalorder %s3912_s16, 1 }
 0x125   : > { %s3950_s26 = smov (!%p659_p11, %s3911_s26), 1  ;;  %s658_s5 = scalar_lea.vmem [#allocation18], %s3554_s9 }
 0x126   : > { %s662_s10 = scalar_select %p661_p9, %s3912_s16, 1 }
 0x127   : > { %s2238_s24 = sshll.u32 %s3950_s26, 1  ;;  %p2242_p2 = scmp.ne.s32.totalorder %s3912_s16, 0 }
 0x128   : > { %s664_s30 = sadd.s32 %s2238_s24, %s662_s10  ;;  %v681_v0 = vld [vmem:[#allocation13] sm:$0xff] (!%p2242_p2)  ;;  %v682_v1 = vld [vmem:[#allocation13 + $0x8] sm:$0xff] (!%p2242_p2)  ;;  %s3915_s26 = sld [smem:[#allocation44_spill]] (!%p2242_p2)  ;;  %vm692_vm0 = vcmask (!%p2242_p2), 261120   ;;  %v683_v5 = vld [vmem:[#allocation13 + $0x10] sm:$0xff] (!%p2242_p2) }
 0x129   : > { %s2239_s14 = sshll.u32 %s664_s30, 3  ;;  %678 = sbr.rel (%p2242_p2) target bundleno = 530 (0x212), region = 108  ;;  %v2437_v3 = vpack.c.bf16 (!%p2242_p2), %v682_v1, %v681_v0  ;;  %v684_v6 = vld [vmem:[#allocation13 + $0x18] sm:$0xff] (!%p2242_p2)  ;;  %v2243_v16 = vld [vmem:[#allocation15] ss:$0 sm:$0xff] (!%p2242_p2) }
 0x12a   : > { %s3562_s13 = scalar_lea.vmem %s3913_s25, %s2239_s14  ;;  %s3567_s0 = scalar_lea.vmem %s3914_s23, %s2239_s14  ;;  %v2441_v8 = vpack.c.bf16 (!%p2242_p2), %v684_v6, %v683_v5  ;;  %v679_v11 = vld [vmem:[%s3524_s20] sm:$0xff] (!%p2242_p2)  ;;  %v680_v14 = vld [vmem:[%s3524_s20 + $0x8] sm:$0xff] (!%p2242_p2) }
 0x12b   : > { %2438 = vmatprep.subr.bf16.mxu0 (!%p2242_p2), %v2437_v3  ;;  %2336 = vmatprep.mubr.msk.f32.mxu0 (!%p2242_p2), %vm692_vm0, %v679_v11  ;;  %v776_v13 = vld [vmem:[%s3531_s7] sm:$0xff] (!%p2242_p2)  ;;  %v777_v15 = vld [vmem:[%s3531_s7 + $0x8] sm:$0xff] (!%p2242_p2)  ;;  %s3917_s15 = sld [smem:[#allocation45_spill]] (!%p2242_p2) }
 0x12c   : > { %2440 = vmatpush3.bf16.msra.mxu0 (!%p2242_p2), %v2437_v3  ;;  %2347 = vmatprep.mubr.msk.f32.mxu1 (!%p2242_p2), %vm692_vm0, %v776_v13 }
 0x12d   : > { %2442 = vmatprep.subr.bf16.mxu0 (!%p2242_p2), %v2441_v8 }
 0x12e   : > { %s3916_s10 = smov (!%p2242_p2), %s3915_s26  ;;  %v778_v2 = vld [vmem:[%s3915_s26] sm:$0xff] (!%p2242_p2) }
 0x12f   : > { %v779_v4 = vld [vmem:[%s3916_s10 + $0x8] sm:$0xff] (!%p2242_p2)  ;;  %v780_v9 = vld [vmem:[%s3916_s10 + $0x10] sm:$0xff] (!%p2242_p2)  ;;  %v781_v10 = vld [vmem:[%s3916_s10 + $0x18] sm:$0xff] (!%p2242_p2) }
 0x130   : > { %v2445_v7 = vpack.c.bf16 %v779_v4, %v778_v2  ;;  %v2449_v12 = vpack.c.bf16 %v781_v10, %v780_v9  ;;  %2444 = vmatpush3.bf16.msra.mxu0 %v2441_v8 }
 0x131   : > { %v2246_v17 = vld [vmem:[%s3917_s15] ss:$0 sm:$0xff] }
 0x132   : > { %2446 = vmatprep.subr.bf16.mxu1 %v2445_v7 }
 0x133   : > { %2448 = vmatpush3.bf16.msra.mxu1 %v2445_v7  ;;  %2337 = vmatmul.mubr.msk.f32.vlgmr.msra.gmra.mrb[0].mxu0 %vm692_vm0, %v680_v14 }
 0x134   : > { %2450 = vmatprep.subr.bf16.mxu1 %v2449_v12 }
 0x137   : > { %2452 = vmatpush3.bf16.msra.mxu1 %v2449_v12 }
 0x13a   : > { %2348 = vmatmul.mubr.msk.f32.vlgmr.msra.gmra.mrb[0].mxu1 %vm692_vm0, %v777_v15 }
 0x206   : > { %v2338_v18 = vpop.f32.mrb[0].mxu0 }
 0x207   : > { %v771_v19 = vadd.f32 %v2338_v18, %v2243_v16  ;;  %v765_v21 = vpop.f32.mrb[1].mxu0 }
 0x208   : > { %v766_v23 = vadd.f32 %v2243_v16, %v765_v21 }
 0x209   : > { %775 = vst.msk [vmem:[#allocation2 + $0x8] sm:$0xff] %vm692_vm0, %v771_v19 }
 0x20a   : > { %774 = vst.msk [vmem:[#allocation2] sm:$0xff] %vm692_vm0, %v766_v23 }
 0x20d   : > { %v2349_v20 = vpop.f32.mrb[0].mxu1 }
 0x20e   : > { %v867_v22 = vadd.f32 %v2349_v20, %v2246_v17  ;;  %v861_v24 = vpop.f32.mrb[1].mxu1 }
 0x20f   : > { %v862_v25 = vadd.f32 %v2246_v17, %v861_v24 }
 0x210   : > { %871 = vst.msk [vmem:[#allocation3 + $0x8] sm:$0xff] %vm692_vm0, %v867_v22 }
 0x211   : > { %870 = vst.msk [vmem:[#allocation3] sm:$0xff] %vm692_vm0, %v862_v25 }
 0x212 PF: > { %v873_v26 = vld [vmem:[#allocation10] sm:$0xff]  ;;  %v874_v27 = vld [vmem:[#allocation10 + $0x8] sm:$0xff]  ;;  %v875_v28 = vld [vmem:[#allocation10 + $0x10] sm:$0xff]  ;;  %v3093_v29 = vmov 0.0|0.0   ;;  %vm3094_vm1 = vmmov 0   ;;  %v3095_v32 = vmov 0.0   ;;  %v967_v47 = vlaneseq }
 0x213   : > { %2453 = vmatprep.subr.bf16.mxu0 %v3093_v29  ;;  %v2454_v30 = vpack.c.bf16 %v874_v27, %v873_v26  ;;  %v876_v31 = vld [vmem:[#allocation10 + $0x18] sm:$0xff]  ;;  %2358 = vmatprep.mubr.msk.f32.mxu0 %vm3094_vm1, %v3095_v32  ;;  %vm994_vm2 = vcmask 64512   ;;  %v991_v34 = vld [vmem:[#allocation2 + $0x8] sm:$0xff]  ;;  %vm884_vm4 = vcmask 261120   ;;  %v3096_v40 = vmov 0   ;;  %s3097_s20 = smov 120  }
 0x214   : > { %v990_v33 = vld [vmem:[#allocation2] sm:$0xff]  ;;  %2459 = vmatprep.subr.bf16.mxu1 %v3093_v29  ;;  %vm3604_vm3 = vmpackc.low %vm994_vm2, %vm994_vm2  ;;  %2365 = vmatprep.mubr.msk.f32.mxu1 %vm3094_vm1, %v3095_v32  ;;  %v2457_v36 = vpack.c.bf16 %v876_v31, %v875_v28  ;;  %v3635_v48 = vshrl.u32 %v967_v47, 7  ;;  %vm1074_vm6 = vcmask 130048   ;;  %s3098_s28 = smov 112   ;;  %s3099_s7 = smov 104   ;;  %v1334_v35 = vld [vmem:[#allocation16 + $0x8] sm:$0xff] }
 0x215   : > { %2455 = vmatpush3.bf16.msra.mxu0 %v2454_v30  ;;  %v2460_v37 = vpack.c.bf16 %v991_v34, %v990_v33  ;;  %v872_v38 = vld [vmem:[%s3562_s13] sm:$0xff]  ;;  %2665 = vset.pattern.permute.xlu0 %v3096_v40  ;;  %v3631_v46 = vpack.i.bf16 %v991_v34, %v990_v33  ;;  %vm976_vm7 = vcmask 122880   ;;  %s3921_s13 = sld [smem:[#allocation29_spill]]  ;;  %s3923_s12 = sld [smem:[#allocation32_spill]] }
 0x216   : > { %2456 = vmatprep.subr.bf16.mxu0 %v3093_v29  ;;  %v3620_v39 = vld [vmem:[%s3567_s0] sm:$0xff]  ;;  %2696 = vset.pattern.permute.xlu1 %v3096_v40  ;;  %v969_v49 = vsub.s32 0, %v3635_v48  ;;  %s3924_s30 = sld [smem:[#allocation46_spill]]  ;;  %s2006_s14 = sshll.u32 %s658_s5, 4  ;;  %s3743_s14 = int_to_ptr.vmem [resolvable:$true] %s2006_s14 }
 0x217   : > { %2462 = vmatpush3.bf16.xpose.msk.msra.mxu1 %vm3604_vm3, %v2460_v37  ;;  %963 = vperm.xlu0 %2665, %v3620_v39   ;;  %v2249_v41 = vld [vmem:[#allocation12] ss:$0 sm:$0xff]  ;;  %v3640_v50 = vld [vmem:[%s571_s27] sm:$0x1]  ;;  %v993_v1 = vld [vmem:[#allocation3 + $0x8] sm:$0xff]  ;;  %s3920_s27 = sld [smem:[#allocation30_spill]] }
 0x218   : > { %2463 = vmatprep.subr.bf16.mxu1 %v3093_v29  ;;  %2667 = vrot.lane.b32.xlu1 %v3631_v46, %s3097_s20  ;;  %v970_v51 = vrot.slane %v3640_v50, %v969_v49  ;;  %v992_v0 = vld [vmem:[#allocation3] sm:$0xff]  ;;  %vm981_vm9 = vcmp.ne.f32.partialorder %v3620_v39, 0.0  ;;  %s3925_s25 = sld [smem:[#allocation47_spill]] }
 0x219   : > { %2458 = vmatpush3.bf16.msra.mxu0 %v2457_v36  ;;  %v2464_v2 = vpack.c.bf16 %v993_v1, %v992_v0  ;;  %v3678_v30 = vpack.i.bf16 %v993_v1, %v992_v0 }
 0x21a   : > { %2470 = vmatprep.subr.bf16.mxu0 %v3093_v29 }
 0x21b   : > { %p3927_p5 = scmp.ne.s32.totalorder %s3923_s12, 0 }
 0x21c   : > { %2359 = vmatmul.mubr.msk.f32.vlgmr.msra.gmra.mrb[0].mxu0 %vm884_vm4, %v872_v38  ;;  %v2271_v39 = vld [vmem:[%s3924_s30] ss:$0 sm:$0xff] }
 0x21d   : > { %2386 = vmatprep.mubr.msk.f32.mxu0 %vm3094_vm1, %v3095_v32  ;;  %s2273_s0 = sshll.u32 %s3920_s27, 1 }
 0x21e   : > { %s2002_s22 = sadd.s32 %s3921_s13, %s2273_s0  ;;  %s3926_s3 = smov %s3925_s25 }
 0x21f   : > { %s2274_s16 = sshll.u32 %s2002_s22, 7 }
 0x220   : > { %s3741_s15 = scalar_lea.hbm %s3925_s25, %s2274_s16 }
 0x28a   : > { %v2668_v3 = vpop.permute.xlu1 %2667 }
 0x28b   : > { %v2670_v6 = vunpack.i.h.bf16 %v2668_v3  ;;  %v2669_v7 = vunpack.i.l.bf16 %v2668_v3 }
 0x28d   : > { %v2467_v10 = vpack.c.bf16 %v2670_v6, %v2669_v7 }
 0x296   : > { %v964_v52 = vpop.permute.xlu0 %963 }
 0x297   : > { %v972_v53 = vmul.f32 %v970_v51, %v964_v52 }
 0x299   : > { %vm973_vm5 = vcmp.eq.f32.partialorder %v972_v53, 0.0 }
 0x29a   : > { %v3646_v54 = vsel %vm973_vm5, -1e+30, %v3095_v32 }
 0x2ef   : > { %v954_v42 = vpop.f32.mrb[0].mxu0 }
 0x2f0   : > { %v955_v43 = vadd.f32 %v2249_v41, %v954_v42  ;;  %v2360_v44 = vpop.f32.mrb[1].mxu0 }
 0x2f2   : > { %v3625_v45 = vmul.f32 0.35355338, %v955_v43 }
 0x2f4   : > { %2366 = vmatmul.mubr.msk.f32.vlgmr.msra.gmra.mrb[0].mxu1 %vm994_vm2, %v3625_v45 }
 0x2f5   : > { %2372 = vmatprep.mubr.msk.f32.mxu1 %vm3094_vm1, %v3095_v32  ;;  %2465 = vmatpush3.bf16.msra.mxu1 %v2464_v2 }
 0x2f6   : > { %2466 = vmatprep.subr.bf16.mxu1 %v3093_v29 }
 0x3c7   : > { %v1070_v55 = vpop.f32.mrb[0].mxu1 }
 0x3c8   : > { %v1071_v56 = vadd.f32 %v1070_v55, %v3646_v54  ;;  %v2367_v57 = vpop.f32.mrb[1].mxu1 }
 0x3ca   : > { %v1075_v58 = vsel %vm1074_vm6, %v1071_v56, -inf }
 0x3cb   : > { %1076 = vmax.xlane.f32.xlu0 %v1075_v58 }
 0x458   : > { %v1077_v59 = vpop.xlane.xlu0 %1076 }
 0x459   : > { %v1078_v60 = vsub.f32 %v1071_v56, %v1077_v59 }
 0x45b   : > { %v1079_v61 = vmul.f32 1.442695, %v1078_v60  ;;  %v1159_v60 = vld [vmem:[#allocation16] sm:$0xff] }
 0x45d   : > { %2697 = vpow2.f32 %v1079_v61 }
 0x467   : > { %v2698_v62 = vpop.eup %2697 }
 0x468   : > { %v1081_v63 = vsel %vm1074_vm6, %v2698_v62, 0.0 }
 0x469   : > { %1082 = vadd.xlane.f32.xlu1 %v1081_v63 }
 0x47a   : > { %1160 = vrot.lane.b32.xlu1 %v3625_v45, %s3097_s20 }
 0x47e   : > { %2672 = vrot.lane.b32.xlu1 %v3631_v46, %s3098_s28 }
 0x482   : > { %1481 = vrot.lane.b32.xlu1 %v3625_v45, %s3098_s28 }
 0x4f6   : > { %v1083_v4 = vpop.xlane.xlu1 %1082 }
 0x4f7   : > { %2699 = vrcp.f32 %v1083_v4 }
 0x4fa   : > { %v1161_v5 = vpop.permute.xlu1 %1160 }
 0x4fe   : > { %v2673_v11 = vpop.permute.xlu1 %2672 }
 0x4ff   : > { %v2675_v12 = vunpack.i.h.bf16 %v2673_v11  ;;  %v2674_v13 = vunpack.i.l.bf16 %v2673_v11 }
 0x501   : > { %v2700_v8 = vpop.eup %2699  ;;  %v2474_v14 = vpack.c.bf16 %v2675_v12, %v2674_v13  ;;  %v975_v13 = vand.u32 2147483647, %v3640_v50 }
 0x502   : > { %v1085_v9 = vmul.f32 %v2700_v8, %v2698_v62  ;;  %v1482_v15 = vpop.permute.xlu1 %1481 }
 0x504   : > { %2373 = vmatmul.mubr.msk.f32.vlgmr.msra.gmra.mrb[2].mxu1 %vm1074_vm6, %v1085_v9 }
 0x505   : > { %2469 = vmatpush3.bf16.xpose.msk.msra.mxu1 %vm3604_vm3, %v2467_v10  ;;  %2379 = vmatprep.mubr.msk.f32.mxu1 %vm3094_vm1, %v3095_v32 }
 0x506   : > { %2473 = vmatprep.subr.bf16.mxu1 %v3093_v29 }
 0x50c   : > { %2380 = vmatmul.mubr.msk.f32.vlgmr.msra.gmra.mrb[4].mxu1 %vm994_vm2, %v1161_v5 }
 0x50d   : > { %2476 = vmatpush3.bf16.xpose.msk.msra.mxu1 %vm3604_vm3, %v2474_v14  ;;  %2403 = vmatprep.mubr.msk.f32.mxu1 %vm3094_vm1, %v3095_v32  ;;  %v977_v14 = vsel %vm976_vm7, %v975_v13, 0.0 }
 0x50e   : > { %2480 = vmatprep.subr.bf16.mxu1 %v3093_v29 }
 0x514   : > { %2404 = vmatmul.mubr.msk.f32.vlgmr.msra.gmra.mrb[6].mxu1 %vm994_vm2, %v1482_v15 }
 0x515   : > { %2422 = vmatprep.mubr.msk.f32.mxu1 %vm3094_vm1, %v3095_v32 }
 0x5d7   : > { %v3673_v16 = vpop.f32.mrb[2].mxu1 }
 0x5d8   : > { %v2374_v17 = vpop.f32.mrb[3].mxu1 }
 0x5df   : > { %v1238_v18 = vpop.f32.mrb[4].mxu1 }
 0x5e0   : > { %v1239_v19 = vadd.f32 %v1238_v18, %v3646_v54  ;;  %v2381_v20 = vpop.f32.mrb[5].mxu1 }
 0x5e2   : > { %v1242_v21 = vsel %vm1074_vm6, %v1239_v19, -inf }
 0x5e3   : > { %1243 = vmax.xlane.f32.xlu1 %v1242_v21 }
 0x5e7   : > { %v1559_v22 = vpop.f32.mrb[6].mxu1 }
 0x5e8   : > { %v2405_v23 = vpop.f32.mrb[7].mxu1  ;;  %v1560_v31 = vadd.f32 %v1559_v22, %v3646_v54  ;;  %v1900_v22 = vld [vmem:[#allocation16 + $0x18] sm:$0xff] }
 0x5ea   : > { %v1563_v33 = vsel %vm1074_vm6, %v1560_v31, -inf }
 0x670   : > { %v1244_v24 = vpop.xlane.xlu1 %1243 }
 0x671   : > { %v1245_v25 = vsub.f32 %v1239_v19, %v1244_v24 }
 0x673   : > { %v1246_v26 = vmul.f32 1.442695, %v1245_v25 }
 0x675   : > { %2701 = vpow2.f32 %v1246_v26 }
 0x67f   : > { %v2702_v27 = vpop.eup %2701 }
 0x680   : > { %v1248_v28 = vsel %vm1074_vm6, %v2702_v27, 0.0 }
 0x681   : > { %1249 = vadd.xlane.f32.xlu0 %v1248_v28 }
 0x697   : > { %2677 = vrot.lane.b32.xlu0 %v3678_v30, %s3097_s20  ;;  %s1991_s20 = scalar_lea.sflag [#allocation6], %s656_s2 }
 0x69b   : > { %2682 = vrot.lane.b32.xlu0 %v3631_v46, %s3099_s7 }
 0x69f   : > { %1728 = vrot.lane.b32.xlu0 %v3625_v45, %s3099_s7 }
 0x6be   : > { %1564 = vmax.xlane.f32.xlu0 %v1563_v33 }
 0x70e   : > { %v1250_v34 = vpop.xlane.xlu0 %1249 }
 0x70f   : > { %2703 = vrcp.f32 %v1250_v34 }
 0x712   : > { %v2678_v36 = vpop.permute.xlu0 %2677 }
 0x713   : > { %v2680_v37 = vunpack.i.h.bf16 %v2678_v36  ;;  %v2679_v38 = vunpack.i.l.bf16 %v2678_v36 }
 0x715   : > { %v2471_v41 = vpack.c.bf16 %v2680_v37, %v2679_v38 }
 0x716   : > { %v2683_v42 = vpop.permute.xlu0 %2682 }
 0x717   : > { %v2685_v43 = vunpack.i.h.bf16 %v2683_v42  ;;  %v2684_v44 = vunpack.i.l.bf16 %v2683_v42  ;;  %2472 = vmatpush3.bf16.msra.mxu0 %v2471_v41 }
 0x718   : > { %2389 = vmatprep.subr.mxu0 %v3095_v32 }
 0x719   : > { %v2704_v46 = vpop.eup %2703  ;;  %v2481_v47 = vpack.c.bf16 %v2685_v43, %v2684_v44 }
 0x71a   : > { %v1252_v45 = vmul.f32 %v2704_v46, %v2702_v27  ;;  %v1729_v51 = vpop.permute.xlu0 %1728 }
 0x71b   : > { %2483 = vmatpush3.bf16.xpose.msk.msra.mxu1 %vm3604_vm3, %v2481_v47 }
 0x71c   : > { %2387 = vmatmul.mubr.msk.f32.vlgmr.msra.gmra.mrb[2].mxu0 %vm1074_vm6, %v1252_v45 }
 0x71d   : > { %2391 = vmatprep.mubr.msk.f32.mxu0 %vm3094_vm1, %v3095_v32  ;;  %2390 = vmatpush3.msra.mxu0 %v1334_v35 }
 0x71e   : > { %2394 = vmatprep.subr.mxu0 %v3095_v32 }
 0x722   : > { %2423 = vmatmul.mubr.msk.f32.vlgmr.msra.gmra.mrb[8].mxu1 %vm994_vm2, %v1729_v51 }
 0x74b   : > { %v1565_v52 = vpop.xlane.xlu0 %1564 }
 0x74c   : > { %v1566_v53 = vsub.f32 %v1560_v31, %v1565_v52 }
 0x74e   : > { %v1567_v55 = vmul.f32 1.442695, %v1566_v53 }
 0x750   : > { %2705 = vpow2.f32 %v1567_v55 }
 0x75a   : > { %v2706_v56 = vpop.eup %2705 }
 0x75b   : > { %v1569_v57 = vsel %vm1074_vm6, %v2706_v56, 0.0 }
 0x75c   : > { %1570 = vadd.xlane.f32.xlu1 %v1569_v57 }
 0x76d   : > { %2687 = vrot.lane.b32.xlu1 %v3678_v30, %s3098_s28  ;;  %s2943_s28 = scalar_lea.vmem %s3743_s14, 128 }
 0x76e   : > { %p2944_p10 = scmp.ne.s32.totalorder %s3743_s14, %s2943_s28 }
 0x770   : > { %p2945_p7 = pnand %p2944_p10, %p3927_p5 }
 0x772   : > { %p2946_p4 = pneg %p2945_p7 }
 0x7e9   : > { %v1571_v58 = vpop.xlane.xlu1 %1570 }
 0x7ea   : > { %2707 = vrcp.f32 %v1571_v58 }
 0x7ed   : > { %v2688_v59 = vpop.permute.xlu1 %2687 }
 0x7ee   : > { %v2690_v63 = vunpack.i.h.bf16 %v2688_v59  ;;  %v2689_v0 = vunpack.i.l.bf16 %v2688_v59 }
 0x7ef   : > { %v1330_v61 = vpop.f32.mrb[2].mxu0 }
 0x7f0   : > { %v2388_v62 = vpop.f32.mrb[3].mxu0  ;;  %2392 = vmatmul.mubr.msk.f32.vlgmr.msra.gmra.mrb[4].mxu0 %vm994_vm2, %v1330_v61  ;;  %v2478_v1 = vpack.c.bf16 %v2690_v63, %v2689_v0 }
 0x7f1   : > { %2395 = vmatpush3.msra.mxu0 %v1159_v60  ;;  %2396 = vmatprep.mubr.msk.f32.mxu0 %vm3094_vm1, %v3095_v32 }
 0x7f2   : > { %2477 = vmatprep.subr.bf16.mxu0 %v3093_v29 }
 0x7f4   : > { %v2708_v5 = vpop.eup %2707 }
 0x7f5   : > { %v1806_v2 = vpop.f32.mrb[8].mxu1  ;;  %v1573_v7 = vmul.f32 %v2708_v5, %v2706_v56 }
 0x7f6   : > { %v1807_v3 = vadd.f32 %v1806_v2, %v3646_v54  ;;  %v2424_v4 = vpop.f32.mrb[9].mxu1  ;;  %v1653_v54 = vld [vmem:[#allocation16 + $0x10] sm:$0xff] }
 0x7f8   : > { %2397 = vmatmul.mubr.msk.f32.vlgmr.msra.gmra.mrb[4].mxu0 %vm994_vm2, %v3673_v16  ;;  %v1810_v6 = vsel %vm1074_vm6, %v1807_v3, -inf }
 0x7f9   : > { %1811 = vmax.xlane.f32.xlu1 %v1810_v6  ;;  %2479 = vmatpush3.bf16.msra.mxu0 %v2478_v1 }
 0x7fa   : > { %2410 = vmatprep.mubr.msk.f32.mxu0 %vm3094_vm1, %v3095_v32  ;;  %2413 = vmatprep.subr.mxu0 %v3095_v32 }
 0x7fc   : > { %2411 = vmatmul.mubr.msk.f32.vlgmr.msra.gmra.mrb[6].mxu0 %vm1074_vm6, %v1573_v7 }
 0x7fd   : > { %2415 = vmatprep.mubr.msk.f32.mxu0 %vm3094_vm1, %v3095_v32  ;;  %2414 = vmatpush3.msra.mxu0 %v1653_v54 }
 0x7fe   : > { %2484 = vmatprep.subr.bf16.mxu0 %v3093_v29 }
 0x886   : > { %v1812_v8 = vpop.xlane.xlu1 %1811 }
 0x887   : > { %v1813_v9 = vsub.f32 %v1807_v3, %v1812_v8 }
 0x889   : > { %v1814_v10 = vmul.f32 1.442695, %v1813_v9 }
 0x88b   : > { %2709 = vpow2.f32 %v1814_v10 }
 0x895   : > { %v2710_v11 = vpop.eup %2709 }
 0x896   : > { %v1816_v12 = vsel %vm1074_vm6, %v2710_v11, 0.0 }
 0x897   : > { %1817 = vadd.xlane.f32.xlu0 %v1816_v12 }
 0x8ad   : > { %2692 = vrot.lane.b32.xlu0 %v3678_v30, %s3099_s7  ;;  %s3100_s7 = smov [#allocation18]  }
 0x8ae   : > { %s2947_s27 = sshll.u32 %s3100_s7, 4  ;;  %s2948_s27 = int_to_ptr.vmem [resolvable:$false] %s2947_s27 }
 0x8af   : > { %s2949_s13 = scalar_lea.vmem %s2948_s27, 256  ;;  %p2950_p3 = scmp.lt.s32.totalorder %s3743_s14, %s2948_s27 }
 0x8b0   : > { %p2951_p6 = scmp.lt.s32.totalorder %s2949_s13, %s2943_s28 }
 0x8b2   : > { %p2952_p0 = por %p2951_p6, %p2950_p3 }
 0x8b4   : > { %p2953_p8 = pnand %p2952_p0, %p2946_p4 }
 0x8cc   : > { %978 = vadd.xlane.f32.xlu0 %v977_v14 }
 0x8cf   : > { %v1649_v15 = vpop.f32.mrb[6].mxu0 }
 0x8d0   : > { %v2412_v16 = vpop.f32.mrb[7].mxu0  ;;  %2416 = vmatmul.mubr.msk.f32.vlgmr.msra.gmra.mrb[4].mxu0 %vm994_vm2, %v1649_v15 }
 0x8d1   : > { %2429 = vmatprep.mubr.msk.f32.mxu0 %vm3094_vm1, %v3095_v32 }
 0x924   : > { %v1818_v29 = vpop.xlane.xlu0 %1817 }
 0x925   : > { %2711 = vrcp.f32 %v1818_v29 }
 0x928   : > { %v2693_v17 = vpop.permute.xlu0 %2692 }
 0x929   : > { %v2695_v18 = vunpack.i.h.bf16 %v2693_v17  ;;  %v2694_v19 = vunpack.i.l.bf16 %v2693_v17 }
 0x92b   : > { %v2485_v20 = vpack.c.bf16 %v2695_v18, %v2694_v19 }
 0x92d   : > { %2486 = vmatpush3.bf16.msra.mxu0 %v2485_v20 }
 0x92e   : > { %2432 = vmatprep.subr.mxu0 %v3095_v32 }
 0x92f   : > { %v2712_v50 = vpop.eup %2711 }
 0x930   : > { %v1820_v21 = vmul.f32 %v2712_v50, %v2710_v11 }
 0x932   : > { %2430 = vmatmul.mubr.msk.f32.vlgmr.msra.gmra.mrb[8].mxu0 %vm1074_vm6, %v1820_v21 }
 0x933   : > { %2433 = vmatpush3.msra.mxu0 %v1900_v22  ;;  %2434 = vmatprep.mubr.msk.f32.mxu0 %vm3094_vm1, %v3095_v32 }
 0x959   : > { %v979_v23 = vpop.xlane.xlu0 %978 }
 0x95a   : > { %vm980_vm8 = vcmp.gt.f32.partialorder %v979_v23, 0.0 }
 0x95b   : > { %v982_v24 = vsel %vm980_vm8, 1, %v3096_v40 }
 0x95c   : > { %v986_v25 = vrot.slane %v982_v24, %v969_v49 }
 0x95e   : > { %vm987_vm10 = vcmp.eq.s32.totalorder %v986_v25, 1 }
 0x95f   : > { %vm988_vm11 = vmand %vm981_vm9, %vm987_vm10 }
 0x960   : > { %v989_v26 = vsel %vm988_vm11, 1.0, %v3095_v32 }
 0x961   : > { %1977 = vperm.xlu1 %2696, %v989_v26  }
 0x9e0   : > { %v1978_v40 = vpop.permute.xlu1 %1977 }
 0xa05   : > { %v1896_v27 = vpop.f32.mrb[8].mxu0 }
 0xa06   : > { %v2431_v28 = vpop.f32.mrb[9].mxu0  ;;  %2435 = vmatmul.mubr.msk.f32.vlgmr.msra.gmra.mrb[4].mxu0 %vm994_vm2, %v1896_v27 }
 0xad9   : > { %v1970_v30 = vpop.f32.mrb[4].mxu0 }
 0xada   : > { %v1980_v32 = vmul.f32 %v1978_v40, %v1970_v30  ;;  %v2436_v48 = vpop.f32.mrb[5].mxu0 }
 0xadc   : > { %v1988_v49 = vadd.f32 %v2271_v39, %v1980_v32 }
 0xade   : > { %1989 = vst.msk [vmem:[%s658_s5] sm:$0xff] %vm884_vm4, %v1988_v49 }
 0xadf   : > { %2956 = shalt.err (!%p2953_p8)
}
 0xae0   : > { %s2957_s2 = scalar_lea.hbm %s3741_s15, 128  ;;  %s2961_s23 = scalar_lea.hbm %s3926_s3, 512 }
 0xae1   : > { %p2958_p12 = scmp.ne.s32.totalorder %s3741_s15, %s2957_s2  ;;  %p2962_p11 = scmp.lt.u32.totalorder %s3741_s15, %s3926_s3 }
 0xae2   : > { %p2963_p9 = scmp.lt.u32.totalorder %s2961_s23, %s2957_s2  ;;  %p2965_p10 = scmp.lt.u32.totalorder %s2957_s2, %s3741_s15 }
 0xae3   : > { %p2959_p1 = pnand %p2958_p12, %p3927_p5 }
 0xae4   : > { %p2964_p2 = por %p2963_p9, %p2962_p11 }
 0xae5   : > { %p2960_p13 = pneg %p2959_p1 }
 0xae6   : > { %p2966_p7 = por %p2965_p10, %p2964_p2 }
 0xae8   : > { %p2967_p4 = pnand %p2966_p7, %p2960_p13 }
 0xaea   : > { %2970 = shalt.err (!%p2967_p4)
}
 0xaeb   : > { %2519 = dma.vmem_to_hbm [thread:$0]  (%p3927_p5), %s3743_s14, 128, %s3741_s15, %s1991_s20  }
 0xaec PF: > { %s3928_s26 = sld [smem:[#allocation25_spill]]  ;;  %s3929_s24 = sld [smem:[#allocation33_spill]] }
 0xaed   : > { %p2562_p3 = scmp.ge.s32.totalorder %s3081_s18, 2 }
 0xaf2   : > { %s2018_s30 = sand.u32 1, %s3928_s26   ;;  %p3930_p6 = scmp.ne.s32.totalorder %s3929_s24, 0 }
 0xaf3   : > { %s2019_s16 = scalar_lea.sflag [#allocation6], %s2018_s30 }
 0xaf4   : > { %p2548_p0 = pnand %p2562_p3, %p3930_p6 }
 0xaf6   : > { %3036 = dma.done.wait (!%p2548_p0), %s2019_s16, 128  }
 0xaf7   : > { %3038 = vsyncadd (!%p2548_p0), %s2019_s16, 4294967168  ;;  %s35_s18 = sadd.s32 1, %s3081_s18   ;;  %s3931_s25 = sld [smem:[#allocation26_spill]] }
 0xaf8   : > { %p32_p8 = scmp.ge.s32.totalorder %s35_s18, 6   ;;  %s3932_s26 = sld [smem:[#allocation27_spill]] }
 0xaf9   : > { %s3933_s27 = sld [smem:[#allocation38_spill]]  ;;  %s3934_s12 = sld [smem:[#allocation28_spill]] }
 0xafa   : > { %s3935_s30 = sld [smem:[#allocation37_spill]]  ;;  %s3936_s14 = sld [smem:[#allocation31_spill]] }
 0xafb   : > { %s3937_s16 = sld [smem:[#allocation35_spill]]  ;;  %s3938_s19 = sld [smem:[#allocation36_spill]] }
 0xafc   : > { %s3939_s28 = smov %s3057_s29  ;;  %s3941_s15 = smov %s3077_s17 }
 0xafd   :  { %34 = sbr.rel (!%p32_p8) target bundleno = 24 (0x18), region = 171 }
 0xaff   : > { %s3940_s29 = smov %s3934_s12 }
 0xb01   : > { %s3942_s17 = smov %s3938_s19 }
 0xb04   :  { %2024 = vsyncpa [#allocation5], 1 }
 0xb05   :  { %2026 = vsyncpa [#allocation5 + $0x1], 1 }
 0xb06   :  { %2027 = vsyncpa [#allocation8], 1 }
 0xb07   :  { %2029 = vsyncpa [#allocation8 + $0x1], 1 }
 0xb08   :  { %2030 = vsyncpa [#allocation11], 1 }
 0xb09   :  { %2031 = vsyncpa [#allocation14], 1 }
 0xb0a   :  { %2032 = vsyncpa [#allocation17], 1 }
 0xb0b   :  { %2033 = vsyncpa [#allocation6], 1 }
 0xb0c   :  { %2035 = vsyncpa [#allocation6 + $0x1], 1 }

// kernel: tpu_custom_call.1
= control target key start
LH: loop header
LB: loop body
LE: loop exit
PB: predicated region body
PF: predicated region fallthrough
CT: control target
= control target key end

     0   :  { %s3808_s0 = inlined_call_operand.vmem [shape: f32[2,16,32], index: 0, kind: input, shape index: {}]   ;;  %s3809_s1 = inlined_call_operand.hbm [shape: f32[2,16,32], index: 1, kind: input, shape index: {}]   ;;  %s3810_s2 = inlined_call_operand.hbm [shape: f32[2,16,32], index: 2, kind: input, shape index: {}]   ;;  %s3811_s3 = inlined_call_operand.vmem [shape: f32[2,16,1], index: 3, kind: input, shape index: {}]   ;;  %s3812_s4 = inlined_call_operand.hbm [shape: f32[2,1,16], index: 4, kind: input, shape index: {}]   ;;  %s3813_s5 = inlined_call_operand.hbm [shape: f32[32,32], index: 5, kind: input, shape index: {}]   ;;  %s3814_s6 = inlined_call_operand.hbm [shape: f32[1,32], index: 6, kind: input, shape index: {}]   ;;  %s3815_s7 = inlined_call_operand.hbm [shape: f32[32,32], index: 7, kind: input, shape index: {}]   ;;  %s3816_s8 = inlined_call_operand.hbm [shape: f32[1,32], index: 8, kind: input, shape index: {}]   ;;  %s3817_s9 = inlined_call_operand.vmem [shape: f32[32,32], index: 9, kind: input, shape index: {}]   ;;  %s3818_s10 = inlined_call_operand.vmem [shape: f32[1,32], index: 10, kind: input, shape index: {}]   ;;  %s3819_s11 = inlined_call_operand.hbm [shape: f32[32,32], index: 11, kind: input, shape index: {}]   ;;  %s3820_s12 = inlined_call_operand.vmem [shape: f32[1,32], index: 12, kind: input, shape index: {}]   ;;  %s3821_s13 = inlined_call_operand.hbm [shape: f32[2,16,32], index: 13, kind: output, shape index: {}]  }
   0x1   :  { %3856 = sst [smem:[#allocation39_spill]] %s3808_s0 }
   0x2   :  { %3857 = sst [smem:[#allocation40_spill]] %s3810_s2 }
   0x3   :  { %3858 = sst [smem:[#allocation41_spill]] %s3811_s3 }
   0x4   :  { %3859 = sst [smem:[#allocation42_spill]] %s3813_s5 }
   0x5   :  { %3860 = sst [smem:[#allocation43_spill]] %s3815_s7 }
   0x6   :  { %3861 = sst [smem:[#allocation44_spill]] %s3817_s9 }
   0x7   :  { %3862 = sst [smem:[#allocation45_spill]] %s3818_s10 }
   0x8   :  { %3863 = sst [smem:[#allocation46_spill]] %s3820_s12 }
   0x9   :  { %3864 = sst [smem:[#allocation47_spill]] %s3821_s13 }
   0xa   :  { %18 = vsyncpa [#allocation5], 0 }
   0xb   :  { %20 = vsyncpa [#allocation5 + $0x1], 0 }
   0xc   :  { %21 = vsyncpa [#allocation8], 0 }
   0xd   :  { %23 = vsyncpa [#allocation8 + $0x1], 0 }
   0xe   :  { %24 = vsyncpa [#allocation11], 0 }
   0xf   :  { %25 = vsyncpa [#allocation14], 0 }
  0x10   :  { %26 = vsyncpa [#allocation17], 0 }
  0x11   :  { %27 = vsyncpa [#allocation6], 0 }
  0x12   :  { %29 = vsyncpa [#allocation6 + $0x1], 0  ;;  %s3171_s25 = smov 0   ;;  %s3173_s26 = smov 0  }
  0x13   :  { %s3175_s27 = smov 0   ;;  %s3177_s28 = smov 0  }
  0x14   :  { %s3179_s29 = smov 0   ;;  %s3181_s30 = smov 0  }
  0x15   :  { %s3183_s14 = smov 0   ;;  %s3185_s15 = smov 0  }
  0x16   :  { %s3187_s16 = smov 0   ;;  %s3189_s17 = smov 0  }
  0x17   :  { %s3191_s18 = smov 0  }
  0x18 LB: > { %3865 = sst [smem:[#allocation25_spill]] %s3041_s25  ;;  %s3227_s19 = sadd.s32 4294967295, %s3081_s18   ;;  %s3081_s18 = sphi %s3191_s18, %s35_s18   ;;  %s3077_s17 = sphi %s3189_s17, %s3942_s17   ;;  %s3073_s16 = sphi %s3187_s16, %s3937_s16   ;;  %s3069_s15 = sphi %s3185_s15, %s3941_s15   ;;  %s3065_s14 = sphi %s3183_s14, %s3936_s14   ;;  %s3061_s30 = sphi %s3181_s30, %s3935_s30   ;;  %s3057_s29 = sphi %s3179_s29, %s3940_s29   ;;  %s3053_s28 = sphi %s3177_s28, %s3939_s28   ;;  %s3049_s27 = sphi %s3175_s27, %s3933_s27   ;;  %s3045_s26 = sphi %s3173_s26, %s3932_s26   ;;  %s3041_s25 = sphi %s3171_s25, %s3931_s25  }
  0x19   : > { %3866 = sst [smem:[#allocation26_spill]] %s3045_s26  ;;  %s2214_s20 = sadd.s32 4294967294, %s3081_s18  }
  0x1a   : > { %3867 = sst [smem:[#allocation27_spill]] %s3049_s27  ;;  %p3828_p0 = scmp.eq.s32.totalorder %s3227_s19, 0 }
  0x1b   : > { %3868 = sst [smem:[#allocation28_spill]] %s3061_s30  ;;  %p368_p1 = scmp.ne.s32.totalorder %s3049_s27, %s3045_s26 }
  0x1c   : > { %3869 = sst [smem:[#allocation29_spill]] %s3065_s14  ;;  %p369_p2 = scmp.eq.s32.totalorder %s3227_s19, 3 }
  0x1d   : > { %3870 = sst [smem:[#allocation30_spill]] %s3069_s15  ;;  %p374_p3 = scmp.ne.s32.totalorder %s3045_s26, %s3041_s25 }
  0x1e   : > { %3871 = sst [smem:[#allocation31_spill]] %s3073_s16  ;;  %p375_p4 = scmp.eq.s32.totalorder %s2214_s20, 3 }
  0x1f   : > { %p2215_p5 = scmp.ge.s32.totalorder %s3081_s18, 1  ;;  %p3237_p6 = por %p369_p2, %p368_p1 }
  0x20   : > { %p382_p7 = scmp.lt.s32.totalorder %s3081_s18, 5  ;;  %p3242_p8 = por %p375_p4, %p374_p3 }
  0x21   : > { %s3872_s21 = scalar_select %p3237_p6, 1, 0 }
  0x22   : > { %s3874_s22 = scalar_select %p3242_p8, 1, 0 }
  0x23   : > { %3873 = sst [smem:[#allocation32_spill]] %s3872_s21  ;;  %p3246_p9 = pnand %p2215_p5, %p382_p7 }
  0x24   : > { %3875 = sst [smem:[#allocation33_spill]] %s3874_s22  ;;  %s3083_s24 = smov [#allocation10]  }
  0x25   : > { %s3876_s23 = scalar_select %p3246_p9, 1, 0 }
  0x26   : > { %s394_s13 = sshll.u32 %s3083_s24, 4  ;;  %p2521_p10 = pneg %p3246_p9  ;;  %s395_s13 = int_to_ptr.vmem [resolvable:$true] %s394_s13 }
  0x27   : > { %3877 = sst [smem:[#allocation34_spill]] %s3876_s23  ;;  %s3084_s25 = smov [#allocation13]  }
  0x28   : > { %p3254_p11 = pnand %p2521_p10, %p3828_p0  ;;  %s418_s12 = sshll.u32 %s3084_s25, 4  ;;  %s3258_s12 = int_to_ptr.vmem [resolvable:$true] %s418_s12 }
  0x29   : > { %s3879_s5 = sld [smem:[#allocation42_spill]] }
  0x2a   : > { %s3878_s20 = scalar_select %p3254_p11, 1, 0 }
  0x2b   : > { %p3268_p13 = pneg %p3254_p11 }
  0x2d   : > { %s3880_s24 = scalar_select %p3268_p13, 1, 0 }
  0x2f   : > { %s2713_s10 = scalar_lea.hbm %s3879_s5, 512 }
  0x30   : > { %p2714_p12 = scmp.ne.s32.totalorder %s3879_s5, %s2713_s10  ;;  %p2720_p3 = scmp.lt.u32.totalorder %s2713_s10, %s3879_s5 }
  0x32   : > { %p2716_p1 = pnand %p3268_p13, %p2714_p12 }
  0x34   : > { %p2717_p2 = pneg %p2716_p1 }
  0x36   : > { %p2722_p4 = pnand %p2720_p3, %p2717_p2 }
  0x38   : > { %2725 = shalt.err (!%p2722_p4)
}
  0x39   : > { %s2726_s21 = scalar_lea.vmem %s395_s13, 512  ;;  %p2734_p0 = scmp.lt.s32.totalorder %s395_s13, %s395_s13 }
  0x3a   : > { %p2727_p5 = scmp.ne.s32.totalorder %s395_s13, %s2726_s21  ;;  %p2735_p8 = scmp.lt.s32.totalorder %s2726_s21, %s2726_s21 }
  0x3c   : > { %p2729_p7 = pnand %p2727_p5, %p3268_p13  ;;  %p2736_p6 = por %p2735_p8, %p2734_p0 }
  0x3e   : > { %p2730_p10 = pneg %p2729_p7 }
  0x40   : > { %p2737_p9 = pnand %p2736_p6, %p2730_p10 }
  0x42   : > { %2740 = shalt.err (!%p2737_p9)
}
  0x43   : > { %s3836_s3 = smov 128   ;;  %s3838_s9 = smov 8  }
  0x44   : > { %2524 = dma.hbm_to_vmem [thread:$0]  (!%p3254_p11), %s3879_s5, 512, %s395_s13, [#allocation11], %s3836_s3, %s3836_s3, %s3838_s9  }
  0x45   : > { %s3881_s7 = sld [smem:[#allocation43_spill]] }
  0x4b   : > { %s2741_s14 = scalar_lea.hbm %s3881_s7, 512 }
  0x4c   : > { %p2742_p0 = scmp.ne.s32.totalorder %s3881_s7, %s2741_s14  ;;  %p2748_p9 = scmp.lt.u32.totalorder %s2741_s14, %s3881_s7 }
  0x4e   : > { %p2744_p6 = pnand %p2742_p0, %p3268_p13 }
  0x50   : > { %p2745_p8 = pneg %p2744_p6 }
  0x52   : > { %p2750_p12 = pnand %p2748_p9, %p2745_p8 }
  0x54   : > { %2753 = shalt.err (!%p2750_p12)
}
  0x55   : > { %s2754_s13 = scalar_lea.vmem %s3258_s12, 512  ;;  %p2762_p4 = scmp.lt.s32.totalorder %s3258_s12, %s3258_s12 }
  0x56   : > { %p2755_p1 = scmp.ne.s32.totalorder %s3258_s12, %s2754_s13  ;;  %p2763_p5 = scmp.lt.s32.totalorder %s2754_s13, %s2754_s13 }
  0x58   : > { %p2757_p2 = pnand %p2755_p1, %p3268_p13  ;;  %p2764_p7 = por %p2763_p5, %p2762_p4 }
  0x5a   : > { %p2758_p3 = pneg %p2757_p2 }
  0x5c   : > { %p2765_p10 = pnand %p2764_p7, %p2758_p3 }
  0x5e   : > { %2768 = shalt.err (!%p2765_p10)
}
  0x5f   : > { %2530 = dma.hbm_to_vmem [thread:$0]  (!%p3254_p11), %s3881_s7, 512, %s3258_s12, [#allocation14], %s3836_s3, %s3836_s3, %s3838_s9  }
  0x60   : > { %s44_s15 = sadd.s32 1, %s3073_s16  ;;  %s47_s23 = sadd.s32 1, %s3077_s17 }
  0x61   : > { %p45_p0 = scmp.ge.s32.totalorder %s44_s15, 2  ;;  %s82_s0 = sadd.s32 1, %s3061_s30 }
  0x62   : > { %p89_p6 = scmp.ne.s32.totalorder %s3061_s30, %s3057_s29  ;;  %p90_p8 = scmp.eq.s32.totalorder %s3081_s18, 0 }
  0x63   : > { %s3944_s15 = smov (%p45_p0, %s44_s15), 0  ;;  %s3946_s23 = smov (!%p45_p0, %s47_s23), %s3077_s17 }
  0x64   : > { %3882 = sst [smem:[#allocation35_spill]] %s3944_s15  ;;  %p95_p9 = scmp.ne.s32.totalorder %s3057_s29, %s3053_s28 }
  0x65   : > { %p49_p12 = scmp.ge.s32.totalorder %s3946_s23, 2  ;;  %s354_s10 = ssub.s32 %s3073_s16, %s3944_s15 }
  0x66   : > { %p3326_p1 = por %p90_p8, %p89_p6  ;;  %p3884_p2 = scmp.eq.s32.totalorder %s3227_s19, 0 }
  0x67   : > { %s3948_s23 = smov (%p49_p12, %s3946_s23), 0  ;;  %s358_s25 = sadd.s32 1, %s3049_s27 }
  0x68   : > { %p3332_p3 = por %p3884_p2, %p95_p9  ;;  %3886 = sst [smem:[#allocation36_spill]] %s3948_s23 }
  0x69   : > { %p2556_p4 = scmp.lt.s32.totalorder %s3081_s18, 4  ;;  %s79_s28 = ssub.s32 %s3077_s17, %s3948_s23 }
  0x6a   : > { %s3885_s22 = scalar_select %p3332_p3, 1, 0 }
  0x6b   : > { %s3343_s21 = sand.u32 1, %s3061_s30   ;;  %p80_p5 = scmp.eq.s32.totalorder %s79_s28, 0 }
  0x6c   : > { %s355_s13 = sor.u32 %s354_s10, %s79_s28  ;;  %s3843_s26 = sshll.u32 %s3343_s21, 4 }
  0x6d   : > { %p356_p7 = scmp.eq.s32.totalorder %s355_s13, 0  ;;  %s3849_s9 = sshll.u32 %s3077_s17, 8 }
  0x6e   : > { %s3347_s14 = scalar_select %p80_p5, %s3061_s30, %s82_s0  }
  0x6f   : > { %s3350_s3 = scalar_select %p356_p7, %s3049_s27, %s358_s25  }
  0x70   : > { %3887 = sst [smem:[#allocation37_spill]] %s3347_s14  ;;  %p3355_p10 = pnand %p2556_p4, %p3326_p1 }
  0x71   : > { %3888 = sst [smem:[#allocation38_spill]] %s3350_s3  ;;  %s497_s7 = sand.u32 1, %s3081_s18  }
  0x72   : > { %s3889_s5 = scalar_select %p3355_p10, 1, 0 }
  0x73   : > { %s3890_s2 = sld [smem:[#allocation40_spill]]  ;;  %s501_s0 = scalar_lea.vmem [#allocation7], %s3843_s26 }
  0x74   : > { %s508_s10 = sshll.u32 %s501_s0, 4  ;;  %s3371_s12 = scalar_lea.sflag [#allocation8], %s497_s7  ;;  %s3369_s10 = int_to_ptr.vmem [resolvable:$true] %s508_s10 }
  0x75   : > { %p3377_p6 = pneg %p3355_p10 }
  0x77   : > { %s3891_s28 = scalar_select %p3377_p6, 1, 0 }
  0x79   : > { %s3365_s16 = scalar_lea.hbm %s3890_s2, %s3849_s9  ;;  %s2774_s13 = scalar_lea.hbm %s3890_s2, 512 }
  0x7a   : > { %s2769_s25 = scalar_lea.hbm %s3365_s16, 256  ;;  %p2775_p12 = scmp.lt.u32.totalorder %s3365_s16, %s3890_s2 }
  0x7b   : > { %p2770_p0 = scmp.ne.s32.totalorder %s3365_s16, %s2769_s25  ;;  %p2776_p1 = scmp.lt.u32.totalorder %s2774_s13, %s2769_s25 }
  0x7c   : > { %p2778_p4 = scmp.lt.u32.totalorder %s2769_s25, %s3365_s16 }
  0x7d   : > { %p2772_p8 = pnand %p3377_p6, %p2770_p0  ;;  %p2777_p2 = por %p2776_p1, %p2775_p12 }
  0x7f   : > { %p2773_p9 = pneg %p2772_p8  ;;  %p2779_p5 = por %p2778_p4, %p2777_p2 }
  0x81   : > { %p2780_p7 = pnand %p2779_p5, %p2773_p9 }
  0x83   : > { %2783 = shalt.err (!%p2780_p7)
}
  0x84   : > { %s2784_s7 = scalar_lea.vmem %s3369_s10, 256  ;;  %s3087_s15 = smov [#allocation7]  }
  0x85   : > { %p2785_p0 = scmp.ne.s32.totalorder %s3369_s10, %s2784_s7  ;;  %s2789_s23 = sshll.u32 %s3087_s15, 4  ;;  %s2790_s23 = int_to_ptr.vmem [resolvable:$false] %s2789_s23 }
  0x86   : > { %s2791_s26 = scalar_lea.vmem %s2790_s23, 512  ;;  %p2792_p11 = scmp.lt.s32.totalorder %s3369_s10, %s2790_s23 }
  0x87   : > { %p2787_p8 = pnand %p2785_p0, %p3377_p6  ;;  %p2793_p13 = scmp.lt.s32.totalorder %s2791_s26, %s2784_s7 }
  0x89   : > { %p2788_p3 = pneg %p2787_p8  ;;  %p2794_p12 = por %p2793_p13, %p2792_p11 }
  0x8b   : > { %p2795_p1 = pnand %p2794_p12, %p2788_p3 }
  0x8d   : > { %2798 = shalt.err (!%p2795_p1)
}
  0x8e   : > { %s3892_s25 = smov 8   ;;  %s3893_s13 = smov 128  }
  0x8f   : > { %2543 = dma.hbm_to_vmem [thread:$0]  (!%p3355_p10), %s3365_s16, 256, %s3369_s10, %s3371_s12, %s3893_s13, %s3893_s13, %s3892_s25  }
  0x90   : > { %s3088_s0 = smov [#allocation12]   ;;  %s3089_s15 = smov [#allocation15]  }
  0x91   : > { %s408_s9 = sshll.u32 %s3088_s0, 4  ;;  %s432_s2 = sshll.u32 %s3089_s15, 4  ;;  %s409_s9 = int_to_ptr.vmem [resolvable:$true] %s408_s9  ;;  %s433_s2 = int_to_ptr.vmem [resolvable:$true] %s432_s2 }
  0x92   : > { %s2799_s26 = scalar_lea.hbm %s3814_s6, 16  ;;  %p3894_p13 = scmp.ne.s32.totalorder %s3880_s24, 0 }
  0x93   : > { %p2800_p11 = scmp.ne.s32.totalorder %s3814_s6, %s2799_s26  ;;  %p2806_p2 = scmp.lt.u32.totalorder %s2799_s26, %s3814_s6 }
  0x95   : > { %p2802_p3 = pnand %p2800_p11, %p3894_p13 }
  0x97   : > { %p2803_p9 = pneg %p2802_p3 }
  0x99   : > { %p2808_p4 = pnand %p2806_p2, %p2803_p9 }
  0x9b   : > { %2811 = shalt.err (!%p2808_p4)
}
  0x9c   : > { %s2812_s16 = scalar_lea.vmem %s409_s9, 16  ;;  %s2819_s10 = scalar_lea.vmem %s409_s9, 32 }
  0x9d   : > { %p2813_p5 = scmp.ne.s32.totalorder %s409_s9, %s2812_s16  ;;  %p2820_p8 = scmp.lt.s32.totalorder %s409_s9, %s409_s9 }
  0x9e   : > { %p2821_p12 = scmp.lt.s32.totalorder %s2819_s10, %s2812_s16 }
  0x9f   : > { %p2815_p7 = pnand %p2813_p5, %p3894_p13 }
  0xa0   : > { %p2822_p1 = por %p2821_p12, %p2820_p8 }
  0xa1   : > { %p2816_p0 = pneg %p2815_p7 }
  0xa3   : > { %p2823_p10 = pnand %p2822_p1, %p2816_p0 }
  0xa5   : > { %2826 = shalt.err (!%p2823_p10)
}
  0xa6   : > { %p3895_p11 = scmp.ne.s32.totalorder %s3878_s20, 0  ;;  %s2827_s0 = scalar_lea.hbm %s3816_s8, 16 }
  0xa7   : > { %p2828_p3 = scmp.ne.s32.totalorder %s3816_s8, %s2827_s0  ;;  %p2834_p10 = scmp.lt.u32.totalorder %s2827_s0, %s3816_s8 }
  0xa8   : > { %2527 = dma.hbm_to_vmem [thread:$0]  (!%p3895_p11), %s3814_s6, 16, %s409_s9, [#allocation11]  }
  0xa9   : > { %p2830_p9 = pnand %p2828_p3, %p3894_p13 }
  0xab   : > { %p2831_p2 = pneg %p2830_p9 }
  0xad   : > { %p2836_p4 = pnand %p2834_p10, %p2831_p2 }
  0xaf   : > { %2839 = shalt.err (!%p2836_p4)
}
  0xb0   : > { %s2840_s16 = scalar_lea.vmem %s433_s2, 16  ;;  %s2847_s9 = scalar_lea.vmem %s433_s2, 32 }
  0xb1   : > { %p2841_p5 = scmp.ne.s32.totalorder %s433_s2, %s2840_s16  ;;  %p2848_p8 = scmp.lt.s32.totalorder %s433_s2, %s433_s2 }
  0xb2   : > { %p2849_p12 = scmp.lt.s32.totalorder %s2847_s9, %s2840_s16 }
  0xb3   : > { %p2843_p7 = pnand %p2841_p5, %p3894_p13 }
  0xb4   : > { %p2850_p1 = por %p2849_p12, %p2848_p8 }
  0xb5   : > { %p2844_p0 = pneg %p2843_p7 }
  0xb7   : > { %p2851_p6 = pnand %p2850_p1, %p2844_p0 }
  0xb9   : > { %2854 = shalt.err (!%p2851_p6)
}
  0xba   : > { %2533 = dma.hbm_to_vmem [thread:$0]  (!%p3895_p11), %s3816_s8, 16, %s433_s2, [#allocation14]  }
  0xbb   : > { %s3090_s14 = smov [#allocation16]   ;;  %s2855_s15 = scalar_lea.hbm %s3819_s11, 512 }
  0xbc   : > { %s448_s27 = sshll.u32 %s3090_s14, 4  ;;  %p2856_p3 = scmp.ne.s32.totalorder %s3819_s11, %s2855_s15  ;;  %s449_s27 = int_to_ptr.vmem [resolvable:$true] %s448_s27 }
  0xbd   : > { %p2862_p2 = scmp.lt.u32.totalorder %s2855_s15, %s3819_s11 }
  0xbe   : > { %p2858_p6 = pnand %p2856_p3, %p3894_p13 }
  0xc0   : > { %p2859_p9 = pneg %p2858_p6 }
  0xc2   : > { %p2864_p10 = pnand %p2862_p2, %p2859_p9 }
  0xc4   : > { %2867 = shalt.err (!%p2864_p10)
}
  0xc5   : > { %s2868_s2 = scalar_lea.vmem %s449_s27, 512  ;;  %p2876_p0 = scmp.lt.s32.totalorder %s449_s27, %s449_s27 }
  0xc6   : > { %p2869_p4 = scmp.ne.s32.totalorder %s449_s27, %s2868_s2  ;;  %p2877_p8 = scmp.lt.s32.totalorder %s2868_s2, %s2868_s2 }
  0xc8   : > { %p2871_p5 = pnand %p2869_p4, %p3894_p13  ;;  %p2878_p12 = por %p2877_p8, %p2876_p0 }
  0xca   : > { %p2872_p7 = pneg %p2871_p5 }
  0xcc   : > { %p2879_p1 = pnand %p2878_p12, %p2872_p7 }
  0xce   : > { %2882 = shalt.err (!%p2879_p1)
}
  0xcf   : > { %2536 = dma.hbm_to_vmem [thread:$0]  (!%p3895_p11), %s3819_s11, 512, %s449_s27, [#allocation17], %s3893_s13, %s3893_s13, %s3892_s25  }
  0xd0   : > { %s3896_s24 = sshll.u32 %s3077_s17, 8  ;;  %s3897_s0 = sshll.u32 %s3343_s21, 4 }
  0xd1   : > { %s3466_s3 = scalar_lea.hbm %s3809_s1, %s3896_s24  ;;  %s480_s20 = scalar_lea.vmem [#allocation4], %s3897_s0 }
  0xd2   : > { %s487_s15 = sshll.u32 %s480_s20, 4  ;;  %s477_s23 = scalar_lea.sflag [#allocation5], %s3343_s21  ;;  %s3470_s15 = int_to_ptr.vmem [resolvable:$true] %s487_s15 }
  0xd3   : > { %s2883_s7 = scalar_lea.hbm %s3466_s3, 256  ;;  %p3898_p3 = scmp.ne.s32.totalorder %s3891_s28, 0 }
  0xd4   : > { %p2884_p13 = scmp.ne.s32.totalorder %s3466_s3, %s2883_s7  ;;  %s2888_s16 = scalar_lea.hbm %s3809_s1, 512 }
  0xd5   : > { %p2889_p9 = scmp.lt.u32.totalorder %s3466_s3, %s3809_s1  ;;  %p2890_p2 = scmp.lt.u32.totalorder %s2888_s16, %s2883_s7 }
  0xd6   : > { %p2886_p11 = pnand %p2884_p13, %p3898_p3  ;;  %p2892_p4 = scmp.lt.u32.totalorder %s2883_s7, %s3466_s3 }
  0xd7   : > { %p2891_p10 = por %p2890_p2, %p2889_p9 }
  0xd8   : > { %p2887_p6 = pneg %p2886_p11 }
  0xd9   : > { %p2893_p5 = por %p2892_p4, %p2891_p10 }
  0xdb   : > { %p2894_p7 = pnand %p2893_p5, %p2887_p6 }
  0xdd   : > { %2897 = shalt.err (!%p2894_p7)
}
  0xde   : > { %s2898_s10 = scalar_lea.vmem %s3470_s15, 256  ;;  %s3091_s24 = smov [#allocation4]  }
  0xdf   : > { %p2899_p0 = scmp.ne.s32.totalorder %s3470_s15, %s2898_s10  ;;  %s2903_s30 = sshll.u32 %s3091_s24, 4  ;;  %s2904_s30 = int_to_ptr.vmem [resolvable:$false] %s2903_s30 }
  0xe0   : > { %s2905_s14 = scalar_lea.vmem %s2904_s30, 512  ;;  %p2906_p1 = scmp.lt.s32.totalorder %s3470_s15, %s2904_s30 }
  0xe1   : > { %p2901_p8 = pnand %p2899_p0, %p3898_p3  ;;  %p2907_p13 = scmp.lt.s32.totalorder %s2905_s14, %s2898_s10 }
  0xe3   : > { %p2902_p12 = pneg %p2901_p8  ;;  %p2908_p11 = por %p2907_p13, %p2906_p1 }
  0xe5   : > { %p2909_p9 = pnand %p2908_p11, %p2902_p12 }
  0xe7   : > { %2912 = shalt.err (!%p2909_p9)
}
  0xe8   : > { %p3899_p6 = scmp.ne.s32.totalorder %s3889_s5, 0  ;;  %s2228_s0 = sshll.u32 %s3077_s17, 4 }
  0xe9   : > { %s532_s20 = scalar_lea.vmem [#allocation9], %s3343_s21  ;;  %s537_s16 = scalar_lea.hbm %s3812_s4, %s2228_s0 }
  0xea   : > { %2540 = dma.hbm_to_vmem [thread:$0]  (!%p3899_p6), %s3466_s3, 256, %s3470_s15, %s477_s23, %s3893_s13, %s3893_s13, %s3892_s25  }
  0xeb   : > { %s539_s7 = sshll.u32 %s532_s20, 4  ;;  %s2913_s2 = scalar_lea.hbm %s537_s16, 16  ;;  %s540_s7 = int_to_ptr.vmem [resolvable:$true] %s539_s7 }
  0xec   : > { %p2914_p2 = scmp.ne.s32.totalorder %s537_s16, %s2913_s2  ;;  %s2918_s24 = scalar_lea.hbm %s3812_s4, 32 }
  0xed   : > { %p2919_p5 = scmp.lt.u32.totalorder %s537_s16, %s3812_s4  ;;  %p2920_p7 = scmp.lt.u32.totalorder %s2918_s24, %s2913_s2 }
  0xee   : > { %p2916_p10 = pnand %p2914_p2, %p3898_p3  ;;  %p2922_p8 = scmp.lt.u32.totalorder %s2913_s2, %s537_s16 }
  0xef   : > { %p2921_p0 = por %p2920_p7, %p2919_p5 }
  0xf0   : > { %p2917_p4 = pneg %p2916_p10 }
  0xf1   : > { %p2923_p12 = por %p2922_p8, %p2921_p0 }
  0xf3   : > { %p2924_p1 = pnand %p2923_p12, %p2917_p4 }
  0xf5   : > { %2927 = shalt.err (!%p2924_p1)
}
  0xf6   : > { %s2928_s21 = scalar_lea.vmem %s540_s7, 16  ;;  %s3092_s25 = smov [#allocation9]  }
  0xf7   : > { %p2929_p13 = scmp.ne.s32.totalorder %s540_s7, %s2928_s21  ;;  %s2933_s13 = sshll.u32 %s3092_s25, 4  ;;  %s2934_s13 = int_to_ptr.vmem [resolvable:$false] %s2933_s13 }
  0xf8   : > { %s2935_s3 = scalar_lea.vmem %s2934_s13, 32  ;;  %p2936_p2 = scmp.lt.s32.totalorder %s540_s7, %s2934_s13 }
  0xf9   : > { %p2931_p11 = pnand %p2929_p13, %p3898_p3  ;;  %p2937_p10 = scmp.lt.s32.totalorder %s2935_s3, %s2928_s21 }
  0xfb   : > { %p2932_p9 = pneg %p2931_p11  ;;  %p2938_p6 = por %p2937_p10, %p2936_p2 }
  0xfd   : > { %p2939_p5 = pnand %p2938_p6, %p2932_p9 }
  0xff   : > { %2942 = shalt.err (!%p2939_p5)
}
 0x100   : > { %p3900_p7 = scmp.ne.s32.totalorder %s3889_s5, 0  ;;  %s3901_s15 = sld [smem:[#allocation34_spill]] }
 0x102   : > { %2546 = dma.hbm_to_vmem [thread:$0]  (!%p3900_p7), %s537_s16, 16, %s540_s7, %s3371_s12  }
 0x106   : > { %p3902_p4 = scmp.ne.s32.totalorder %s3901_s15, 0 }
 0x107   : > { %s3520_s28 = sand.u32 (!%p3902_p4), 1, %s3057_s29   ;;  %p3903_p3 = scmp.ne.s32.totalorder (!%p3902_p4), %s3885_s22, 0 }
 0x108   : > { %548 = sbr.rel (%p3902_p4) target bundleno = 2796 (0xaec), region = 72  ;;  %s2230_s23 = sshll.u32 (!%p3902_p4), %s3520_s28, 4 }
 0x109   : > { %s551_s0 = scalar_lea.sflag (!%p3902_p4), [#allocation5], %s3520_s28  ;;  %s3524_s20 = scalar_lea.vmem (!%p3902_p4), [#allocation4], %s2230_s23 }
 0x10f   : > { %3016 = dma.done.wait (%p3903_p3), %s551_s0, 256  }
 0x110   : > { %3018 = vsyncadd (%p3903_p3), %s551_s0, 4294967040  ;;  %s559_s5 = sand.u32 1, %s3227_s19   ;;  %s3531_s7 = scalar_lea.vmem [#allocation7], %s2230_s23 }
 0x111   : > { %s560_s12 = scalar_lea.sflag [#allocation8], %s559_s5 }
 0x112   : > { %3020 = dma.done.wait (%p3903_p3), %s560_s12, 272  }
 0x113   : > { %3022 = vsyncadd (%p3903_p3), %s560_s12, 4294967024  ;;  %s571_s27 = scalar_lea.vmem [#allocation9], %s3520_s28  ;;  %p3904_p6 = scmp.eq.s32.totalorder %s3227_s19, 0 }
 0x115   : > { %3024 = dma.done.wait (%p3904_p6), [#allocation11], 528   ;;  %p3905_p0 = pmov %p3904_p6 }
 0x117   : > { %3026 = vsyncadd (%p3905_p0), [#allocation11], 4294966768  ;;  %p3906_p8 = pmov %p3905_p0 }
 0x118   : > { %p3907_p12 = pmov %p3905_p0 }
 0x119   : > { %3028 = dma.done.wait (%p3906_p8), [#allocation14], 528  }
 0x11a   : > { %3030 = vsyncadd (%p3907_p12), [#allocation14], 4294966768  ;;  %p3908_p1 = pmov %p3905_p0 }
 0x11b   : > { %p3909_p13 = pmov %p3905_p0 }
 0x11c   : > { %3032 = dma.done.wait (%p3908_p1), [#allocation17], 512  }
 0x11d   : > { %3034 = vsyncadd (%p3909_p13), [#allocation17], 4294966784  ;;  %s3910_s22 = sld [smem:[#allocation26_spill]]  ;;  %s3911_s26 = sld [smem:[#allocation30_spill]] }
 0x11e   : > { %s3912_s16 = sld [smem:[#allocation29_spill]]  ;;  %s3913_s25 = sld [smem:[#allocation39_spill]] }
 0x11f   : > { %s3914_s23 = sld [smem:[#allocation41_spill]] }
 0x123   : > { %s656_s2 = sand.u32 1, %s3910_s22   ;;  %p659_p11 = scmp.lt.s32.totalorder %s3911_s26, 1 }
 0x124   : > { %s3554_s9 = sshll.u32 %s656_s2, 3  ;;  %p661_p9 = scmp.lt.s32.totalorder %s3912_s16, 1 }
 0x125   : > { %s3950_s26 = smov (!%p659_p11, %s3911_s26), 1  ;;  %s658_s5 = scalar_lea.vmem [#allocation18], %s3554_s9 }
 0x126   : > { %s662_s10 = scalar_select %p661_p9, %s3912_s16, 1 }
 0x127   : > { %s2238_s24 = sshll.u32 %s3950_s26, 1  ;;  %p2242_p2 = scmp.ne.s32.totalorder %s3912_s16, 0 }
 0x128   : > { %s664_s30 = sadd.s32 %s2238_s24, %s662_s10  ;;  %v681_v0 = vld [vmem:[#allocation13] sm:$0xff] (!%p2242_p2)  ;;  %v682_v1 = vld [vmem:[#allocation13 + $0x8] sm:$0xff] (!%p2242_p2)  ;;  %s3915_s26 = sld [smem:[#allocation44_spill]] (!%p2242_p2)  ;;  %vm692_vm0 = vcmask (!%p2242_p2), 261120   ;;  %v683_v5 = vld [vmem:[#allocation13 + $0x10] sm:$0xff] (!%p2242_p2) }
 0x129   : > { %s2239_s14 = sshll.u32 %s664_s30, 3  ;;  %678 = sbr.rel (%p2242_p2) target bundleno = 530 (0x212), region = 108  ;;  %v2437_v3 = vpack.c.bf16 (!%p2242_p2), %v682_v1, %v681_v0  ;;  %v684_v6 = vld [vmem:[#allocation13 + $0x18] sm:$0xff] (!%p2242_p2)  ;;  %v2243_v16 = vld [vmem:[#allocation15] ss:$0 sm:$0xff] (!%p2242_p2) }
 0x12a   : > { %s3562_s13 = scalar_lea.vmem %s3913_s25, %s2239_s14  ;;  %s3567_s0 = scalar_lea.vmem %s3914_s23, %s2239_s14  ;;  %v2441_v8 = vpack.c.bf16 (!%p2242_p2), %v684_v6, %v683_v5  ;;  %v679_v11 = vld [vmem:[%s3524_s20] sm:$0xff] (!%p2242_p2)  ;;  %v680_v14 = vld [vmem:[%s3524_s20 + $0x8] sm:$0xff] (!%p2242_p2) }
 0x12b   : > { %2438 = vmatprep.subr.bf16.mxu0 (!%p2242_p2), %v2437_v3  ;;  %2336 = vmatprep.mubr.msk.f32.mxu0 (!%p2242_p2), %vm692_vm0, %v679_v11  ;;  %v776_v13 = vld [vmem:[%s3531_s7] sm:$0xff] (!%p2242_p2)  ;;  %v777_v15 = vld [vmem:[%s3531_s7 + $0x8] sm:$0xff] (!%p2242_p2)  ;;  %s3917_s15 = sld [smem:[#allocation45_spill]] (!%p2242_p2) }
 0x12c   : > { %2440 = vmatpush3.bf16.msra.mxu0 (!%p2242_p2), %v2437_v3  ;;  %2347 = vmatprep.mubr.msk.f32.mxu1 (!%p2242_p2), %vm692_vm0, %v776_v13 }
 0x12d   : > { %2442 = vmatprep.subr.bf16.mxu0 (!%p2242_p2), %v2441_v8 }
 0x12e   : > { %s3916_s10 = smov (!%p2242_p2), %s3915_s26  ;;  %v778_v2 = vld [vmem:[%s3915_s26] sm:$0xff] (!%p2242_p2) }
 0x12f   : > { %v779_v4 = vld [vmem:[%s3916_s10 + $0x8] sm:$0xff] (!%p2242_p2)  ;;  %v780_v9 = vld [vmem:[%s3916_s10 + $0x10] sm:$0xff] (!%p2242_p2)  ;;  %v781_v10 = vld [vmem:[%s3916_s10 + $0x18] sm:$0xff] (!%p2242_p2) }
 0x130   : > { %v2445_v7 = vpack.c.bf16 %v779_v4, %v778_v2  ;;  %v2449_v12 = vpack.c.bf16 %v781_v10, %v780_v9  ;;  %2444 = vmatpush3.bf16.msra.mxu0 %v2441_v8 }
 0x131   : > { %v2246_v17 = vld [vmem:[%s3917_s15] ss:$0 sm:$0xff] }
 0x132   : > { %2446 = vmatprep.subr.bf16.mxu1 %v2445_v7 }
 0x133   : > { %2448 = vmatpush3.bf16.msra.mxu1 %v2445_v7  ;;  %2337 = vmatmul.mubr.msk.f32.vlgmr.msra.gmra.mrb[0].mxu0 %vm692_vm0, %v680_v14 }
 0x134   : > { %2450 = vmatprep.subr.bf16.mxu1 %v2449_v12 }
 0x137   : > { %2452 = vmatpush3.bf16.msra.mxu1 %v2449_v12 }
 0x13a   : > { %2348 = vmatmul.mubr.msk.f32.vlgmr.msra.gmra.mrb[0].mxu1 %vm692_vm0, %v777_v15 }
 0x206   : > { %v2338_v18 = vpop.f32.mrb[0].mxu0 }
 0x207   : > { %v771_v19 = vadd.f32 %v2338_v18, %v2243_v16  ;;  %v765_v21 = vpop.f32.mrb[1].mxu0 }
 0x208   : > { %v766_v23 = vadd.f32 %v2243_v16, %v765_v21 }
 0x209   : > { %775 = vst.msk [vmem:[#allocation2 + $0x8] sm:$0xff] %vm692_vm0, %v771_v19 }
 0x20a   : > { %774 = vst.msk [vmem:[#allocation2] sm:$0xff] %vm692_vm0, %v766_v23 }
 0x20d   : > { %v2349_v20 = vpop.f32.mrb[0].mxu1 }
 0x20e   : > { %v867_v22 = vadd.f32 %v2349_v20, %v2246_v17  ;;  %v861_v24 = vpop.f32.mrb[1].mxu1 }
 0x20f   : > { %v862_v25 = vadd.f32 %v2246_v17, %v861_v24 }
 0x210   : > { %871 = vst.msk [vmem:[#allocation3 + $0x8] sm:$0xff] %vm692_vm0, %v867_v22 }
 0x211   : > { %870 = vst.msk [vmem:[#allocation3] sm:$0xff] %vm692_vm0, %v862_v25 }
 0x212 PF: > { %v873_v26 = vld [vmem:[#allocation10] sm:$0xff]  ;;  %v874_v27 = vld [vmem:[#allocation10 + $0x8] sm:$0xff]  ;;  %v875_v28 = vld [vmem:[#allocation10 + $0x10] sm:$0xff]  ;;  %v3093_v29 = vmov 0.0|0.0   ;;  %vm3094_vm1 = vmmov 0   ;;  %v3095_v32 = vmov 0.0   ;;  %v967_v47 = vlaneseq }
 0x213   : > { %2453 = vmatprep.subr.bf16.mxu0 %v3093_v29  ;;  %v2454_v30 = vpack.c.bf16 %v874_v27, %v873_v26  ;;  %v876_v31 = vld [vmem:[#allocation10 + $0x18] sm:$0xff]  ;;  %2358 = vmatprep.mubr.msk.f32.mxu0 %vm3094_vm1, %v3095_v32  ;;  %vm994_vm2 = vcmask 64512   ;;  %v991_v34 = vld [vmem:[#allocation2 + $0x8] sm:$0xff]  ;;  %vm884_vm4 = vcmask 261120   ;;  %v3096_v40 = vmov 0   ;;  %s3097_s20 = smov 120  }
 0x214   : > { %v990_v33 = vld [vmem:[#allocation2] sm:$0xff]  ;;  %2459 = vmatprep.subr.bf16.mxu1 %v3093_v29  ;;  %vm3604_vm3 = vmpackc.low %vm994_vm2, %vm994_vm2  ;;  %2365 = vmatprep.mubr.msk.f32.mxu1 %vm3094_vm1, %v3095_v32  ;;  %v2457_v36 = vpack.c.bf16 %v876_v31, %v875_v28  ;;  %v3635_v48 = vshrl.u32 %v967_v47, 7  ;;  %vm1074_vm6 = vcmask 130048   ;;  %s3098_s28 = smov 112   ;;  %s3099_s7 = smov 104   ;;  %v1334_v35 = vld [vmem:[#allocation16 + $0x8] sm:$0xff] }
 0x215   : > { %2455 = vmatpush3.bf16.msra.mxu0 %v2454_v30  ;;  %v2460_v37 = vpack.c.bf16 %v991_v34, %v990_v33  ;;  %v872_v38 = vld [vmem:[%s3562_s13] sm:$0xff]  ;;  %2665 = vset.pattern.permute.xlu0 %v3096_v40  ;;  %v3631_v46 = vpack.i.bf16 %v991_v34, %v990_v33  ;;  %vm976_vm7 = vcmask 122880   ;;  %s3921_s13 = sld [smem:[#allocation29_spill]]  ;;  %s3923_s12 = sld [smem:[#allocation32_spill]] }
 0x216   : > { %2456 = vmatprep.subr.bf16.mxu0 %v3093_v29  ;;  %v3620_v39 = vld [vmem:[%s3567_s0] sm:$0xff]  ;;  %2696 = vset.pattern.permute.xlu1 %v3096_v40  ;;  %v969_v49 = vsub.s32 0, %v3635_v48  ;;  %s3924_s30 = sld [smem:[#allocation46_spill]]  ;;  %s2006_s14 = sshll.u32 %s658_s5, 4  ;;  %s3743_s14 = int_to_ptr.vmem [resolvable:$true] %s2006_s14 }
 0x217   : > { %2462 = vmatpush3.bf16.xpose.msk.msra.mxu1 %vm3604_vm3, %v2460_v37  ;;  %963 = vperm.xlu0 %2665, %v3620_v39   ;;  %v2249_v41 = vld [vmem:[#allocation12] ss:$0 sm:$0xff]  ;;  %v3640_v50 = vld [vmem:[%s571_s27] sm:$0x1]  ;;  %v993_v1 = vld [vmem:[#allocation3 + $0x8] sm:$0xff]  ;;  %s3920_s27 = sld [smem:[#allocation30_spill]] }
 0x218   : > { %2463 = vmatprep.subr.bf16.mxu1 %v3093_v29  ;;  %2667 = vrot.lane.b32.xlu1 %v3631_v46, %s3097_s20  ;;  %v970_v51 = vrot.slane %v3640_v50, %v969_v49  ;;  %v992_v0 = vld [vmem:[#allocation3] sm:$0xff]  ;;  %vm981_vm9 = vcmp.ne.f32.partialorder %v3620_v39, 0.0  ;;  %s3925_s25 = sld [smem:[#allocation47_spill]] }
 0x219   : > { %2458 = vmatpush3.bf16.msra.mxu0 %v2457_v36  ;;  %v2464_v2 = vpack.c.bf16 %v993_v1, %v992_v0  ;;  %v3678_v30 = vpack.i.bf16 %v993_v1, %v992_v0 }
 0x21a   : > { %2470 = vmatprep.subr.bf16.mxu0 %v3093_v29 }
 0x21b   : > { %p3927_p5 = scmp.ne.s32.totalorder %s3923_s12, 0 }
 0x21c   : > { %2359 = vmatmul.mubr.msk.f32.vlgmr.msra.gmra.mrb[0].mxu0 %vm884_vm4, %v872_v38  ;;  %v2271_v39 = vld [vmem:[%s3924_s30] ss:$0 sm:$0xff] }
 0x21d   : > { %2386 = vmatprep.mubr.msk.f32.mxu0 %vm3094_vm1, %v3095_v32  ;;  %s2273_s0 = sshll.u32 %s3920_s27, 1 }
 0x21e   : > { %s2002_s22 = sadd.s32 %s3921_s13, %s2273_s0  ;;  %s3926_s3 = smov %s3925_s25 }
 0x21f   : > { %s2274_s16 = sshll.u32 %s2002_s22, 7 }
 0x220   : > { %s3741_s15 = scalar_lea.hbm %s3925_s25, %s2274_s16 }
 0x28a   : > { %v2668_v3 = vpop.permute.xlu1 %2667 }
 0x28b   : > { %v2670_v6 = vunpack.i.h.bf16 %v2668_v3  ;;  %v2669_v7 = vunpack.i.l.bf16 %v2668_v3 }
 0x28d   : > { %v2467_v10 = vpack.c.bf16 %v2670_v6, %v2669_v7 }
 0x296   : > { %v964_v52 = vpop.permute.xlu0 %963 }
 0x297   : > { %v972_v53 = vmul.f32 %v970_v51, %v964_v52 }
 0x299   : > { %vm973_vm5 = vcmp.eq.f32.partialorder %v972_v53, 0.0 }
 0x29a   : > { %v3646_v54 = vsel %vm973_vm5, -1e+30, %v3095_v32 }
 0x2ef   : > { %v954_v42 = vpop.f32.mrb[0].mxu0 }
 0x2f0   : > { %v955_v43 = vadd.f32 %v2249_v41, %v954_v42  ;;  %v2360_v44 = vpop.f32.mrb[1].mxu0 }
 0x2f2   : > { %v3625_v45 = vmul.f32 0.35355338, %v955_v43 }
 0x2f4   : > { %2366 = vmatmul.mubr.msk.f32.vlgmr.msra.gmra.mrb[0].mxu1 %vm994_vm2, %v3625_v45 }
 0x2f5   : > { %2372 = vmatprep.mubr.msk.f32.mxu1 %vm3094_vm1, %v3095_v32  ;;  %2465 = vmatpush3.bf16.msra.mxu1 %v2464_v2 }
 0x2f6   : > { %2466 = vmatprep.subr.bf16.mxu1 %v3093_v29 }
 0x3c7   : > { %v1070_v55 = vpop.f32.mrb[0].mxu1 }
 0x3c8   : > { %v1071_v56 = vadd.f32 %v1070_v55, %v3646_v54  ;;  %v2367_v57 = vpop.f32.mrb[1].mxu1 }
 0x3ca   : > { %v1075_v58 = vsel %vm1074_vm6, %v1071_v56, -inf }
 0x3cb   : > { %1076 = vmax.xlane.f32.xlu0 %v1075_v58 }
 0x458   : > { %v1077_v59 = vpop.xlane.xlu0 %1076 }
 0x459   : > { %v1078_v60 = vsub.f32 %v1071_v56, %v1077_v59 }
 0x45b   : > { %v1079_v61 = vmul.f32 1.442695, %v1078_v60  ;;  %v1159_v60 = vld [vmem:[#allocation16] sm:$0xff] }
 0x45d   : > { %2697 = vpow2.f32 %v1079_v61 }
 0x467   : > { %v2698_v62 = vpop.eup %2697 }
 0x468   : > { %v1081_v63 = vsel %vm1074_vm6, %v2698_v62, 0.0 }
 0x469   : > { %1082 = vadd.xlane.f32.xlu1 %v1081_v63 }
 0x47a   : > { %1160 = vrot.lane.b32.xlu1 %v3625_v45, %s3097_s20 }
 0x47e   : > { %2672 = vrot.lane.b32.xlu1 %v3631_v46, %s3098_s28 }
 0x482   : > { %1481 = vrot.lane.b32.xlu1 %v3625_v45, %s3098_s28 }
 0x4f6   : > { %v1083_v4 = vpop.xlane.xlu1 %1082 }
 0x4f7   : > { %2699 = vrcp.f32 %v1083_v4 }
 0x4fa   : > { %v1161_v5 = vpop.permute.xlu1 %1160 }
 0x4fe   : > { %v2673_v11 = vpop.permute.xlu1 %2672 }
 0x4ff   : > { %v2675_v12 = vunpack.i.h.bf16 %v2673_v11  ;;  %v2674_v13 = vunpack.i.l.bf16 %v2673_v11 }
 0x501   : > { %v2700_v8 = vpop.eup %2699  ;;  %v2474_v14 = vpack.c.bf16 %v2675_v12, %v2674_v13  ;;  %v975_v13 = vand.u32 2147483647, %v3640_v50 }
 0x502   : > { %v1085_v9 = vmul.f32 %v2700_v8, %v2698_v62  ;;  %v1482_v15 = vpop.permute.xlu1 %1481 }
 0x504   : > { %2373 = vmatmul.mubr.msk.f32.vlgmr.msra.gmra.mrb[2].mxu1 %vm1074_vm6, %v1085_v9 }
 0x505   : > { %2469 = vmatpush3.bf16.xpose.msk.msra.mxu1 %vm3604_vm3, %v2467_v10  ;;  %2379 = vmatprep.mubr.msk.f32.mxu1 %vm3094_vm1, %v3095_v32 }
 0x506   : > { %2473 = vmatprep.subr.bf16.mxu1 %v3093_v29 }
 0x50c   : > { %2380 = vmatmul.mubr.msk.f32.vlgmr.msra.gmra.mrb[4].mxu1 %vm994_vm2, %v1161_v5 }
 0x50d   : > { %2476 = vmatpush3.bf16.xpose.msk.msra.mxu1 %vm3604_vm3, %v2474_v14  ;;  %2403 = vmatprep.mubr.msk.f32.mxu1 %vm3094_vm1, %v3095_v32  ;;  %v977_v14 = vsel %vm976_vm7, %v975_v13, 0.0 }
 0x50e   : > { %2480 = vmatprep.subr.bf16.mxu1 %v3093_v29 }
 0x514   : > { %2404 = vmatmul.mubr.msk.f32.vlgmr.msra.gmra.mrb[6].mxu1 %vm994_vm2, %v1482_v15 }
 0x515   : > { %2422 = vmatprep.mubr.msk.f32.mxu1 %vm3094_vm1, %v3095_v32 }
 0x5d7   : > { %v3673_v16 = vpop.f32.mrb[2].mxu1 }
 0x5d8   : > { %v2374_v17 = vpop.f32.mrb[3].mxu1 }
 0x5df   : > { %v1238_v18 = vpop.f32.mrb[4].mxu1 }
 0x5e0   : > { %v1239_v19 = vadd.f32 %v1238_v18, %v3646_v54  ;;  %v2381_v20 = vpop.f32.mrb[5].mxu1 }
 0x5e2   : > { %v1242_v21 = vsel %vm1074_vm6, %v1239_v19, -inf }
 0x5e3   : > { %1243 = vmax.xlane.f32.xlu1 %v1242_v21 }
 0x5e7   : > { %v1559_v22 = vpop.f32.mrb[6].mxu1 }
 0x5e8   : > { %v2405_v23 = vpop.f32.mrb[7].mxu1  ;;  %v1560_v31 = vadd.f32 %v1559_v22, %v3646_v54  ;;  %v1900_v22 = vld [vmem:[#allocation16 + $0x18] sm:$0xff] }
 0x5ea   : > { %v1563_v33 = vsel %vm1074_vm6, %v1560_v31, -inf }
 0x670   : > { %v1244_v24 = vpop.xlane.xlu1 %1243 }
 0x671   : > { %v1245_v25 = vsub.f32 %v1239_v19, %v1244_v24 }
 0x673   : > { %v1246_v26 = vmul.f32 1.442695, %v1245_v25 }
 0x675   : > { %2701 = vpow2.f32 %v1246_v26 }
 0x67f   : > { %v2702_v27 = vpop.eup %2701 }
 0x680   : > { %v1248_v28 = vsel %vm1074_vm6, %v2702_v27, 0.0 }
 0x681   : > { %1249 = vadd.xlane.f32.xlu0 %v1248_v28 }
 0x697   : > { %2677 = vrot.lane.b32.xlu0 %v3678_v30, %s3097_s20  ;;  %s1991_s20 = scalar_lea.sflag [#allocation6], %s656_s2 }
 0x69b   : > { %2682 = vrot.lane.b32.xlu0 %v3631_v46, %s3099_s7 }
 0x69f   : > { %1728 = vrot.lane.b32.xlu0 %v3625_v45, %s3099_s7 }
 0x6be   : > { %1564 = vmax.xlane.f32.xlu0 %v1563_v33 }
 0x70e   : > { %v1250_v34 = vpop.xlane.xlu0 %1249 }
 0x70f   : > { %2703 = vrcp.f32 %v1250_v34 }
 0x712   : > { %v2678_v36 = vpop.permute.xlu0 %2677 }
 0x713   : > { %v2680_v37 = vunpack.i.h.bf16 %v2678_v36  ;;  %v2679_v38 = vunpack.i.l.bf16 %v2678_v36 }
 0x715   : > { %v2471_v41 = vpack.c.bf16 %v2680_v37, %v2679_v38 }
 0x716   : > { %v2683_v42 = vpop.permute.xlu0 %2682 }
 0x717   : > { %v2685_v43 = vunpack.i.h.bf16 %v2683_v42  ;;  %v2684_v44 = vunpack.i.l.bf16 %v2683_v42  ;;  %2472 = vmatpush3.bf16.msra.mxu0 %v2471_v41 }
 0x718   : > { %2389 = vmatprep.subr.mxu0 %v3095_v32 }
 0x719   : > { %v2704_v46 = vpop.eup %2703  ;;  %v2481_v47 = vpack.c.bf16 %v2685_v43, %v2684_v44 }
 0x71a   : > { %v1252_v45 = vmul.f32 %v2704_v46, %v2702_v27  ;;  %v1729_v51 = vpop.permute.xlu0 %1728 }
 0x71b   : > { %2483 = vmatpush3.bf16.xpose.msk.msra.mxu1 %vm3604_vm3, %v2481_v47 }
 0x71c   : > { %2387 = vmatmul.mubr.msk.f32.vlgmr.msra.gmra.mrb[2].mxu0 %vm1074_vm6, %v1252_v45 }
 0x71d   : > { %2391 = vmatprep.mubr.msk.f32.mxu0 %vm3094_vm1, %v3095_v32  ;;  %2390 = vmatpush3.msra.mxu0 %v1334_v35 }
 0x71e   : > { %2394 = vmatprep.subr.mxu0 %v3095_v32 }
 0x722   : > { %2423 = vmatmul.mubr.msk.f32.vlgmr.msra.gmra.mrb[8].mxu1 %vm994_vm2, %v1729_v51 }
 0x74b   : > { %v1565_v52 = vpop.xlane.xlu0 %1564 }
 0x74c   : > { %v1566_v53 = vsub.f32 %v1560_v31, %v1565_v52 }
 0x74e   : > { %v1567_v55 = vmul.f32 1.442695, %v1566_v53 }
 0x750   : > { %2705 = vpow2.f32 %v1567_v55 }
 0x75a   : > { %v2706_v56 = vpop.eup %2705 }
 0x75b   : > { %v1569_v57 = vsel %vm1074_vm6, %v2706_v56, 0.0 }
 0x75c   : > { %1570 = vadd.xlane.f32.xlu1 %v1569_v57 }
 0x76d   : > { %2687 = vrot.lane.b32.xlu1 %v3678_v30, %s3098_s28  ;;  %s2943_s28 = scalar_lea.vmem %s3743_s14, 128 }
 0x76e   : > { %p2944_p10 = scmp.ne.s32.totalorder %s3743_s14, %s2943_s28 }
 0x770   : > { %p2945_p7 = pnand %p2944_p10, %p3927_p5 }
 0x772   : > { %p2946_p4 = pneg %p2945_p7 }
 0x7e9   : > { %v1571_v58 = vpop.xlane.xlu1 %1570 }
 0x7ea   : > { %2707 = vrcp.f32 %v1571_v58 }
 0x7ed   : > { %v2688_v59 = vpop.permute.xlu1 %2687 }
 0x7ee   : > { %v2690_v63 = vunpack.i.h.bf16 %v2688_v59  ;;  %v2689_v0 = vunpack.i.l.bf16 %v2688_v59 }
 0x7ef   : > { %v1330_v61 = vpop.f32.mrb[2].mxu0 }
 0x7f0   : > { %v2388_v62 = vpop.f32.mrb[3].mxu0  ;;  %2392 = vmatmul.mubr.msk.f32.vlgmr.msra.gmra.mrb[4].mxu0 %vm994_vm2, %v1330_v61  ;;  %v2478_v1 = vpack.c.bf16 %v2690_v63, %v2689_v0 }
 0x7f1   : > { %2395 = vmatpush3.msra.mxu0 %v1159_v60  ;;  %2396 = vmatprep.mubr.msk.f32.mxu0 %vm3094_vm1, %v3095_v32 }
 0x7f2   : > { %2477 = vmatprep.subr.bf16.mxu0 %v3093_v29 }
 0x7f4   : > { %v2708_v5 = vpop.eup %2707 }
 0x7f5   : > { %v1806_v2 = vpop.f32.mrb[8].mxu1  ;;  %v1573_v7 = vmul.f32 %v2708_v5, %v2706_v56 }
 0x7f6   : > { %v1807_v3 = vadd.f32 %v1806_v2, %v3646_v54  ;;  %v2424_v4 = vpop.f32.mrb[9].mxu1  ;;  %v1653_v54 = vld [vmem:[#allocation16 + $0x10] sm:$0xff] }
 0x7f8   : > { %2397 = vmatmul.mubr.msk.f32.vlgmr.msra.gmra.mrb[4].mxu0 %vm994_vm2, %v3673_v16  ;;  %v1810_v6 = vsel %vm1074_vm6, %v1807_v3, -inf }
 0x7f9   : > { %1811 = vmax.xlane.f32.xlu1 %v1810_v6  ;;  %2479 = vmatpush3.bf16.msra.mxu0 %v2478_v1 }
 0x7fa   : > { %2410 = vmatprep.mubr.msk.f32.mxu0 %vm3094_vm1, %v3095_v32  ;;  %2413 = vmatprep.subr.mxu0 %v3095_v32 }
 0x7fc   : > { %2411 = vmatmul.mubr.msk.f32.vlgmr.msra.gmra.mrb[6].mxu0 %vm1074_vm6, %v1573_v7 }
 0x7fd   : > { %2415 = vmatprep.mubr.msk.f32.mxu0 %vm3094_vm1, %v3095_v32  ;;  %2414 = vmatpush3.msra.mxu0 %v1653_v54 }
 0x7fe   : > { %2484 = vmatprep.subr.bf16.mxu0 %v3093_v29 }
 0x886   : > { %v1812_v8 = vpop.xlane.xlu1 %1811 }
 0x887   : > { %v1813_v9 = vsub.f32 %v1807_v3, %v1812_v8 }
 0x889   : > { %v1814_v10 = vmul.f32 1.442695, %v1813_v9 }
 0x88b   : > { %2709 = vpow2.f32 %v1814_v10 }
 0x895   : > { %v2710_v11 = vpop.eup %2709 }
 0x896   : > { %v1816_v12 = vsel %vm1074_vm6, %v2710_v11, 0.0 }
 0x897   : > { %1817 = vadd.xlane.f32.xlu0 %v1816_v12 }
 0x8ad   : > { %2692 = vrot.lane.b32.xlu0 %v3678_v30, %s3099_s7  ;;  %s3100_s7 = smov [#allocation18]  }
 0x8ae   : > { %s2947_s27 = sshll.u32 %s3100_s7, 4  ;;  %s2948_s27 = int_to_ptr.vmem [resolvable:$false] %s2947_s27 }
 0x8af   : > { %s2949_s13 = scalar_lea.vmem %s2948_s27, 256  ;;  %p2950_p3 = scmp.lt.s32.totalorder %s3743_s14, %s2948_s27 }
 0x8b0   : > { %p2951_p6 = scmp.lt.s32.totalorder %s2949_s13, %s2943_s28 }
 0x8b2   : > { %p2952_p0 = por %p2951_p6, %p2950_p3 }
 0x8b4   : > { %p2953_p8 = pnand %p2952_p0, %p2946_p4 }
 0x8cc   : > { %978 = vadd.xlane.f32.xlu0 %v977_v14 }
 0x8cf   : > { %v1649_v15 = vpop.f32.mrb[6].mxu0 }
 0x8d0   : > { %v2412_v16 = vpop.f32.mrb[7].mxu0  ;;  %2416 = vmatmul.mubr.msk.f32.vlgmr.msra.gmra.mrb[4].mxu0 %vm994_vm2, %v1649_v15 }
 0x8d1   : > { %2429 = vmatprep.mubr.msk.f32.mxu0 %vm3094_vm1, %v3095_v32 }
 0x924   : > { %v1818_v29 = vpop.xlane.xlu0 %1817 }
 0x925   : > { %2711 = vrcp.f32 %v1818_v29 }
 0x928   : > { %v2693_v17 = vpop.permute.xlu0 %2692 }
 0x929   : > { %v2695_v18 = vunpack.i.h.bf16 %v2693_v17  ;;  %v2694_v19 = vunpack.i.l.bf16 %v2693_v17 }
 0x92b   : > { %v2485_v20 = vpack.c.bf16 %v2695_v18, %v2694_v19 }
 0x92d   : > { %2486 = vmatpush3.bf16.msra.mxu0 %v2485_v20 }
 0x92e   : > { %2432 = vmatprep.subr.mxu0 %v3095_v32 }
 0x92f   : > { %v2712_v50 = vpop.eup %2711 }
 0x930   : > { %v1820_v21 = vmul.f32 %v2712_v50, %v2710_v11 }
 0x932   : > { %2430 = vmatmul.mubr.msk.f32.vlgmr.msra.gmra.mrb[8].mxu0 %vm1074_vm6, %v1820_v21 }
 0x933   : > { %2433 = vmatpush3.msra.mxu0 %v1900_v22  ;;  %2434 = vmatprep.mubr.msk.f32.mxu0 %vm3094_vm1, %v3095_v32 }
 0x959   : > { %v979_v23 = vpop.xlane.xlu0 %978 }
 0x95a   : > { %vm980_vm8 = vcmp.gt.f32.partialorder %v979_v23, 0.0 }
 0x95b   : > { %v982_v24 = vsel %vm980_vm8, 1, %v3096_v40 }
 0x95c   : > { %v986_v25 = vrot.slane %v982_v24, %v969_v49 }
 0x95e   : > { %vm987_vm10 = vcmp.eq.s32.totalorder %v986_v25, 1 }
 0x95f   : > { %vm988_vm11 = vmand %vm981_vm9, %vm987_vm10 }
 0x960   : > { %v989_v26 = vsel %vm988_vm11, 1.0, %v3095_v32 }
 0x961   : > { %1977 = vperm.xlu1 %2696, %v989_v26  }
 0x9e0   : > { %v1978_v40 = vpop.permute.xlu1 %1977 }
 0xa05   : > { %v1896_v27 = vpop.f32.mrb[8].mxu0 }
 0xa06   : > { %v2431_v28 = vpop.f32.mrb[9].mxu0  ;;  %2435 = vmatmul.mubr.msk.f32.vlgmr.msra.gmra.mrb[4].mxu0 %vm994_vm2, %v1896_v27 }
 0xad9   : > { %v1970_v30 = vpop.f32.mrb[4].mxu0 }
 0xada   : > { %v1980_v32 = vmul.f32 %v1978_v40, %v1970_v30  ;;  %v2436_v48 = vpop.f32.mrb[5].mxu0 }
 0xadc   : > { %v1988_v49 = vadd.f32 %v2271_v39, %v1980_v32 }
 0xade   : > { %1989 = vst.msk [vmem:[%s658_s5] sm:$0xff] %vm884_vm4, %v1988_v49 }
 0xadf   : > { %2956 = shalt.err (!%p2953_p8)
}
 0xae0   : > { %s2957_s2 = scalar_lea.hbm %s3741_s15, 128  ;;  %s2961_s23 = scalar_lea.hbm %s3926_s3, 512 }
 0xae1   : > { %p2958_p12 = scmp.ne.s32.totalorder %s3741_s15, %s2957_s2  ;;  %p2962_p11 = scmp.lt.u32.totalorder %s3741_s15, %s3926_s3 }
 0xae2   : > { %p2963_p9 = scmp.lt.u32.totalorder %s2961_s23, %s2957_s2  ;;  %p2965_p10 = scmp.lt.u32.totalorder %s2957_s2, %s3741_s15 }
 0xae3   : > { %p2959_p1 = pnand %p2958_p12, %p3927_p5 }
 0xae4   : > { %p2964_p2 = por %p2963_p9, %p2962_p11 }
 0xae5   : > { %p2960_p13 = pneg %p2959_p1 }
 0xae6   : > { %p2966_p7 = por %p2965_p10, %p2964_p2 }
 0xae8   : > { %p2967_p4 = pnand %p2966_p7, %p2960_p13 }
 0xaea   : > { %2970 = shalt.err (!%p2967_p4)
}
 0xaeb   : > { %2519 = dma.vmem_to_hbm [thread:$0]  (%p3927_p5), %s3743_s14, 128, %s3741_s15, %s1991_s20  }
 0xaec PF: > { %s3928_s26 = sld [smem:[#allocation25_spill]]  ;;  %s3929_s24 = sld [smem:[#allocation33_spill]] }
 0xaed   : > { %p2562_p3 = scmp.ge.s32.totalorder %s3081_s18, 2 }
 0xaf2   : > { %s2018_s30 = sand.u32 1, %s3928_s26   ;;  %p3930_p6 = scmp.ne.s32.totalorder %s3929_s24, 0 }
 0xaf3   : > { %s2019_s16 = scalar_lea.sflag [#allocation6], %s2018_s30 }
 0xaf4   : > { %p2548_p0 = pnand %p2562_p3, %p3930_p6 }
 0xaf6   : > { %3036 = dma.done.wait (!%p2548_p0), %s2019_s16, 128  }
 0xaf7   : > { %3038 = vsyncadd (!%p2548_p0), %s2019_s16, 4294967168  ;;  %s35_s18 = sadd.s32 1, %s3081_s18   ;;  %s3931_s25 = sld [smem:[#allocation26_spill]] }
 0xaf8   : > { %p32_p8 = scmp.ge.s32.totalorder %s35_s18, 6   ;;  %s3932_s26 = sld [smem:[#allocation27_spill]] }
 0xaf9   : > { %s3933_s27 = sld [smem:[#allocation38_spill]]  ;;  %s3934_s12 = sld [smem:[#allocation28_spill]] }
 0xafa   : > { %s3935_s30 = sld [smem:[#allocation37_spill]]  ;;  %s3936_s14 = sld [smem:[#allocation31_spill]] }
 0xafb   : > { %s3937_s16 = sld [smem:[#allocation35_spill]]  ;;  %s3938_s19 = sld [smem:[#allocation36_spill]] }
 0xafc   : > { %s3939_s28 = smov %s3057_s29  ;;  %s3941_s15 = smov %s3077_s17 }
 0xafd   :  { %34 = sbr.rel (!%p32_p8) target bundleno = 24 (0x18), region = 171 }
 0xaff   : > { %s3940_s29 = smov %s3934_s12 }
 0xb01   : > { %s3942_s17 = smov %s3938_s19 }
 0xb04   :  { %2024 = vsyncpa [#allocation5], 1 }
 0xb05   :  { %2026 = vsyncpa [#allocation5 + $0x1], 1 }
 0xb06   :  { %2027 = vsyncpa [#allocation8], 1 }
 0xb07   :  { %2029 = vsyncpa [#allocation8 + $0x1], 1 }
 0xb08   :  { %2030 = vsyncpa [#allocation11], 1 }
 0xb09   :  { %2031 = vsyncpa [#allocation14], 1 }
 0xb0a   :  { %2032 = vsyncpa [#allocation17], 1 }
 0xb0b   :  { %2033 = vsyncpa [#allocation6], 1 }
 0xb0c   :  { %2035 = vsyncpa [#allocation6 + $0x1], 1 }

</bundles_post_ra>
